<compile_context>
chip_gen: v7x
topology: tpu7x:2x2x1
jax: 0.10.0
libtpu: 0.0.40
codegen_flags: <defaults>
</compile_context>

<pallas_src>
import functools

import jax
import jax.numpy as jnp
from jax import lax
from jax.experimental import pallas as pl
from jax.experimental.pallas import tpu as pltpu


# ---------------------------------------------------------------------------
# Kernel
# ---------------------------------------------------------------------------
def _stock_lstm_kernel(x_ref,        # (T*Bp, I)      time-major, flattened
                       wih0_ref,     # (I, 4Hp)
                       whh0_ref,     # (Hp, 4Hp)
                       b0_ref,       # (1, 4Hp)       b_ih0 + b_hh0
                       w1_ref,       # (2Hp, 4Hp)     stacked [W_ih1; W_hh1]
                       b1_ref,       # (Bp, 4Hp)      pre-broadcast b_ih1 + b_hh1
                       wfc_ref,      # (Hp, O)
                       bfc_ref,      # (Bp, O)        pre-broadcast fc bias
                       out_ref,      # (Bp, O)
                       xproj_ref,    # VMEM scratch (T*Bp, 4Hp)
                       *, seq_len, batch_p, hidden_p, matmul_dtype):
    B = batch_p
    H = hidden_p
    cdt = matmul_dtype

    # ---- (1) batched layer-0 input projection, off the recurrent chain ----
    xproj_ref[...] = (
        jnp.dot(x_ref[...].astype(cdt), wih0_ref[...].astype(cdt),
                preferred_element_type=jnp.float32)
        + b0_ref[...])

    # Weights converted once, resident for the whole loop.
    whh0 = whh0_ref[...].astype(cdt)   # (Hp, 4Hp)
    w1 = w1_ref[...].astype(cdt)       # (2Hp, 4Hp)
    b1 = b1_ref[...]                   # (Bp, 4Hp)  (already broadcast)

    def gates_to_state(gates, c_prev):
        # H is a multiple of 128, so every gate slice is vreg-lane aligned
        # (no XLU sub-vreg lane shifts). PyTorch gate order [i, f, g, o].
        i = jax.nn.sigmoid(gates[:, 0 * H:1 * H])
        f = jax.nn.sigmoid(gates[:, 1 * H:2 * H])
        g = jnp.tanh(gates[:, 2 * H:3 * H])
        o = jax.nn.sigmoid(gates[:, 3 * H:4 * H])
        c_new = f * c_prev + i * g
        h_new = o * jnp.tanh(c_new)
        return h_new, c_new

    def step(t, carry):
        h0, c0, h1, c1 = carry

        # ---- layer 0: only the recurrent matmul is on the serial chain ----
        row = pl.multiple_of(t * B, B)                       # sublane aligned
        g0 = xproj_ref[pl.ds(row, B), :] + jnp.dot(
            h0.astype(cdt), whh0, preferred_element_type=jnp.float32)
        h0, c0 = gates_to_state(g0, c0)

        # ---- layer 1: fused input+recurrent matmul (single MXU launch) ----
        hcat = jnp.concatenate([h0, h1], axis=-1).astype(cdt)   # (Bp, 2Hp)
        g1 = jnp.dot(hcat, w1, preferred_element_type=jnp.float32) + b1
        h1, c1 = gates_to_state(g1, c1)

        return h0, c0, h1, c1

    zeros = jnp.zeros((B, H), jnp.float32)
    _, _, h1, _ = lax.fori_loop(0, seq_len, step,
                                (zeros, zeros, zeros, zeros), unroll=True)

    # ---- final Linear + clamp on the last hidden state ----
    out = jnp.dot(h1.astype(cdt), wfc_ref[...].astype(cdt),
                  preferred_element_type=jnp.float32) + bfc_ref[...]
    out_ref[...] = jnp.clip(out, -5.0, 5.0).astype(out_ref.dtype)


# ---------------------------------------------------------------------------
# Wrapper: padding / layout plumbing + pallas_call
# ---------------------------------------------------------------------------
def _round_up(n, m):
    return (n + m - 1) // m * m


def _pad_axis(a, axis, new_size):
    pad = [(0, 0)] * a.ndim
    pad[axis] = (0, new_size - a.shape[axis])
    return jnp.pad(a, pad)


def _pad_gate_cols(w, H, Hp):
    """w: (..., 4H) with gate blocks [i|f|g|o]; pad each block's width H -> Hp."""
    lead = w.shape[:-1]
    w4 = w.reshape(*lead, 4, H)
    w4 = _pad_axis(w4, -1, Hp)
    return w4.reshape(*lead, 4 * Hp)


def stock_lstm_forward(x_btf, params, *, matmul_dtype=jnp.float32):
    """x_btf: (batch, seq, input_size) float32, PyTorch batch_first layout."""
    B, T, I = x_btf.shape
    H = params["whh0"].shape[0]
    O = params["wfc"].shape[1]

    Bp = _round_up(B, 8)      # sublane alignment
    Hp = _round_up(H, 128)    # lane alignment (gate slices become vreg-aligned)

    # --- input: batch_first -> time-major, pad batch, flatten (T*Bp, I) ---
    x_tbf = jnp.transpose(x_btf, (1, 0, 2))          # (T, B, I)
    x_tbf = _pad_axis(x_tbf, 1, Bp)                  # (T, Bp, I)
    x_flat = x_tbf.reshape(T * Bp, I)

    # --- zero-pad parameters (exactly neutral: padded h/c lanes stay 0) ---
    wih0_p = _pad_gate_cols(params["wih0"], H, Hp)                        # (I, 4Hp)
    whh0_p = _pad_gate_cols(_pad_axis(params["whh0"], 0, Hp), H, Hp)      # (Hp, 4Hp)
    b0_p = _pad_gate_cols(params["b0"], H, Hp)                            # (1, 4Hp)
    wih1_p = _pad_gate_cols(_pad_axis(params["wih1"], 0, Hp), H, Hp)      # (Hp, 4Hp)
    whh1_p = _pad_gate_cols(_pad_axis(params["whh1"], 0, Hp), H, Hp)      # (Hp, 4Hp)
    w1_p = jnp.concatenate([wih1_p, whh1_p], axis=0)                      # (2Hp, 4Hp)
    b1_p = jnp.broadcast_to(_pad_gate_cols(params["b1"], H, Hp), (Bp, 4 * Hp))
    wfc_p = _pad_axis(params["wfc"], 0, Hp)                               # (Hp, O)
    bfc_p = jnp.broadcast_to(params["bfc"], (Bp, O))

    kernel = functools.partial(
        _stock_lstm_kernel,
        seq_len=T, batch_p=Bp, hidden_p=Hp, matmul_dtype=matmul_dtype)

    out = pl.pallas_call(
        kernel,
        out_shape=jax.ShapeDtypeStruct((Bp, O), jnp.float32),
        grid=(1,),
        in_specs=[
            pl.BlockSpec((T * Bp, I), lambda i: (0, 0)),       # x (whole sequence)
            pl.BlockSpec((I, 4 * Hp), lambda i: (0, 0)),       # W_ih layer 0
            pl.BlockSpec((Hp, 4 * Hp), lambda i: (0, 0)),      # W_hh layer 0
            pl.BlockSpec((1, 4 * Hp), lambda i: (0, 0)),       # bias  layer 0
            pl.BlockSpec((2 * Hp, 4 * Hp), lambda i: (0, 0)),  # stacked W layer 1
            pl.BlockSpec((Bp, 4 * Hp), lambda i: (0, 0)),      # bias  layer 1
            pl.BlockSpec((Hp, O), lambda i: (0, 0)),           # fc weight
            pl.BlockSpec((Bp, O), lambda i: (0, 0)),           # fc bias
        ],
        out_specs=pl.BlockSpec((Bp, O), lambda i: (0, 0)),
        scratch_shapes=[
            pltpu.VMEM((T * Bp, 4 * Hp), jnp.float32),         # precomputed x @ W_ih0 + b0
        ],
        compiler_params=pltpu.CompilerParams(
            dimension_semantics=("arbitrary",)),
    )(x_flat, wih0_p, whh0_p, b0_p, w1_p, b1_p, wfc_p, bfc_p)

    return out[:B]


# ---------------------------------------------------------------------------
# Parameter init (PyTorch LSTM/Linear shapes, stored pre-transposed)
# ---------------------------------------------------------------------------
def init_params(key, input_size, hidden_size, output_size):
    H = hidden_size
    k = 1.0 / jnp.sqrt(jnp.float32(H))
    keys = jax.random.split(key, 12)

    def u(kk, shape):
        return jax.random.uniform(kk, shape, jnp.float32, -k, k)

    # layer 0: weight_ih (4H, I), weight_hh (4H, H), b_ih (4H,), b_hh (4H,)
    wih0 = u(keys[0], (4 * H, input_size)).T                       # (I, 4H)
    whh0 = u(keys[1], (4 * H, H)).T                                # (H, 4H)
    b0 = (u(keys[2], (4 * H,)) + u(keys[3], (4 * H,)))[None, :]    # (1, 4H)
    # layer 1: weight_ih (4H, H)
    wih1 = u(keys[4], (4 * H, H)).T
    whh1 = u(keys[5], (4 * H, H)).T
    b1 = (u(keys[6], (4 * H,)) + u(keys[7], (4 * H,)))[None, :]
    # fc: Linear(H, output_size)
    kf = 1.0 / jnp.sqrt(jnp.float32(H))
    wfc = jax.random.uniform(keys[8], (output_size, H), jnp.float32, -kf, kf).T
    bfc = jax.random.uniform(keys[9], (output_size,), jnp.float32, -kf, kf)[None, :]

    return dict(wih0=wih0, whh0=whh0, b0=b0,
                wih1=wih1, whh1=whh1, b1=b1,
                wfc=wfc, bfc=bfc)


# ---------------------------------------------------------------------------
# Pure-JAX reference (identical semantics, for verification)
# ---------------------------------------------------------------------------
def reference_forward(x_btf, params):
    B, T, I = x_btf.shape
    H = params["whh0"].shape[0]

    def cell(x_t, h, c, wih, whh, b):
        g = x_t @ wih + h @ whh + b
        i = jax.nn.sigmoid(g[:, 0 * H:1 * H])
        f = jax.nn.sigmoid(g[:, 1 * H:2 * H])
        gg = jnp.tanh(g[:, 2 * H:3 * H])
        o = jax.nn.sigmoid(g[:, 3 * H:4 * H])
        c = f * c + i * gg
        h = o * jnp.tanh(c)
        return h, c

    h0 = c0 = h1 = c1 = jnp.zeros((B, H), jnp.float32)
    for t in range(T):
        x_t = x_btf[:, t, :]
        h0, c0 = cell(x_t, h0, c0, params["wih0"], params["whh0"], params["b0"])
        h1, c1 = cell(h0, h1, c1, params["wih1"], params["whh1"], params["b1"])
    out = h1 @ params["wfc"] + params["bfc"]
    return jnp.clip(out, -5.0, 5.0)


if __name__ == "__main__":
    # small shapes consistent with the module (module default hidden_size=128)
    batch, seq_len, input_size = 2, 8, 16
    hidden_size, output_size = 128, 2

    key = jax.random.PRNGKey(0)
    k_x, k_p = jax.random.split(key)
    x = jax.random.normal(k_x, (batch, seq_len, input_size), jnp.float32)
    params = init_params(k_p, input_size, hidden_size, output_size)

    ref = reference_forward(x, params)

    # f32 MXU path (strict check)
    out = jax.block_until_ready(stock_lstm_forward(x, params))
    assert out.shape == (batch, output_size)
    assert jnp.allclose(out, ref, atol=1e-4, rtol=1e-4), (out, ref)

    # bf16 MXU path (v6e/v7x recommendation): bf16 matmul operands, f32
    # accumulation, f32 gate/elementwise math and c state.
    out_bf16 = jax.block_until_ready(
        stock_lstm_forward(x, params, matmul_dtype=jnp.bfloat16))
    assert jnp.allclose(out_bf16, ref, atol=5e-2, rtol=5e-2), (out_bf16, ref)

    print("KERNEL_OK")
</pallas_src>

<mosaic_0001>
module attributes {stable_mosaic.version = 11 : i64} {
  func.func @_stock_lstm_kernel(%arg0: i32, %arg1: memref<64x16xf32, #tpu.memory_space<vmem>>, %arg2: memref<16x512xf32, #tpu.memory_space<vmem>>, %arg3: memref<128x512xf32, #tpu.memory_space<vmem>>, %arg4: memref<1x512xf32, #tpu.memory_space<vmem>>, %arg5: memref<256x512xf32, #tpu.memory_space<vmem>>, %arg6: memref<8x512xf32, #tpu.memory_space<vmem>>, %arg7: memref<128x2xf32, #tpu.memory_space<vmem>>, %arg8: memref<8x2xf32, #tpu.memory_space<vmem>>, %arg9: memref<8x2xf32, #tpu.memory_space<vmem>>, %arg10: memref<64x512xf32, #tpu.memory_space<vmem>>) attributes {dimension_semantics = [#tpu.dimension_semantics<arbitrary>], iteration_bounds = array<i64: 1>, scalar_prefetch = 0 : i64, scratch_operands = 1 : i64, tpu.core_type = #tpu.core_type<tc>, window_params = [{pipeline_mode = #tpu.pipeline_mode<synchronous>, transform_indices = @transform_0, window_bounds = array<i64: 64, 16>}, {pipeline_mode = #tpu.pipeline_mode<synchronous>, transform_indices = @transform_1, window_bounds = array<i64: 16, 512>}, {pipeline_mode = #tpu.pipeline_mode<synchronous>, transform_indices = @transform_2, window_bounds = array<i64: 128, 512>}, {pipeline_mode = #tpu.pipeline_mode<synchronous>, transform_indices = @transform_3, window_bounds = array<i64: 1, 512>}, {pipeline_mode = #tpu.pipeline_mode<synchronous>, transform_indices = @transform_4, window_bounds = array<i64: 256, 512>}, {pipeline_mode = #tpu.pipeline_mode<synchronous>, transform_indices = @transform_5, window_bounds = array<i64: 8, 512>}, {pipeline_mode = #tpu.pipeline_mode<synchronous>, transform_indices = @transform_6, window_bounds = array<i64: 128, 2>}, {pipeline_mode = #tpu.pipeline_mode<synchronous>, transform_indices = @transform_7, window_bounds = array<i64: 8, 2>}, {pipeline_mode = #tpu.pipeline_mode<synchronous>, transform_indices = @transform_8, window_bounds = array<i64: 8, 2>}]} {
    %c0 = arith.constant 0 : index
    %c0_0 = arith.constant 0 : index
    %0 = vector.load %arg1[%c0, %c0_0] : memref<64x16xf32, #tpu.memory_space<vmem>>, vector<64x16xf32>
    %c0_1 = arith.constant 0 : index
    %c0_2 = arith.constant 0 : index
    %1 = vector.load %arg2[%c0_1, %c0_2] : memref<16x512xf32, #tpu.memory_space<vmem>>, vector<16x512xf32>
    %cst = arith.constant dense<0.000000e+00> : vector<64x512xf32>
    %2 = tpu.matmul %0, %1, %cst {dimension_numbers = #tpu.dot_dimension_numbers<[1], [0], [0], [1], [0, 0, 1, 1], [], []>} : vector<64x16xf32>, vector<16x512xf32>, vector<64x512xf32> -> vector<64x512xf32>
    %c0_3 = arith.constant 0 : index
    %c0_4 = arith.constant 0 : index
    %3 = vector.load %arg4[%c0_3, %c0_4] : memref<1x512xf32, #tpu.memory_space<vmem>>, vector<1x512xf32>
    %4 = vector.broadcast %3 : vector<1x512xf32> to vector<64x512xf32>
    %5 = arith.addf %2, %4 : vector<64x512xf32>
    %c0_5 = arith.constant 0 : index
    %c0_6 = arith.constant 0 : index
    %6 = vector.load %arg10[%c0_5, %c0_6] : memref<64x512xf32, #tpu.memory_space<vmem>>, vector<64x512xf32>
    tpu.vector_store %arg10[%c0_5, %c0_6], %5 {strides = array<i32>} : memref<64x512xf32, #tpu.memory_space<vmem>>, vector<64x512xf32>,
    %c0_7 = arith.constant 0 : index
    %c0_8 = arith.constant 0 : index
    %7 = vector.load %arg3[%c0_7, %c0_8] : memref<128x512xf32, #tpu.memory_space<vmem>>, vector<128x512xf32>
    %c0_9 = arith.constant 0 : index
    %c0_10 = arith.constant 0 : index
    %8 = vector.load %arg5[%c0_9, %c0_10] : memref<256x512xf32, #tpu.memory_space<vmem>>, vector<256x512xf32>
    %c0_11 = arith.constant 0 : index
    %c0_12 = arith.constant 0 : index
    %9 = vector.load %arg6[%c0_11, %c0_12] : memref<8x512xf32, #tpu.memory_space<vmem>>, vector<8x512xf32>
    %cst_13 = arith.constant 0.000000e+00 : f32
    %10 = vector.broadcast %cst_13 : f32 to vector<8x128xf32>
    %c0_i32 = arith.constant 0 : i32
    %c8_i32 = arith.constant 8 : i32
    %11 = arith.muli %c0_i32, %c8_i32 : i32
    %12 = tpu.assume_multiple %11, 8 : i32
    %13 = arith.index_cast %12 : i32 to index
    %c0_14 = arith.constant 0 : index
    %14 = vector.load %arg10[%13, %c0_14] : memref<64x512xf32, #tpu.memory_space<vmem>>, vector<8x512xf32>
    %cst_15 = arith.constant dense<0.000000e+00> : vector<8x512xf32>
    %15 = tpu.matmul %10, %7, %cst_15 {dimension_numbers = #tpu.dot_dimension_numbers<[1], [0], [0], [1], [0, 0, 1, 1], [], []>} : vector<8x128xf32>, vector<128x512xf32>, vector<8x512xf32> -> vector<8x512xf32>
    %16 = arith.addf %14, %15 : vector<8x512xf32>
    %17 = vector.extract_strided_slice %16 {offsets = [0, 0], sizes = [8, 128], strides = [1, 1]} : vector<8x512xf32> to vector<8x128xf32>
    %18 = arith.negf %17 : vector<8x128xf32>
    %19 = math.exp %18 : vector<8x128xf32>
    %cst_16 = arith.constant 1.000000e+00 : f32
    %20 = vector.broadcast %cst_16 : f32 to vector<8x128xf32>
    %21 = arith.addf %20, %19 : vector<8x128xf32>
    %22 = arith.divf %20, %21 : vector<8x128xf32>
    %23 = vector.extract_strided_slice %16 {offsets = [0, 128], sizes = [8, 128], strides = [1, 1]} : vector<8x512xf32> to vector<8x128xf32>
    %24 = arith.negf %23 : vector<8x128xf32>
    %25 = math.exp %24 : vector<8x128xf32>
    %cst_17 = arith.constant 1.000000e+00 : f32
    %26 = vector.broadcast %cst_17 : f32 to vector<8x128xf32>
    %27 = arith.addf %26, %25 : vector<8x128xf32>
    %28 = arith.divf %26, %27 : vector<8x128xf32>
    %29 = vector.extract_strided_slice %16 {offsets = [0, 256], sizes = [8, 128], strides = [1, 1]} : vector<8x512xf32> to vector<8x128xf32>
    %30 = math.tanh %29 : vector<8x128xf32>
    %31 = vector.extract_strided_slice %16 {offsets = [0, 384], sizes = [8, 128], strides = [1, 1]} : vector<8x512xf32> to vector<8x128xf32>
    %32 = arith.negf %31 : vector<8x128xf32>
    %33 = math.exp %32 : vector<8x128xf32>
    %cst_18 = arith.constant 1.000000e+00 : f32
    %34 = vector.broadcast %cst_18 : f32 to vector<8x128xf32>
    %35 = arith.addf %34, %33 : vector<8x128xf32>
    %36 = arith.divf %34, %35 : vector<8x128xf32>
    %37 = arith.mulf %28, %10 : vector<8x128xf32>
    %38 = arith.mulf %22, %30 : vector<8x128xf32>
    %39 = arith.addf %37, %38 : vector<8x128xf32>
    %40 = math.tanh %39 : vector<8x128xf32>
    %41 = arith.mulf %36, %40 : vector<8x128xf32>
    %42 = tpu.concatenate %41, %10 in 1 : vector<8x128xf32>, vector<8x128xf32> -> vector<8x256xf32>
    %cst_19 = arith.constant dense<0.000000e+00> : vector<8x512xf32>
    %43 = tpu.matmul %42, %8, %cst_19 {dimension_numbers = #tpu.dot_dimension_numbers<[1], [0], [0], [1], [0, 0, 1, 1], [], []>} : vector<8x256xf32>, vector<256x512xf32>, vector<8x512xf32> -> vector<8x512xf32>
    %44 = arith.addf %43, %9 : vector<8x512xf32>
    %45 = vector.extract_strided_slice %44 {offsets = [0, 0], sizes = [8, 128], strides = [1, 1]} : vector<8x512xf32> to vector<8x128xf32>
    %46 = arith.negf %45 : vector<8x128xf32>
    %47 = math.exp %46 : vector<8x128xf32>
    %cst_20 = arith.constant 1.000000e+00 : f32
    %48 = vector.broadcast %cst_20 : f32 to vector<8x128xf32>
    %49 = arith.addf %48, %47 : vector<8x128xf32>
    %50 = arith.divf %48, %49 : vector<8x128xf32>
    %51 = vector.extract_strided_slice %44 {offsets = [0, 128], sizes = [8, 128], strides = [1, 1]} : vector<8x512xf32> to vector<8x128xf32>
    %52 = arith.negf %51 : vector<8x128xf32>
    %53 = math.exp %52 : vector<8x128xf32>
    %cst_21 = arith.constant 1.000000e+00 : f32
    %54 = vector.broadcast %cst_21 : f32 to vector<8x128xf32>
    %55 = arith.addf %54, %53 : vector<8x128xf32>
    %56 = arith.divf %54, %55 : vector<8x128xf32>
    %57 = vector.extract_strided_slice %44 {offsets = [0, 256], sizes = [8, 128], strides = [1, 1]} : vector<8x512xf32> to vector<8x128xf32>
    %58 = math.tanh %57 : vector<8x128xf32>
    %59 = vector.extract_strided_slice %44 {offsets = [0, 384], sizes = [8, 128], strides = [1, 1]} : vector<8x512xf32> to vector<8x128xf32>
    %60 = arith.negf %59 : vector<8x128xf32>
    %61 = math.exp %60 : vector<8x128xf32>
    %cst_22 = arith.constant 1.000000e+00 : f32
    %62 = vector.broadcast %cst_22 : f32 to vector<8x128xf32>
    %63 = arith.addf %62, %61 : vector<8x128xf32>
    %64 = arith.divf %62, %63 : vector<8x128xf32>
    %65 = arith.mulf %56, %10 : vector<8x128xf32>
    %66 = arith.mulf %50, %58 : vector<8x128xf32>
    %67 = arith.addf %65, %66 : vector<8x128xf32>
    %68 = math.tanh %67 : vector<8x128xf32>
    %69 = arith.mulf %64, %68 : vector<8x128xf32>
    %c1_i32 = arith.constant 1 : i32
    %c8_i32_23 = arith.constant 8 : i32
    %70 = arith.muli %c1_i32, %c8_i32_23 : i32
    %71 = tpu.assume_multiple %70, 8 : i32
    %72 = arith.index_cast %71 : i32 to index
    %c0_24 = arith.constant 0 : index
    %73 = vector.load %arg10[%72, %c0_24] : memref<64x512xf32, #tpu.memory_space<vmem>>, vector<8x512xf32>
    %cst_25 = arith.constant dense<0.000000e+00> : vector<8x512xf32>
    %74 = tpu.matmul %41, %7, %cst_25 {dimension_numbers = #tpu.dot_dimension_numbers<[1], [0], [0], [1], [0, 0, 1, 1], [], []>} : vector<8x128xf32>, vector<128x512xf32>, vector<8x512xf32> -> vector<8x512xf32>
    %75 = arith.addf %73, %74 : vector<8x512xf32>
    %76 = vector.extract_strided_slice %75 {offsets = [0, 0], sizes = [8, 128], strides = [1, 1]} : vector<8x512xf32> to vector<8x128xf32>
    %77 = arith.negf %76 : vector<8x128xf32>
    %78 = math.exp %77 : vector<8x128xf32>
    %cst_26 = arith.constant 1.000000e+00 : f32
    %79 = vector.broadcast %cst_26 : f32 to vector<8x128xf32>
    %80 = arith.addf %79, %78 : vector<8x128xf32>
    %81 = arith.divf %79, %80 : vector<8x128xf32>
    %82 = vector.extract_strided_slice %75 {offsets = [0, 128], sizes = [8, 128], strides = [1, 1]} : vector<8x512xf32> to vector<8x128xf32>
    %83 = arith.negf %82 : vector<8x128xf32>
    %84 = math.exp %83 : vector<8x128xf32>
    %cst_27 = arith.constant 1.000000e+00 : f32
    %85 = vector.broadcast %cst_27 : f32 to vector<8x128xf32>
    %86 = arith.addf %85, %84 : vector<8x128xf32>
    %87 = arith.divf %85, %86 : vector<8x128xf32>
    %88 = vector.extract_strided_slice %75 {offsets = [0, 256], sizes = [8, 128], strides = [1, 1]} : vector<8x512xf32> to vector<8x128xf32>
    %89 = math.tanh %88 : vector<8x128xf32>
    %90 = vector.extract_strided_slice %75 {offsets = [0, 384], sizes = [8, 128], strides = [1, 1]} : vector<8x512xf32> to vector<8x128xf32>
    %91 = arith.negf %90 : vector<8x128xf32>
    %92 = math.exp %91 : vector<8x128xf32>
    %cst_28 = arith.constant 1.000000e+00 : f32
    %93 = vector.broadcast %cst_28 : f32 to vector<8x128xf32>
    %94 = arith.addf %93, %92 : vector<8x128xf32>
    %95 = arith.divf %93, %94 : vector<8x128xf32>
    %96 = arith.mulf %87, %39 : vector<8x128xf32>
    %97 = arith.mulf %81, %89 : vector<8x128xf32>
    %98 = arith.addf %96, %97 : vector<8x128xf32>
    %99 = math.tanh %98 : vector<8x128xf32>
    %100 = arith.mulf %95, %99 : vector<8x128xf32>
    %101 = tpu.concatenate %100, %69 in 1 : vector<8x128xf32>, vector<8x128xf32> -> vector<8x256xf32>
    %cst_29 = arith.constant dense<0.000000e+00> : vector<8x512xf32>
    %102 = tpu.matmul %101, %8, %cst_29 {dimension_numbers = #tpu.dot_dimension_numbers<[1], [0], [0], [1], [0, 0, 1, 1], [], []>} : vector<8x256xf32>, vector<256x512xf32>, vector<8x512xf32> -> vector<8x512xf32>
    %103 = arith.addf %102, %9 : vector<8x512xf32>
    %104 = vector.extract_strided_slice %103 {offsets = [0, 0], sizes = [8, 128], strides = [1, 1]} : vector<8x512xf32> to vector<8x128xf32>
    %105 = arith.negf %104 : vector<8x128xf32>
    %106 = math.exp %105 : vector<8x128xf32>
    %cst_30 = arith.constant 1.000000e+00 : f32
    %107 = vector.broadcast %cst_30 : f32 to vector<8x128xf32>
    %108 = arith.addf %107, %106 : vector<8x128xf32>
    %109 = arith.divf %107, %108 : vector<8x128xf32>
    %110 = vector.extract_strided_slice %103 {offsets = [0, 128], sizes = [8, 128], strides = [1, 1]} : vector<8x512xf32> to vector<8x128xf32>
    %111 = arith.negf %110 : vector<8x128xf32>
    %112 = math.exp %111 : vector<8x128xf32>
    %cst_31 = arith.constant 1.000000e+00 : f32
    %113 = vector.broadcast %cst_31 : f32 to vector<8x128xf32>
    %114 = arith.addf %113, %112 : vector<8x128xf32>
    %115 = arith.divf %113, %114 : vector<8x128xf32>
    %116 = vector.extract_strided_slice %103 {offsets = [0, 256], sizes = [8, 128], strides = [1, 1]} : vector<8x512xf32> to vector<8x128xf32>
    %117 = math.tanh %116 : vector<8x128xf32>
    %118 = vector.extract_strided_slice %103 {offsets = [0, 384], sizes = [8, 128], strides = [1, 1]} : vector<8x512xf32> to vector<8x128xf32>
    %119 = arith.negf %118 : vector<8x128xf32>
    %120 = math.exp %119 : vector<8x128xf32>
    %cst_32 = arith.constant 1.000000e+00 : f32
    %121 = vector.broadcast %cst_32 : f32 to vector<8x128xf32>
    %122 = arith.addf %121, %120 : vector<8x128xf32>
    %123 = arith.divf %121, %122 : vector<8x128xf32>
    %124 = arith.mulf %115, %67 : vector<8x128xf32>
    %125 = arith.mulf %109, %117 : vector<8x128xf32>
    %126 = arith.addf %124, %125 : vector<8x128xf32>
    %127 = math.tanh %126 : vector<8x128xf32>
    %128 = arith.mulf %123, %127 : vector<8x128xf32>
    %c2_i32 = arith.constant 2 : i32
    %c8_i32_33 = arith.constant 8 : i32
    %129 = arith.muli %c2_i32, %c8_i32_33 : i32
    %130 = tpu.assume_multiple %129, 8 : i32
    %131 = arith.index_cast %130 : i32 to index
    %c0_34 = arith.constant 0 : index
    %132 = vector.load %arg10[%131, %c0_34] : memref<64x512xf32, #tpu.memory_space<vmem>>, vector<8x512xf32>
    %cst_35 = arith.constant dense<0.000000e+00> : vector<8x512xf32>
    %133 = tpu.matmul %100, %7, %cst_35 {dimension_numbers = #tpu.dot_dimension_numbers<[1], [0], [0], [1], [0, 0, 1, 1], [], []>} : vector<8x128xf32>, vector<128x512xf32>, vector<8x512xf32> -> vector<8x512xf32>
    %134 = arith.addf %132, %133 : vector<8x512xf32>
    %135 = vector.extract_strided_slice %134 {offsets = [0, 0], sizes = [8, 128], strides = [1, 1]} : vector<8x512xf32> to vector<8x128xf32>
    %136 = arith.negf %135 : vector<8x128xf32>
    %137 = math.exp %136 : vector<8x128xf32>
    %cst_36 = arith.constant 1.000000e+00 : f32
    %138 = vector.broadcast %cst_36 : f32 to vector<8x128xf32>
    %139 = arith.addf %138, %137 : vector<8x128xf32>
    %140 = arith.divf %138, %139 : vector<8x128xf32>
    %141 = vector.extract_strided_slice %134 {offsets = [0, 128], sizes = [8, 128], strides = [1, 1]} : vector<8x512xf32> to vector<8x128xf32>
    %142 = arith.negf %141 : vector<8x128xf32>
    %143 = math.exp %142 : vector<8x128xf32>
    %cst_37 = arith.constant 1.000000e+00 : f32
    %144 = vector.broadcast %cst_37 : f32 to vector<8x128xf32>
    %145 = arith.addf %144, %143 : vector<8x128xf32>
    %146 = arith.divf %144, %145 : vector<8x128xf32>
    %147 = vector.extract_strided_slice %134 {offsets = [0, 256], sizes = [8, 128], strides = [1, 1]} : vector<8x512xf32> to vector<8x128xf32>
    %148 = math.tanh %147 : vector<8x128xf32>
    %149 = vector.extract_strided_slice %134 {offsets = [0, 384], sizes = [8, 128], strides = [1, 1]} : vector<8x512xf32> to vector<8x128xf32>
    %150 = arith.negf %149 : vector<8x128xf32>
    %151 = math.exp %150 : vector<8x128xf32>
    %cst_38 = arith.constant 1.000000e+00 : f32
    %152 = vector.broadcast %cst_38 : f32 to vector<8x128xf32>
    %153 = arith.addf %152, %151 : vector<8x128xf32>
    %154 = arith.divf %152, %153 : vector<8x128xf32>
    %155 = arith.mulf %146, %98 : vector<8x128xf32>
    %156 = arith.mulf %140, %148 : vector<8x128xf32>
    %157 = arith.addf %155, %156 : vector<8x128xf32>
    %158 = math.tanh %157 : vector<8x128xf32>
    %159 = arith.mulf %154, %158 : vector<8x128xf32>
    %160 = tpu.concatenate %159, %128 in 1 : vector<8x128xf32>, vector<8x128xf32> -> vector<8x256xf32>
    %cst_39 = arith.constant dense<0.000000e+00> : vector<8x512xf32>
    %161 = tpu.matmul %160, %8, %cst_39 {dimension_numbers = #tpu.dot_dimension_numbers<[1], [0], [0], [1], [0, 0, 1, 1], [], []>} : vector<8x256xf32>, vector<256x512xf32>, vector<8x512xf32> -> vector<8x512xf32>
    %162 = arith.addf %161, %9 : vector<8x512xf32>
    %163 = vector.extract_strided_slice %162 {offsets = [0, 0], sizes = [8, 128], strides = [1, 1]} : vector<8x512xf32> to vector<8x128xf32>
    %164 = arith.negf %163 : vector<8x128xf32>
    %165 = math.exp %164 : vector<8x128xf32>
    %cst_40 = arith.constant 1.000000e+00 : f32
    %166 = vector.broadcast %cst_40 : f32 to vector<8x128xf32>
    %167 = arith.addf %166, %165 : vector<8x128xf32>
    %168 = arith.divf %166, %167 : vector<8x128xf32>
    %169 = vector.extract_strided_slice %162 {offsets = [0, 128], sizes = [8, 128], strides = [1, 1]} : vector<8x512xf32> to vector<8x128xf32>
    %170 = arith.negf %169 : vector<8x128xf32>
    %171 = math.exp %170 : vector<8x128xf32>
    %cst_41 = arith.constant 1.000000e+00 : f32
    %172 = vector.broadcast %cst_41 : f32 to vector<8x128xf32>
    %173 = arith.addf %172, %171 : vector<8x128xf32>
    %174 = arith.divf %172, %173 : vector<8x128xf32>
    %175 = vector.extract_strided_slice %162 {offsets = [0, 256], sizes = [8, 128], strides = [1, 1]} : vector<8x512xf32> to vector<8x128xf32>
    %176 = math.tanh %175 : vector<8x128xf32>
    %177 = vector.extract_strided_slice %162 {offsets = [0, 384], sizes = [8, 128], strides = [1, 1]} : vector<8x512xf32> to vector<8x128xf32>
    %178 = arith.negf %177 : vector<8x128xf32>
    %179 = math.exp %178 : vector<8x128xf32>
    %cst_42 = arith.constant 1.000000e+00 : f32
    %180 = vector.broadcast %cst_42 : f32 to vector<8x128xf32>
    %181 = arith.addf %180, %179 : vector<8x128xf32>
    %182 = arith.divf %180, %181 : vector<8x128xf32>
    %183 = arith.mulf %174, %126 : vector<8x128xf32>
    %184 = arith.mulf %168, %176 : vector<8x128xf32>
    %185 = arith.addf %183, %184 : vector<8x128xf32>
    %186 = math.tanh %185 : vector<8x128xf32>
    %187 = arith.mulf %182, %186 : vector<8x128xf32>
    %c3_i32 = arith.constant 3 : i32
    %c8_i32_43 = arith.constant 8 : i32
    %188 = arith.muli %c3_i32, %c8_i32_43 : i32
    %189 = tpu.assume_multiple %188, 8 : i32
    %190 = arith.index_cast %189 : i32 to index
    %c0_44 = arith.constant 0 : index
    %191 = vector.load %arg10[%190, %c0_44] : memref<64x512xf32, #tpu.memory_space<vmem>>, vector<8x512xf32>
    %cst_45 = arith.constant dense<0.000000e+00> : vector<8x512xf32>
    %192 = tpu.matmul %159, %7, %cst_45 {dimension_numbers = #tpu.dot_dimension_numbers<[1], [0], [0], [1], [0, 0, 1, 1], [], []>} : vector<8x128xf32>, vector<128x512xf32>, vector<8x512xf32> -> vector<8x512xf32>
    %193 = arith.addf %191, %192 : vector<8x512xf32>
    %194 = vector.extract_strided_slice %193 {offsets = [0, 0], sizes = [8, 128], strides = [1, 1]} : vector<8x512xf32> to vector<8x128xf32>
    %195 = arith.negf %194 : vector<8x128xf32>
    %196 = math.exp %195 : vector<8x128xf32>
    %cst_46 = arith.constant 1.000000e+00 : f32
    %197 = vector.broadcast %cst_46 : f32 to vector<8x128xf32>
    %198 = arith.addf %197, %196 : vector<8x128xf32>
    %199 = arith.divf %197, %198 : vector<8x128xf32>
    %200 = vector.extract_strided_slice %193 {offsets = [0, 128], sizes = [8, 128], strides = [1, 1]} : vector<8x512xf32> to vector<8x128xf32>
    %201 = arith.negf %200 : vector<8x128xf32>
    %202 = math.exp %201 : vector<8x128xf32>
    %cst_47 = arith.constant 1.000000e+00 : f32
    %203 = vector.broadcast %cst_47 : f32 to vector<8x128xf32>
    %204 = arith.addf %203, %202 : vector<8x128xf32>
    %205 = arith.divf %203, %204 : vector<8x128xf32>
    %206 = vector.extract_strided_slice %193 {offsets = [0, 256], sizes = [8, 128], strides = [1, 1]} : vector<8x512xf32> to vector<8x128xf32>
    %207 = math.tanh %206 : vector<8x128xf32>
    %208 = vector.extract_strided_slice %193 {offsets = [0, 384], sizes = [8, 128], strides = [1, 1]} : vector<8x512xf32> to vector<8x128xf32>
    %209 = arith.negf %208 : vector<8x128xf32>
    %210 = math.exp %209 : vector<8x128xf32>
    %cst_48 = arith.constant 1.000000e+00 : f32
    %211 = vector.broadcast %cst_48 : f32 to vector<8x128xf32>
    %212 = arith.addf %211, %210 : vector<8x128xf32>
    %213 = arith.divf %211, %212 : vector<8x128xf32>
    %214 = arith.mulf %205, %157 : vector<8x128xf32>
    %215 = arith.mulf %199, %207 : vector<8x128xf32>
    %216 = arith.addf %214, %215 : vector<8x128xf32>
    %217 = math.tanh %216 : vector<8x128xf32>
    %218 = arith.mulf %213, %217 : vector<8x128xf32>
    %219 = tpu.concatenate %218, %187 in 1 : vector<8x128xf32>, vector<8x128xf32> -> vector<8x256xf32>
    %cst_49 = arith.constant dense<0.000000e+00> : vector<8x512xf32>
    %220 = tpu.matmul %219, %8, %cst_49 {dimension_numbers = #tpu.dot_dimension_numbers<[1], [0], [0], [1], [0, 0, 1, 1], [], []>} : vector<8x256xf32>, vector<256x512xf32>, vector<8x512xf32> -> vector<8x512xf32>
    %221 = arith.addf %220, %9 : vector<8x512xf32>
    %222 = vector.extract_strided_slice %221 {offsets = [0, 0], sizes = [8, 128], strides = [1, 1]} : vector<8x512xf32> to vector<8x128xf32>
    %223 = arith.negf %222 : vector<8x128xf32>
    %224 = math.exp %223 : vector<8x128xf32>
    %cst_50 = arith.constant 1.000000e+00 : f32
    %225 = vector.broadcast %cst_50 : f32 to vector<8x128xf32>
    %226 = arith.addf %225, %224 : vector<8x128xf32>
    %227 = arith.divf %225, %226 : vector<8x128xf32>
    %228 = vector.extract_strided_slice %221 {offsets = [0, 128], sizes = [8, 128], strides = [1, 1]} : vector<8x512xf32> to vector<8x128xf32>
    %229 = arith.negf %228 : vector<8x128xf32>
    %230 = math.exp %229 : vector<8x128xf32>
    %cst_51 = arith.constant 1.000000e+00 : f32
    %231 = vector.broadcast %cst_51 : f32 to vector<8x128xf32>
    %232 = arith.addf %231, %230 : vector<8x128xf32>
    %233 = arith.divf %231, %232 : vector<8x128xf32>
    %234 = vector.extract_strided_slice %221 {offsets = [0, 256], sizes = [8, 128], strides = [1, 1]} : vector<8x512xf32> to vector<8x128xf32>
    %235 = math.tanh %234 : vector<8x128xf32>
    %236 = vector.extract_strided_slice %221 {offsets = [0, 384], sizes = [8, 128], strides = [1, 1]} : vector<8x512xf32> to vector<8x128xf32>
    %237 = arith.negf %236 : vector<8x128xf32>
    %238 = math.exp %237 : vector<8x128xf32>
    %cst_52 = arith.constant 1.000000e+00 : f32
    %239 = vector.broadcast %cst_52 : f32 to vector<8x128xf32>
    %240 = arith.addf %239, %238 : vector<8x128xf32>
    %241 = arith.divf %239, %240 : vector<8x128xf32>
    %242 = arith.mulf %233, %185 : vector<8x128xf32>
    %243 = arith.mulf %227, %235 : vector<8x128xf32>
    %244 = arith.addf %242, %243 : vector<8x128xf32>
    %245 = math.tanh %244 : vector<8x128xf32>
    %246 = arith.mulf %241, %245 : vector<8x128xf32>
    %c4_i32 = arith.constant 4 : i32
    %c8_i32_53 = arith.constant 8 : i32
    %247 = arith.muli %c4_i32, %c8_i32_53 : i32
    %248 = tpu.assume_multiple %247, 8 : i32
    %249 = arith.index_cast %248 : i32 to index
    %c0_54 = arith.constant 0 : index
    %250 = vector.load %arg10[%249, %c0_54] : memref<64x512xf32, #tpu.memory_space<vmem>>, vector<8x512xf32>
    %cst_55 = arith.constant dense<0.000000e+00> : vector<8x512xf32>
    %251 = tpu.matmul %218, %7, %cst_55 {dimension_numbers = #tpu.dot_dimension_numbers<[1], [0], [0], [1], [0, 0, 1, 1], [], []>} : vector<8x128xf32>, vector<128x512xf32>, vector<8x512xf32> -> vector<8x512xf32>
    %252 = arith.addf %250, %251 : vector<8x512xf32>
    %253 = vector.extract_strided_slice %252 {offsets = [0, 0], sizes = [8, 128], strides = [1, 1]} : vector<8x512xf32> to vector<8x128xf32>
    %254 = arith.negf %253 : vector<8x128xf32>
    %255 = math.exp %254 : vector<8x128xf32>
    %cst_56 = arith.constant 1.000000e+00 : f32
    %256 = vector.broadcast %cst_56 : f32 to vector<8x128xf32>
    %257 = arith.addf %256, %255 : vector<8x128xf32>
    %258 = arith.divf %256, %257 : vector<8x128xf32>
    %259 = vector.extract_strided_slice %252 {offsets = [0, 128], sizes = [8, 128], strides = [1, 1]} : vector<8x512xf32> to vector<8x128xf32>
    %260 = arith.negf %259 : vector<8x128xf32>
    %261 = math.exp %260 : vector<8x128xf32>
    %cst_57 = arith.constant 1.000000e+00 : f32
    %262 = vector.broadcast %cst_57 : f32 to vector<8x128xf32>
    %263 = arith.addf %262, %261 : vector<8x128xf32>
    %264 = arith.divf %262, %263 : vector<8x128xf32>
    %265 = vector.extract_strided_slice %252 {offsets = [0, 256], sizes = [8, 128], strides = [1, 1]} : vector<8x512xf32> to vector<8x128xf32>
    %266 = math.tanh %265 : vector<8x128xf32>
    %267 = vector.extract_strided_slice %252 {offsets = [0, 384], sizes = [8, 128], strides = [1, 1]} : vector<8x512xf32> to vector<8x128xf32>
    %268 = arith.negf %267 : vector<8x128xf32>
    %269 = math.exp %268 : vector<8x128xf32>
    %cst_58 = arith.constant 1.000000e+00 : f32
    %270 = vector.broadcast %cst_58 : f32 to vector<8x128xf32>
    %271 = arith.addf %270, %269 : vector<8x128xf32>
    %272 = arith.divf %270, %271 : vector<8x128xf32>
    %273 = arith.mulf %264, %216 : vector<8x128xf32>
    %274 = arith.mulf %258, %266 : vector<8x128xf32>
    %275 = arith.addf %273, %274 : vector<8x128xf32>
    %276 = math.tanh %275 : vector<8x128xf32>
    %277 = arith.mulf %272, %276 : vector<8x128xf32>
    %278 = tpu.concatenate %277, %246 in 1 : vector<8x128xf32>, vector<8x128xf32> -> vector<8x256xf32>
    %cst_59 = arith.constant dense<0.000000e+00> : vector<8x512xf32>
    %279 = tpu.matmul %278, %8, %cst_59 {dimension_numbers = #tpu.dot_dimension_numbers<[1], [0], [0], [1], [0, 0, 1, 1], [], []>} : vector<8x256xf32>, vector<256x512xf32>, vector<8x512xf32> -> vector<8x512xf32>
    %280 = arith.addf %279, %9 : vector<8x512xf32>
    %281 = vector.extract_strided_slice %280 {offsets = [0, 0], sizes = [8, 128], strides = [1, 1]} : vector<8x512xf32> to vector<8x128xf32>
    %282 = arith.negf %281 : vector<8x128xf32>
    %283 = math.exp %282 : vector<8x128xf32>
    %cst_60 = arith.constant 1.000000e+00 : f32
    %284 = vector.broadcast %cst_60 : f32 to vector<8x128xf32>
    %285 = arith.addf %284, %283 : vector<8x128xf32>
    %286 = arith.divf %284, %285 : vector<8x128xf32>
    %287 = vector.extract_strided_slice %280 {offsets = [0, 128], sizes = [8, 128], strides = [1, 1]} : vector<8x512xf32> to vector<8x128xf32>
    %288 = arith.negf %287 : vector<8x128xf32>
    %289 = math.exp %288 : vector<8x128xf32>
    %cst_61 = arith.constant 1.000000e+00 : f32
    %290 = vector.broadcast %cst_61 : f32 to vector<8x128xf32>
    %291 = arith.addf %290, %289 : vector<8x128xf32>
    %292 = arith.divf %290, %291 : vector<8x128xf32>
    %293 = vector.extract_strided_slice %280 {offsets = [0, 256], sizes = [8, 128], strides = [1, 1]} : vector<8x512xf32> to vector<8x128xf32>
    %294 = math.tanh %293 : vector<8x128xf32>
    %295 = vector.extract_strided_slice %280 {offsets = [0, 384], sizes = [8, 128], strides = [1, 1]} : vector<8x512xf32> to vector<8x128xf32>
    %296 = arith.negf %295 : vector<8x128xf32>
    %297 = math.exp %296 : vector<8x128xf32>
    %cst_62 = arith.constant 1.000000e+00 : f32
    %298 = vector.broadcast %cst_62 : f32 to vector<8x128xf32>
    %299 = arith.addf %298, %297 : vector<8x128xf32>
    %300 = arith.divf %298, %299 : vector<8x128xf32>
    %301 = arith.mulf %292, %244 : vector<8x128xf32>
    %302 = arith.mulf %286, %294 : vector<8x128xf32>
    %303 = arith.addf %301, %302 : vector<8x128xf32>
    %304 = math.tanh %303 : vector<8x128xf32>
    %305 = arith.mulf %300, %304 : vector<8x128xf32>
    %c5_i32 = arith.constant 5 : i32
    %c8_i32_63 = arith.constant 8 : i32
    %306 = arith.muli %c5_i32, %c8_i32_63 : i32
    %307 = tpu.assume_multiple %306, 8 : i32
    %308 = arith.index_cast %307 : i32 to index
    %c0_64 = arith.constant 0 : index
    %309 = vector.load %arg10[%308, %c0_64] : memref<64x512xf32, #tpu.memory_space<vmem>>, vector<8x512xf32>
    %cst_65 = arith.constant dense<0.000000e+00> : vector<8x512xf32>
    %310 = tpu.matmul %277, %7, %cst_65 {dimension_numbers = #tpu.dot_dimension_numbers<[1], [0], [0], [1], [0, 0, 1, 1], [], []>} : vector<8x128xf32>, vector<128x512xf32>, vector<8x512xf32> -> vector<8x512xf32>
    %311 = arith.addf %309, %310 : vector<8x512xf32>
    %312 = vector.extract_strided_slice %311 {offsets = [0, 0], sizes = [8, 128], strides = [1, 1]} : vector<8x512xf32> to vector<8x128xf32>
    %313 = arith.negf %312 : vector<8x128xf32>
    %314 = math.exp %313 : vector<8x128xf32>
    %cst_66 = arith.constant 1.000000e+00 : f32
    %315 = vector.broadcast %cst_66 : f32 to vector<8x128xf32>
    %316 = arith.addf %315, %314 : vector<8x128xf32>
    %317 = arith.divf %315, %316 : vector<8x128xf32>
    %318 = vector.extract_strided_slice %311 {offsets = [0, 128], sizes = [8, 128], strides = [1, 1]} : vector<8x512xf32> to vector<8x128xf32>
    %319 = arith.negf %318 : vector<8x128xf32>
    %320 = math.exp %319 : vector<8x128xf32>
    %cst_67 = arith.constant 1.000000e+00 : f32
    %321 = vector.broadcast %cst_67 : f32 to vector<8x128xf32>
    %322 = arith.addf %321, %320 : vector<8x128xf32>
    %323 = arith.divf %321, %322 : vector<8x128xf32>
    %324 = vector.extract_strided_slice %311 {offsets = [0, 256], sizes = [8, 128], strides = [1, 1]} : vector<8x512xf32> to vector<8x128xf32>
    %325 = math.tanh %324 : vector<8x128xf32>
    %326 = vector.extract_strided_slice %311 {offsets = [0, 384], sizes = [8, 128], strides = [1, 1]} : vector<8x512xf32> to vector<8x128xf32>
    %327 = arith.negf %326 : vector<8x128xf32>
    %328 = math.exp %327 : vector<8x128xf32>
    %cst_68 = arith.constant 1.000000e+00 : f32
    %329 = vector.broadcast %cst_68 : f32 to vector<8x128xf32>
    %330 = arith.addf %329, %328 : vector<8x128xf32>
    %331 = arith.divf %329, %330 : vector<8x128xf32>
    %332 = arith.mulf %323, %275 : vector<8x128xf32>
    %333 = arith.mulf %317, %325 : vector<8x128xf32>
    %334 = arith.addf %332, %333 : vector<8x128xf32>
    %335 = math.tanh %334 : vector<8x128xf32>
    %336 = arith.mulf %331, %335 : vector<8x128xf32>
    %337 = tpu.concatenate %336, %305 in 1 : vector<8x128xf32>, vector<8x128xf32> -> vector<8x256xf32>
    %cst_69 = arith.constant dense<0.000000e+00> : vector<8x512xf32>
    %338 = tpu.matmul %337, %8, %cst_69 {dimension_numbers = #tpu.dot_dimension_numbers<[1], [0], [0], [1], [0, 0, 1, 1], [], []>} : vector<8x256xf32>, vector<256x512xf32>, vector<8x512xf32> -> vector<8x512xf32>
    %339 = arith.addf %338, %9 : vector<8x512xf32>
    %340 = vector.extract_strided_slice %339 {offsets = [0, 0], sizes = [8, 128], strides = [1, 1]} : vector<8x512xf32> to vector<8x128xf32>
    %341 = arith.negf %340 : vector<8x128xf32>
    %342 = math.exp %341 : vector<8x128xf32>
    %cst_70 = arith.constant 1.000000e+00 : f32
    %343 = vector.broadcast %cst_70 : f32 to vector<8x128xf32>
    %344 = arith.addf %343, %342 : vector<8x128xf32>
    %345 = arith.divf %343, %344 : vector<8x128xf32>
    %346 = vector.extract_strided_slice %339 {offsets = [0, 128], sizes = [8, 128], strides = [1, 1]} : vector<8x512xf32> to vector<8x128xf32>
    %347 = arith.negf %346 : vector<8x128xf32>
    %348 = math.exp %347 : vector<8x128xf32>
    %cst_71 = arith.constant 1.000000e+00 : f32
    %349 = vector.broadcast %cst_71 : f32 to vector<8x128xf32>
    %350 = arith.addf %349, %348 : vector<8x128xf32>
    %351 = arith.divf %349, %350 : vector<8x128xf32>
    %352 = vector.extract_strided_slice %339 {offsets = [0, 256], sizes = [8, 128], strides = [1, 1]} : vector<8x512xf32> to vector<8x128xf32>
    %353 = math.tanh %352 : vector<8x128xf32>
    %354 = vector.extract_strided_slice %339 {offsets = [0, 384], sizes = [8, 128], strides = [1, 1]} : vector<8x512xf32> to vector<8x128xf32>
    %355 = arith.negf %354 : vector<8x128xf32>
    %356 = math.exp %355 : vector<8x128xf32>
    %cst_72 = arith.constant 1.000000e+00 : f32
    %357 = vector.broadcast %cst_72 : f32 to vector<8x128xf32>
    %358 = arith.addf %357, %356 : vector<8x128xf32>
    %359 = arith.divf %357, %358 : vector<8x128xf32>
    %360 = arith.mulf %351, %303 : vector<8x128xf32>
    %361 = arith.mulf %345, %353 : vector<8x128xf32>
    %362 = arith.addf %360, %361 : vector<8x128xf32>
    %363 = math.tanh %362 : vector<8x128xf32>
    %364 = arith.mulf %359, %363 : vector<8x128xf32>
    %c6_i32 = arith.constant 6 : i32
    %c8_i32_73 = arith.constant 8 : i32
    %365 = arith.muli %c6_i32, %c8_i32_73 : i32
    %366 = tpu.assume_multiple %365, 8 : i32
    %367 = arith.index_cast %366 : i32 to index
    %c0_74 = arith.constant 0 : index
    %368 = vector.load %arg10[%367, %c0_74] : memref<64x512xf32, #tpu.memory_space<vmem>>, vector<8x512xf32>
    %cst_75 = arith.constant dense<0.000000e+00> : vector<8x512xf32>
    %369 = tpu.matmul %336, %7, %cst_75 {dimension_numbers = #tpu.dot_dimension_numbers<[1], [0], [0], [1], [0, 0, 1, 1], [], []>} : vector<8x128xf32>, vector<128x512xf32>, vector<8x512xf32> -> vector<8x512xf32>
    %370 = arith.addf %368, %369 : vector<8x512xf32>
    %371 = vector.extract_strided_slice %370 {offsets = [0, 0], sizes = [8, 128], strides = [1, 1]} : vector<8x512xf32> to vector<8x128xf32>
    %372 = arith.negf %371 : vector<8x128xf32>
    %373 = math.exp %372 : vector<8x128xf32>
    %cst_76 = arith.constant 1.000000e+00 : f32
    %374 = vector.broadcast %cst_76 : f32 to vector<8x128xf32>
    %375 = arith.addf %374, %373 : vector<8x128xf32>
    %376 = arith.divf %374, %375 : vector<8x128xf32>
    %377 = vector.extract_strided_slice %370 {offsets = [0, 128], sizes = [8, 128], strides = [1, 1]} : vector<8x512xf32> to vector<8x128xf32>
    %378 = arith.negf %377 : vector<8x128xf32>
    %379 = math.exp %378 : vector<8x128xf32>
    %cst_77 = arith.constant 1.000000e+00 : f32
    %380 = vector.broadcast %cst_77 : f32 to vector<8x128xf32>
    %381 = arith.addf %380, %379 : vector<8x128xf32>
    %382 = arith.divf %380, %381 : vector<8x128xf32>
    %383 = vector.extract_strided_slice %370 {offsets = [0, 256], sizes = [8, 128], strides = [1, 1]} : vector<8x512xf32> to vector<8x128xf32>
    %384 = math.tanh %383 : vector<8x128xf32>
    %385 = vector.extract_strided_slice %370 {offsets = [0, 384], sizes = [8, 128], strides = [1, 1]} : vector<8x512xf32> to vector<8x128xf32>
    %386 = arith.negf %385 : vector<8x128xf32>
    %387 = math.exp %386 : vector<8x128xf32>
    %cst_78 = arith.constant 1.000000e+00 : f32
    %388 = vector.broadcast %cst_78 : f32 to vector<8x128xf32>
    %389 = arith.addf %388, %387 : vector<8x128xf32>
    %390 = arith.divf %388, %389 : vector<8x128xf32>
    %391 = arith.mulf %382, %334 : vector<8x128xf32>
    %392 = arith.mulf %376, %384 : vector<8x128xf32>
    %393 = arith.addf %391, %392 : vector<8x128xf32>
    %394 = math.tanh %393 : vector<8x128xf32>
    %395 = arith.mulf %390, %394 : vector<8x128xf32>
    %396 = tpu.concatenate %395, %364 in 1 : vector<8x128xf32>, vector<8x128xf32> -> vector<8x256xf32>
    %cst_79 = arith.constant dense<0.000000e+00> : vector<8x512xf32>
    %397 = tpu.matmul %396, %8, %cst_79 {dimension_numbers = #tpu.dot_dimension_numbers<[1], [0], [0], [1], [0, 0, 1, 1], [], []>} : vector<8x256xf32>, vector<256x512xf32>, vector<8x512xf32> -> vector<8x512xf32>
    %398 = arith.addf %397, %9 : vector<8x512xf32>
    %399 = vector.extract_strided_slice %398 {offsets = [0, 0], sizes = [8, 128], strides = [1, 1]} : vector<8x512xf32> to vector<8x128xf32>
    %400 = arith.negf %399 : vector<8x128xf32>
    %401 = math.exp %400 : vector<8x128xf32>
    %cst_80 = arith.constant 1.000000e+00 : f32
    %402 = vector.broadcast %cst_80 : f32 to vector<8x128xf32>
    %403 = arith.addf %402, %401 : vector<8x128xf32>
    %404 = arith.divf %402, %403 : vector<8x128xf32>
    %405 = vector.extract_strided_slice %398 {offsets = [0, 128], sizes = [8, 128], strides = [1, 1]} : vector<8x512xf32> to vector<8x128xf32>
    %406 = arith.negf %405 : vector<8x128xf32>
    %407 = math.exp %406 : vector<8x128xf32>
    %cst_81 = arith.constant 1.000000e+00 : f32
    %408 = vector.broadcast %cst_81 : f32 to vector<8x128xf32>
    %409 = arith.addf %408, %407 : vector<8x128xf32>
    %410 = arith.divf %408, %409 : vector<8x128xf32>
    %411 = vector.extract_strided_slice %398 {offsets = [0, 256], sizes = [8, 128], strides = [1, 1]} : vector<8x512xf32> to vector<8x128xf32>
    %412 = math.tanh %411 : vector<8x128xf32>
    %413 = vector.extract_strided_slice %398 {offsets = [0, 384], sizes = [8, 128], strides = [1, 1]} : vector<8x512xf32> to vector<8x128xf32>
    %414 = arith.negf %413 : vector<8x128xf32>
    %415 = math.exp %414 : vector<8x128xf32>
    %cst_82 = arith.constant 1.000000e+00 : f32
    %416 = vector.broadcast %cst_82 : f32 to vector<8x128xf32>
    %417 = arith.addf %416, %415 : vector<8x128xf32>
    %418 = arith.divf %416, %417 : vector<8x128xf32>
    %419 = arith.mulf %410, %362 : vector<8x128xf32>
    %420 = arith.mulf %404, %412 : vector<8x128xf32>
    %421 = arith.addf %419, %420 : vector<8x128xf32>
    %422 = math.tanh %421 : vector<8x128xf32>
    %423 = arith.mulf %418, %422 : vector<8x128xf32>
    %c7_i32 = arith.constant 7 : i32
    %c8_i32_83 = arith.constant 8 : i32
    %424 = arith.muli %c7_i32, %c8_i32_83 : i32
    %425 = tpu.assume_multiple %424, 8 : i32
    %426 = arith.index_cast %425 : i32 to index
    %c0_84 = arith.constant 0 : index
    %427 = vector.load %arg10[%426, %c0_84] : memref<64x512xf32, #tpu.memory_space<vmem>>, vector<8x512xf32>
    %cst_85 = arith.constant dense<0.000000e+00> : vector<8x512xf32>
    %428 = tpu.matmul %395, %7, %cst_85 {dimension_numbers = #tpu.dot_dimension_numbers<[1], [0], [0], [1], [0, 0, 1, 1], [], []>} : vector<8x128xf32>, vector<128x512xf32>, vector<8x512xf32> -> vector<8x512xf32>
    %429 = arith.addf %427, %428 : vector<8x512xf32>
    %430 = vector.extract_strided_slice %429 {offsets = [0, 0], sizes = [8, 128], strides = [1, 1]} : vector<8x512xf32> to vector<8x128xf32>
    %431 = arith.negf %430 : vector<8x128xf32>
    %432 = math.exp %431 : vector<8x128xf32>
    %cst_86 = arith.constant 1.000000e+00 : f32
    %433 = vector.broadcast %cst_86 : f32 to vector<8x128xf32>
    %434 = arith.addf %433, %432 : vector<8x128xf32>
    %435 = arith.divf %433, %434 : vector<8x128xf32>
    %436 = vector.extract_strided_slice %429 {offsets = [0, 128], sizes = [8, 128], strides = [1, 1]} : vector<8x512xf32> to vector<8x128xf32>
    %437 = arith.negf %436 : vector<8x128xf32>
    %438 = math.exp %437 : vector<8x128xf32>
    %cst_87 = arith.constant 1.000000e+00 : f32
    %439 = vector.broadcast %cst_87 : f32 to vector<8x128xf32>
    %440 = arith.addf %439, %438 : vector<8x128xf32>
    %441 = arith.divf %439, %440 : vector<8x128xf32>
    %442 = vector.extract_strided_slice %429 {offsets = [0, 256], sizes = [8, 128], strides = [1, 1]} : vector<8x512xf32> to vector<8x128xf32>
    %443 = math.tanh %442 : vector<8x128xf32>
    %444 = vector.extract_strided_slice %429 {offsets = [0, 384], sizes = [8, 128], strides = [1, 1]} : vector<8x512xf32> to vector<8x128xf32>
    %445 = arith.negf %444 : vector<8x128xf32>
    %446 = math.exp %445 : vector<8x128xf32>
    %cst_88 = arith.constant 1.000000e+00 : f32
    %447 = vector.broadcast %cst_88 : f32 to vector<8x128xf32>
    %448 = arith.addf %447, %446 : vector<8x128xf32>
    %449 = arith.divf %447, %448 : vector<8x128xf32>
    %450 = arith.mulf %441, %393 : vector<8x128xf32>
    %451 = arith.mulf %435, %443 : vector<8x128xf32>
    %452 = arith.addf %450, %451 : vector<8x128xf32>
    %453 = math.tanh %452 : vector<8x128xf32>
    %454 = arith.mulf %449, %453 : vector<8x128xf32>
    %455 = tpu.concatenate %454, %423 in 1 : vector<8x128xf32>, vector<8x128xf32> -> vector<8x256xf32>
    %cst_89 = arith.constant dense<0.000000e+00> : vector<8x512xf32>
    %456 = tpu.matmul %455, %8, %cst_89 {dimension_numbers = #tpu.dot_dimension_numbers<[1], [0], [0], [1], [0, 0, 1, 1], [], []>} : vector<8x256xf32>, vector<256x512xf32>, vector<8x512xf32> -> vector<8x512xf32>
    %457 = arith.addf %456, %9 : vector<8x512xf32>
    %458 = vector.extract_strided_slice %457 {offsets = [0, 0], sizes = [8, 128], strides = [1, 1]} : vector<8x512xf32> to vector<8x128xf32>
    %459 = arith.negf %458 : vector<8x128xf32>
    %460 = math.exp %459 : vector<8x128xf32>
    %cst_90 = arith.constant 1.000000e+00 : f32
    %461 = vector.broadcast %cst_90 : f32 to vector<8x128xf32>
    %462 = arith.addf %461, %460 : vector<8x128xf32>
    %463 = arith.divf %461, %462 : vector<8x128xf32>
    %464 = vector.extract_strided_slice %457 {offsets = [0, 128], sizes = [8, 128], strides = [1, 1]} : vector<8x512xf32> to vector<8x128xf32>
    %465 = arith.negf %464 : vector<8x128xf32>
    %466 = math.exp %465 : vector<8x128xf32>
    %cst_91 = arith.constant 1.000000e+00 : f32
    %467 = vector.broadcast %cst_91 : f32 to vector<8x128xf32>
    %468 = arith.addf %467, %466 : vector<8x128xf32>
    %469 = arith.divf %467, %468 : vector<8x128xf32>
    %470 = vector.extract_strided_slice %457 {offsets = [0, 256], sizes = [8, 128], strides = [1, 1]} : vector<8x512xf32> to vector<8x128xf32>
    %471 = math.tanh %470 : vector<8x128xf32>
    %472 = vector.extract_strided_slice %457 {offsets = [0, 384], sizes = [8, 128], strides = [1, 1]} : vector<8x512xf32> to vector<8x128xf32>
    %473 = arith.negf %472 : vector<8x128xf32>
    %474 = math.exp %473 : vector<8x128xf32>
    %cst_92 = arith.constant 1.000000e+00 : f32
    %475 = vector.broadcast %cst_92 : f32 to vector<8x128xf32>
    %476 = arith.addf %475, %474 : vector<8x128xf32>
    %477 = arith.divf %475, %476 : vector<8x128xf32>
    %478 = arith.mulf %469, %421 : vector<8x128xf32>
    %479 = arith.mulf %463, %471 : vector<8x128xf32>
    %480 = arith.addf %478, %479 : vector<8x128xf32>
    %481 = math.tanh %480 : vector<8x128xf32>
    %482 = arith.mulf %477, %481 : vector<8x128xf32>
    %c8_i32_93 = arith.constant 8 : i32
    %c0_94 = arith.constant 0 : index
    %c0_95 = arith.constant 0 : index
    %483 = vector.load %arg7[%c0_94, %c0_95] : memref<128x2xf32, #tpu.memory_space<vmem>>, vector<128x2xf32>
    %cst_96 = arith.constant dense<0.000000e+00> : vector<8x2xf32>
    %484 = tpu.matmul %482, %483, %cst_96 {dimension_numbers = #tpu.dot_dimension_numbers<[1], [0], [0], [1], [0, 0, 1, 1], [], []>} : vector<8x128xf32>, vector<128x2xf32>, vector<8x2xf32> -> vector<8x2xf32>
    %c0_97 = arith.constant 0 : index
    %c0_98 = arith.constant 0 : index
    %485 = vector.load %arg8[%c0_97, %c0_98] : memref<8x2xf32, #tpu.memory_space<vmem>>, vector<8x2xf32>
    %486 = arith.addf %484, %485 : vector<8x2xf32>
    %cst_99 = arith.constant -5.000000e+00 : f32
    %cst_100 = arith.constant 5.000000e+00 : f32
    %487 = vector.broadcast %cst_99 : f32 to vector<8x2xf32>
    %488 = arith.maximumf %487, %486 : vector<8x2xf32>
    %489 = vector.broadcast %cst_100 : f32 to vector<8x2xf32>
    %490 = arith.minimumf %489, %488 : vector<8x2xf32>
    %c0_101 = arith.constant 0 : index
    %c0_102 = arith.constant 0 : index
    %491 = vector.load %arg9[%c0_101, %c0_102] : memref<8x2xf32, #tpu.memory_space<vmem>>, vector<8x2xf32>
    tpu.vector_store %arg9[%c0_101, %c0_102], %490 {strides = array<i32>} : memref<8x2xf32, #tpu.memory_space<vmem>>, vector<8x2xf32>,
    return
  }
  func.func @transform_0(%arg0: i32) -> (i32, i32) {
    %c0_i32 = arith.constant 0 : i32
    %c0_i32_0 = arith.constant 0 : i32
    %c0_i32_1 = arith.constant 0 : i32
    return %c0_i32, %c0_i32_0 : i32, i32
  }
  func.func @transform_1(%arg0: i32) -> (i32, i32) {
    %c0_i32 = arith.constant 0 : i32
    %c0_i32_0 = arith.constant 0 : i32
    %c0_i32_1 = arith.constant 0 : i32
    return %c0_i32, %c0_i32_0 : i32, i32
  }
  func.func @transform_2(%arg0: i32) -> (i32, i32) {
    %c0_i32 = arith.constant 0 : i32
    %c0_i32_0 = arith.constant 0 : i32
    %c0_i32_1 = arith.constant 0 : i32
    return %c0_i32, %c0_i32_0 : i32, i32
  }
  func.func @transform_3(%arg0: i32) -> (i32, i32) {
    %c0_i32 = arith.constant 0 : i32
    %c0_i32_0 = arith.constant 0 : i32
    %c0_i32_1 = arith.constant 0 : i32
    return %c0_i32, %c0_i32_0 : i32, i32
  }
  func.func @transform_4(%arg0: i32) -> (i32, i32) {
    %c0_i32 = arith.constant 0 : i32
    %c0_i32_0 = arith.constant 0 : i32
    %c0_i32_1 = arith.constant 0 : i32
    return %c0_i32, %c0_i32_0 : i32, i32
  }
  func.func @transform_5(%arg0: i32) -> (i32, i32) {
    %c0_i32 = arith.constant 0 : i32
    %c0_i32_0 = arith.constant 0 : i32
    %c0_i32_1 = arith.constant 0 : i32
    return %c0_i32, %c0_i32_0 : i32, i32
  }
  func.func @transform_6(%arg0: i32) -> (i32, i32) {
    %c0_i32 = arith.constant 0 : i32
    %c0_i32_0 = arith.constant 0 : i32
    %c0_i32_1 = arith.constant 0 : i32
    return %c0_i32, %c0_i32_0 : i32, i32
  }
  func.func @transform_7(%arg0: i32) -> (i32, i32) {
    %c0_i32 = arith.constant 0 : i32
    %c0_i32_0 = arith.constant 0 : i32
    %c0_i32_1 = arith.constant 0 : i32
    return %c0_i32, %c0_i32_0 : i32, i32
  }
  func.func @transform_8(%arg0: i32) -> (i32, i32) {
    %c0_i32 = arith.constant 0 : i32
    %c0_i32_0 = arith.constant 0 : i32
    %c0_i32_1 = arith.constant 0 : i32
    return %c0_i32, %c0_i32_0 : i32, i32
  }
}

</mosaic_0001>

<bundles_post_ra>
// kernel: tpu_custom_call.1
= control target key start
LH: loop header
LB: loop body
LE: loop exit
PB: predicated region body
PF: predicated region fallthrough
CT: control target
= control target key end

     0   :  { %13 = vsyncpa [#allocation4], 0  ;;  %s6872_s0 = inlined_call_operand.vmem [shape: f32[64,16], index: 0, kind: input, shape index: {}]   ;;  %s6873_s1 = inlined_call_operand.vmem [shape: f32[16,512], index: 1, kind: input, shape index: {}]   ;;  %s6874_s2 = inlined_call_operand.hbm [shape: f32[128,512], index: 2, kind: input, shape index: {}]   ;;  %s6875_s3 = inlined_call_operand.vmem [shape: f32[1,512], index: 3, kind: input, shape index: {}]   ;;  %s6876_s4 = inlined_call_operand.hbm [shape: f32[256,512], index: 4, kind: input, shape index: {}]   ;;  %s6877_s5 = inlined_call_operand.vmem [shape: f32[8,512], index: 5, kind: input, shape index: {}]   ;;  %s6878_s6 = inlined_call_operand.vmem [shape: f32[128,2], index: 6, kind: input, shape index: {}]   ;;  %s6879_s7 = inlined_call_operand.vmem [shape: f32[8,2], index: 7, kind: input, shape index: {}]   ;;  %s6880_s8 = inlined_call_operand.vmem [shape: f32[8,2], index: 8, kind: output, shape index: {}]  }
   0x1   :  { %14 = vsyncpa [#allocation6], 0  ;;  %s5490_s27 = smov [#allocation3]   ;;  %s5442_s9 = scalar_lea.hbm %s6874_s2, 8192 }
   0x2   :  { %s24_s28 = sshll.u32 %s5490_s27, 4  ;;  %p5443_p0 = scmp.ne.s32.totalorder %s6874_s2, %s5442_s9  ;;  %s25_s28 = int_to_ptr.vmem [resolvable:$true] %s24_s28 }
   0x3   :  { %p5446_p1 = scmp.lt.u32.totalorder %s5442_s9, %s6874_s2 }
   0x5   :  { %p5448_p2 = pnand %p5446_p1, %p5443_p0 }
   0x7   :  { %5451 = shalt.err (!%p5448_p2)
}
   0x8   :  { %s5452_s14 = scalar_lea.vmem %s25_s28, 8192  ;;  %p5457_p4 = scmp.lt.s32.totalorder %s25_s28, %s25_s28 }
   0x9   :  { %p5453_p3 = scmp.ne.s32.totalorder %s25_s28, %s5452_s14  ;;  %p5458_p5 = scmp.lt.s32.totalorder %s5452_s14, %s5452_s14 }
   0xb   :  { %p5459_p6 = por %p5458_p5, %p5457_p4 }
   0xd   :  { %p5460_p7 = pnand %p5459_p6, %p5453_p3 }
   0xf   :  { %5463 = shalt.err (!%p5460_p7)
}
  0x10   :  { %s5491_s15 = smov 512   ;;  %s5492_s16 = smov 32  }
  0x11   :  { %30 = dma.hbm_to_vmem [thread:$0]  %s6874_s2, 8192, %s25_s28, [#allocation4], %s5491_s15, %s5491_s15, %s5492_s16  }
  0x12   :  { %s5493_s19 = smov [#allocation5]   ;;  %s5464_s23 = scalar_lea.hbm %s6876_s4, 16384 }
  0x13   :  { %s38_s20 = sshll.u32 %s5493_s19, 4  ;;  %p5465_p8 = scmp.ne.s32.totalorder %s6876_s4, %s5464_s23  ;;  %s39_s20 = int_to_ptr.vmem [resolvable:$true] %s38_s20 }
  0x14   :  { %p5468_p9 = scmp.lt.u32.totalorder %s5464_s23, %s6876_s4 }
  0x16   :  { %p5470_p10 = pnand %p5468_p9, %p5465_p8 }
  0x18   :  { %5473 = shalt.err (!%p5470_p10)
}
  0x19   :  { %s5474_s29 = scalar_lea.vmem %s39_s20, 16384  ;;  %p5479_p12 = scmp.lt.s32.totalorder %s39_s20, %s39_s20 }
  0x1a   :  { %p5475_p11 = scmp.ne.s32.totalorder %s39_s20, %s5474_s29  ;;  %p5480_p13 = scmp.lt.s32.totalorder %s5474_s29, %s5474_s29 }
  0x1c   :  { %p5481_p0 = por %p5480_p13, %p5479_p12 }
  0x1e   :  { %p5482_p1 = pnand %p5481_p0, %p5475_p11 }
  0x20   :  { %5485 = shalt.err (!%p5482_p1)
}
  0x21   :  { %44 = dma.hbm_to_vmem [thread:$0]  %s6876_s4, 16384, %s39_s20, [#allocation6], %s5491_s15, %s5491_s15, %s5492_s16  }
  0x22   :  { %5486 = dma.done.wait [#allocation4], 8192  }
  0x23   :  { %5487 = vsyncadd [#allocation4], 4294959104 }
  0x24   :  { %5488 = dma.done.wait [#allocation6], 16384  }
  0x25   :  { %5489 = vsyncadd [#allocation6], 4294950912  ;;  %v6881_v0 = vmov 0.0   ;;  %v66_v1 = vld [vmem:[%s6873_s1 + $0x8] sm:$0xff]  ;;  %v68_v3 = vld [vmem:[%s6873_s1 + $0x18] sm:$0xff]  ;;  %vm95_vm0 = vcmask 130048  }
  0x26   :  { %184 = vmatprep.mubr.f32.mxu0 %v6881_v0  ;;  %297 = vmatprep.mubr.f32.mxu1 %v6881_v0  ;;  %v70_v2 = vld [vmem:[%s6873_s1 + $0x28] sm:$0xff]  ;;  %v72_v5 = vld [vmem:[%s6873_s1 + $0x38] sm:$0xff]  ;;  %v65_v6 = vld [vmem:[%s6873_s1] sm:$0xff]  ;;  %vm5496_vm1 = vmmov 0   ;;  %vm3407_vm2 = vcmask 15360  }
  0x27   :  { %v3539_v4 = vpack.c.bf16 %v70_v2, %v66_v1  ;;  %v69_v7 = vld [vmem:[%s6873_s1 + $0x20] sm:$0xff]  ;;  %v3543_v8 = vpack.c.bf16 %v72_v5, %v68_v3  ;;  %v67_v10 = vld [vmem:[%s6873_s1 + $0x10] sm:$0xff]  ;;  %v379_v14 = vld [vmem:[#allocation3 + $0x8] sm:$0xff] }
  0x28   :  { %v3541_v9 = vpack.c.bf16 %v69_v7, %v65_v6  ;;  %v71_v11 = vld [vmem:[%s6873_s1 + $0x30] sm:$0xff]  ;;  %v57_v12 = vld [vmem:[%s6872_s0] sm:$0xff]  ;;  %v383_v15 = vld [vmem:[#allocation3 + $0x28] sm:$0xff] }
  0x29   :  { %3540 = vmatprep.subr.bf16.mxu0 %v3539_v4  ;;  %v3545_v13 = vpack.c.bf16 %v71_v11, %v67_v10  ;;  %v381_v16 = vld [vmem:[#allocation3 + $0x18] sm:$0xff]  ;;  %3544 = vmatprep.subr.bf16.mxu1 %v3543_v8  ;;  %v5595_v17 = vpack.c.bf16 %v383_v15, %v379_v14  ;;  %v378_v19 = vld [vmem:[#allocation3] sm:$0xff]  ;;  %v380_v23 = vld [vmem:[#allocation3 + $0x10] sm:$0xff] }
  0x2a   :  { %3542 = vmatpush1.bf16.msra.mxu0 %v3541_v9  ;;  %v385_v18 = vld [vmem:[#allocation3 + $0x38] sm:$0xff]  ;;  %v382_v20 = vld [vmem:[#allocation3 + $0x20] sm:$0xff]  ;;  %v384_v24 = vld [vmem:[#allocation3 + $0x30] sm:$0xff] }
  0x2b   :  { %7017 = vst [vmem:[#allocation9_spill] sm:$0xff] %v5595_v17  ;;  %3546 = vmatpush1.bf16.msra.mxu1 %v3545_v13  ;;  %v5597_v21 = vpack.c.bf16 %v385_v18, %v381_v16  ;;  %v5599_v22 = vpack.c.bf16 %v382_v20, %v378_v19  ;;  %3548 = vmatprep.subr.bf16.mxu0 %v5595_v17  ;;  %v387_v26 = vld [vmem:[#allocation3 + $0x48] sm:$0xff]  ;;  %v389_v28 = vld [vmem:[#allocation3 + $0x58] sm:$0xff]  ;;  %v386_v31 = vld [vmem:[#allocation3 + $0x40] sm:$0xff] }
  0x2c   :  { %v5602_v25 = vpack.c.bf16 %v384_v24, %v380_v23  ;;  %v391_v27 = vld [vmem:[#allocation3 + $0x68] sm:$0xff]  ;;  %v393_v30 = vld [vmem:[#allocation3 + $0x78] sm:$0xff]  ;;  %v390_v32 = vld [vmem:[#allocation3 + $0x60] sm:$0xff] }
  0x2d   :  { %7018 = vst [vmem:[#allocation10_spill] sm:$0xff] %v5597_v21  ;;  %3422 = vmatmul.mubr.msk.f32.vlgmr.msra.gmra.mrb[0].mxu0 %vm95_vm0, %v57_v12  ;;  %3580 = vmatprep.subr.bf16.mxu1 %v5597_v21  ;;  %v5606_v29 = vpack.c.bf16 %v391_v27, %v387_v26  ;;  %v58_v33 = vld [vmem:[%s6872_s0 + $0x8] sm:$0xff]  ;;  %v5613_v34 = vpack.c.bf16 %v393_v30, %v389_v28  ;;  %v388_v36 = vld [vmem:[#allocation3 + $0x50] sm:$0xff]  ;;  %v397_v41 = vld [vmem:[#allocation3 + $0x98] sm:$0xff] }
  0x2e   :  { %3430 = vmatmul.mubr.msk.f32.vlgmr.msra.gmra.mrb[0].mxu1 %vm95_vm0, %v57_v12  ;;  %3550 = vmatpush1.bf16.msra.mxu0 %v5599_v22  ;;  %v5615_v35 = vpack.c.bf16 %v390_v32, %v386_v31  ;;  %v392_v37 = vld [vmem:[#allocation3 + $0x70] sm:$0xff]  ;;  %v395_v39 = vld [vmem:[#allocation3 + $0x88] sm:$0xff]  ;;  %v401_v43 = vld [vmem:[#allocation3 + $0xb8] sm:$0xff] }
  0x2f   :  { %3582 = vmatpush1.bf16.msra.mxu1 %v5602_v25  ;;  %190 = vmatprep.mubr.f32.mxu0 %v6881_v0  ;;  %v5619_v38 = vpack.c.bf16 %v392_v37, %v388_v36  ;;  %v399_v40 = vld [vmem:[#allocation3 + $0xa8] sm:$0xff]  ;;  %v394_v44 = vld [vmem:[#allocation3 + $0x80] sm:$0xff]  ;;  %v59_v46 = vld [vmem:[%s6872_s0 + $0x10] sm:$0xff]  ;;  %v5630_v47 = vpack.c.bf16 %v401_v43, %v397_v41 }
  0x30   :  { %303 = vmatprep.mubr.f32.mxu1 %v6881_v0  ;;  %3552 = vmatprep.subr.bf16.mxu0 %v5606_v29  ;;  %v5623_v42 = vpack.c.bf16 %v399_v40, %v395_v39  ;;  %v398_v45 = vld [vmem:[#allocation3 + $0xa0] sm:$0xff]  ;;  %v396_v48 = vld [vmem:[#allocation3 + $0x90] sm:$0xff]  ;;  %v403_v51 = vld [vmem:[#allocation3 + $0xc8] sm:$0xff] }
  0x31   :  { %3423 = vmatmul.mubr.msk.f32.gmra.mrb[2].mxu0 %vm95_vm0, %v58_v33  ;;  %3584 = vmatprep.subr.bf16.mxu1 %v5613_v34  ;;  %v400_v49 = vld [vmem:[#allocation3 + $0xb0] sm:$0xff]  ;;  %v5634_v50 = vpack.c.bf16 %v398_v45, %v394_v44  ;;  %v407_v52 = vld [vmem:[#allocation3 + $0xe8] sm:$0xff]  ;;  %v405_v53 = vld [vmem:[#allocation3 + $0xd8] sm:$0xff] }
  0x32   :  { %3431 = vmatmul.mubr.msk.f32.gmra.mrb[2].mxu1 %vm95_vm0, %v58_v33  ;;  %3554 = vmatpush1.bf16.msra.mxu0 %v5615_v35  ;;  %v5638_v54 = vpack.c.bf16 %v400_v49, %v396_v48  ;;  %v409_v55 = vld [vmem:[#allocation3 + $0xf8] sm:$0xff]  ;;  %v402_v56 = vld [vmem:[#allocation3 + $0xc0] sm:$0xff]  ;;  %v5642_v58 = vpack.c.bf16 %v407_v52, %v403_v51  ;;  %v404_v59 = vld [vmem:[#allocation3 + $0xd0] sm:$0xff] }
  0x33   :  { %3586 = vmatpush1.bf16.msra.mxu1 %v5619_v38  ;;  %196 = vmatprep.mubr.f32.mxu0 %v6881_v0  ;;  %v406_v57 = vld [vmem:[#allocation3 + $0xe0] sm:$0xff]  ;;  %v408_v60 = vld [vmem:[#allocation3 + $0xf0] sm:$0xff]  ;;  %v5646_v61 = vpack.c.bf16 %v409_v55, %v405_v53  ;;  %v411_v62 = vld [vmem:[#allocation3 + $0x108] sm:$0xff] }
  0x34   :  { %309 = vmatprep.mubr.f32.mxu1 %v6881_v0  ;;  %3556 = vmatprep.subr.bf16.mxu0 %v5623_v42  ;;  %v415_v63 = vld [vmem:[#allocation3 + $0x128] sm:$0xff]  ;;  %v60_v1 = vld [vmem:[%s6872_s0 + $0x18] sm:$0xff]  ;;  %v5653_v2 = vpack.c.bf16 %v406_v57, %v402_v56  ;;  %v5657_v5 = vpack.c.bf16 %v408_v60, %v404_v59  ;;  %v410_v6 = vld [vmem:[#allocation3 + $0x100] sm:$0xff] }
  0x35   :  { %3424 = vmatmul.mubr.msk.f32.gmra.mrb[4].mxu0 %vm95_vm0, %v59_v46  ;;  %3588 = vmatprep.subr.bf16.mxu1 %v5630_v47  ;;  %v413_v3 = vld [vmem:[#allocation3 + $0x118] sm:$0xff]  ;;  %v414_v7 = vld [vmem:[#allocation3 + $0x120] sm:$0xff]  ;;  %v5661_v8 = vpack.c.bf16 %v415_v63, %v411_v62  ;;  %v412_v9 = vld [vmem:[#allocation3 + $0x110] sm:$0xff] }
  0x36   :  { %3432 = vmatmul.mubr.msk.f32.gmra.mrb[4].mxu1 %vm95_vm0, %v59_v46  ;;  %3558 = vmatpush1.bf16.msra.mxu0 %v5634_v50  ;;  %v417_v4 = vld [vmem:[#allocation3 + $0x138] sm:$0xff]  ;;  %v416_v10 = vld [vmem:[#allocation3 + $0x130] sm:$0xff]  ;;  %v419_v12 = vld [vmem:[#allocation3 + $0x148] sm:$0xff]  ;;  %v5672_v15 = vpack.c.bf16 %v414_v7, %v410_v6 }
  0x37   :  { %3590 = vmatpush1.bf16.msra.mxu1 %v5638_v54  ;;  %202 = vmatprep.mubr.f32.mxu0 %v6881_v0  ;;  %v5665_v11 = vpack.c.bf16 %v417_v4, %v413_v3  ;;  %v423_v13 = vld [vmem:[#allocation3 + $0x168] sm:$0xff]  ;;  %v61_v14 = vld [vmem:[%s6872_s0 + $0x20] sm:$0xff]  ;;  %v421_v16 = vld [vmem:[#allocation3 + $0x158] sm:$0xff]  ;;  %v5676_v19 = vpack.c.bf16 %v416_v10, %v412_v9 }
  0x38   :  { %315 = vmatprep.mubr.f32.mxu1 %v6881_v0  ;;  %3560 = vmatprep.subr.bf16.mxu0 %v5642_v58  ;;  %v425_v18 = vld [vmem:[#allocation3 + $0x178] sm:$0xff]  ;;  %v418_v20 = vld [vmem:[#allocation3 + $0x140] sm:$0xff]  ;;  %v5680_v24 = vpack.c.bf16 %v423_v13, %v419_v12  ;;  %v420_v26 = vld [vmem:[#allocation3 + $0x150] sm:$0xff] }
  0x39   :  { %3425 = vmatmul.mubr.msk.f32.gmra.mrb[6].mxu0 %vm95_vm0, %v60_v1  ;;  %3592 = vmatprep.subr.bf16.mxu1 %v5646_v61  ;;  %v422_v23 = vld [vmem:[#allocation3 + $0x160] sm:$0xff]  ;;  %v424_v27 = vld [vmem:[#allocation3 + $0x170] sm:$0xff]  ;;  %v5684_v28 = vpack.c.bf16 %v425_v18, %v421_v16  ;;  %v427_v30 = vld [vmem:[#allocation3 + $0x188] sm:$0xff] }
  0x3a   :  { %3433 = vmatmul.mubr.msk.f32.gmra.mrb[6].mxu1 %vm95_vm0, %v60_v1  ;;  %3562 = vmatpush1.bf16.msra.mxu0 %v5653_v2  ;;  %v431_v31 = vld [vmem:[#allocation3 + $0x1a8] sm:$0xff]  ;;  %v5691_v33 = vpack.c.bf16 %v422_v23, %v418_v20  ;;  %v429_v36 = vld [vmem:[#allocation3 + $0x198] sm:$0xff]  ;;  %v5695_v39 = vpack.c.bf16 %v424_v27, %v420_v26  ;;  %v426_v40 = vld [vmem:[#allocation3 + $0x180] sm:$0xff] }
  0x3b   :  { %3594 = vmatpush1.bf16.msra.mxu1 %v5657_v5  ;;  %208 = vmatprep.mubr.f32.mxu0 %v6881_v0  ;;  %v62_v32 = vld [vmem:[%s6872_s0 + $0x28] sm:$0xff]  ;;  %v433_v37 = vld [vmem:[#allocation3 + $0x1b8] sm:$0xff]  ;;  %v430_v41 = vld [vmem:[#allocation3 + $0x1a0] sm:$0xff]  ;;  %v5699_v43 = vpack.c.bf16 %v431_v31, %v427_v30 }
  0x3c   :  { %321 = vmatprep.mubr.f32.mxu1 %v6881_v0  ;;  %3564 = vmatprep.subr.bf16.mxu0 %v5661_v8  ;;  %v428_v44 = vld [vmem:[#allocation3 + $0x190] sm:$0xff]  ;;  %v5703_v46 = vpack.c.bf16 %v433_v37, %v429_v36  ;;  %v435_v48 = vld [vmem:[#allocation3 + $0x1c8] sm:$0xff]  ;;  %v5710_v52 = vpack.c.bf16 %v430_v41, %v426_v40  ;;  %v437_v53 = vld [vmem:[#allocation3 + $0x1d8] sm:$0xff] }
  0x3d   :  { %3426 = vmatmul.mubr.msk.f32.gmra.mrb[8].mxu0 %vm95_vm0, %v61_v14  ;;  %3596 = vmatprep.subr.bf16.mxu1 %v5665_v11  ;;  %v432_v45 = vld [vmem:[#allocation3 + $0x1b0] sm:$0xff]  ;;  %v439_v49 = vld [vmem:[#allocation3 + $0x1e8] sm:$0xff]  ;;  %v441_v55 = vld [vmem:[#allocation3 + $0x1f8] sm:$0xff] }
  0x3e   :  { %3434 = vmatmul.mubr.msk.f32.gmra.mrb[8].mxu1 %vm95_vm0, %v61_v14  ;;  %3566 = vmatpush1.bf16.msra.mxu0 %v5672_v15  ;;  %v63_v51 = vld [vmem:[%s6872_s0 + $0x30] sm:$0xff]  ;;  %v5714_v56 = vpack.c.bf16 %v432_v45, %v428_v44  ;;  %v434_v57 = vld [vmem:[#allocation3 + $0x1c0] sm:$0xff]  ;;  %v5718_v60 = vpack.c.bf16 %v439_v49, %v435_v48  ;;  %v5722_v1 = vpack.c.bf16 %v441_v55, %v437_v53  ;;  %v443_v3 = vld [vmem:[#allocation5 + $0x8] sm:$0xff] }
  0x3f   :  { %3598 = vmatpush1.bf16.msra.mxu1 %v5676_v19  ;;  %214 = vmatprep.mubr.f32.mxu0 %v6881_v0  ;;  %v438_v59 = vld [vmem:[#allocation3 + $0x1e0] sm:$0xff]  ;;  %v436_v62 = vld [vmem:[#allocation3 + $0x1d0] sm:$0xff]  ;;  %v447_v4 = vld [vmem:[#allocation5 + $0x28] sm:$0xff] }
  0x40   :  { %327 = vmatprep.mubr.f32.mxu1 %v6881_v0  ;;  %3568 = vmatprep.subr.bf16.mxu0 %v5680_v24  ;;  %v440_v63 = vld [vmem:[#allocation3 + $0x1f0] sm:$0xff]  ;;  %v64_v6 = vld [vmem:[%s6872_s0 + $0x38] sm:$0xff]  ;;  %v5729_v7 = vpack.c.bf16 %v438_v59, %v434_v57  ;;  %v442_v13 = vld [vmem:[#allocation5] sm:$0xff]  ;;  %v5737_v18 = vpack.c.bf16 %v447_v4, %v443_v3 }
  0x41   :  { %3427 = vmatmul.mubr.msk.f32.gmra.mrb[10].mxu0 %vm95_vm0, %v62_v32  ;;  %3600 = vmatprep.subr.bf16.mxu1 %v5684_v28  ;;  %v445_v9 = vld [vmem:[#allocation5 + $0x18] sm:$0xff]  ;;  %v5733_v12 = vpack.c.bf16 %v440_v63, %v436_v62  ;;  %v446_v14 = vld [vmem:[#allocation5 + $0x20] sm:$0xff]  ;;  %v444_v16 = vld [vmem:[#allocation5 + $0x10] sm:$0xff] }
  0x42   :  { %3435 = vmatmul.mubr.msk.f32.gmra.mrb[10].mxu1 %vm95_vm0, %v62_v32  ;;  %3570 = vmatpush1.bf16.msra.mxu0 %v5691_v33  ;;  %v449_v10 = vld [vmem:[#allocation5 + $0x38] sm:$0xff]  ;;  %v448_v20 = vld [vmem:[#allocation5 + $0x30] sm:$0xff]  ;;  %v451_v23 = vld [vmem:[#allocation5 + $0x48] sm:$0xff]  ;;  %v5745_v32 = vpack.c.bf16 %v446_v14, %v442_v13 }
  0x43   :  { %3602 = vmatpush1.bf16.msra.mxu1 %v5695_v39  ;;  %220 = vmatprep.mubr.f32.mxu0 %v6881_v0  ;;  %v455_v26 = vld [vmem:[#allocation5 + $0x68] sm:$0xff]  ;;  %v5741_v27 = vpack.c.bf16 %v449_v10, %v445_v9  ;;  %v453_v30 = vld [vmem:[#allocation5 + $0x58] sm:$0xff]  ;;  %v5749_v36 = vpack.c.bf16 %v448_v20, %v444_v16  ;;  %v450_v40 = vld [vmem:[#allocation5 + $0x40] sm:$0xff] }
  0x44   :  { %333 = vmatprep.mubr.f32.mxu1 %v6881_v0  ;;  %3572 = vmatprep.subr.bf16.mxu0 %v5699_v43  ;;  %v457_v31 = vld [vmem:[#allocation5 + $0x78] sm:$0xff]  ;;  %v5751_v37 = vpack.c.bf16 %v455_v26, %v451_v23  ;;  %v454_v41 = vld [vmem:[#allocation5 + $0x60] sm:$0xff]  ;;  %v452_v44 = vld [vmem:[#allocation5 + $0x50] sm:$0xff] }
  0x45   :  { %3428 = vmatmul.mubr.msk.f32.gmra.mrb[12].mxu0 %vm95_vm0, %v63_v51  ;;  %3604 = vmatprep.subr.bf16.mxu1 %v5703_v46  ;;  %v5755_v45 = vpack.c.bf16 %v457_v31, %v453_v30  ;;  %v456_v48 = vld [vmem:[#allocation5 + $0x70] sm:$0xff]  ;;  %v459_v49 = vld [vmem:[#allocation5 + $0x88] sm:$0xff]  ;;  %v461_v53 = vld [vmem:[#allocation5 + $0x98] sm:$0xff]  ;;  %v5761_v57 = vpack.c.bf16 %v454_v41, %v450_v40 }
  0x46   :  { %3436 = vmatmul.mubr.msk.f32.gmra.mrb[12].mxu1 %vm95_vm0, %v63_v51  ;;  %3574 = vmatpush1.bf16.msra.mxu0 %v5710_v52  ;;  %v463_v51 = vld [vmem:[#allocation5 + $0xa8] sm:$0xff]  ;;  %v465_v55 = vld [vmem:[#allocation5 + $0xb8] sm:$0xff]  ;;  %v5765_v59 = vpack.c.bf16 %v456_v48, %v452_v44  ;;  %v458_v63 = vld [vmem:[#allocation5 + $0x80] sm:$0xff] }
  0x47   :  { %3606 = vmatpush1.bf16.msra.mxu1 %v5714_v56  ;;  %226 = vmatprep.mubr.f32.mxu0 %v6881_v0  ;;  %v5767_v62 = vpack.c.bf16 %v463_v51, %v459_v49  ;;  %v462_v3 = vld [vmem:[#allocation5 + $0xa0] sm:$0xff]  ;;  %v460_v4 = vld [vmem:[#allocation5 + $0x90] sm:$0xff]  ;;  %v467_v10 = vld [vmem:[#allocation5 + $0xc8] sm:$0xff] }
  0x48   :  { %339 = vmatprep.mubr.f32.mxu1 %v6881_v0  ;;  %3576 = vmatprep.subr.bf16.mxu0 %v5718_v60  ;;  %v464_v9 = vld [vmem:[#allocation5 + $0xb0] sm:$0xff]  ;;  %v471_v13 = vld [vmem:[#allocation5 + $0xe8] sm:$0xff]  ;;  %v469_v14 = vld [vmem:[#allocation5 + $0xd8] sm:$0xff]  ;;  %v5775_v20 = vpack.c.bf16 %v462_v3, %v458_v63 }
  0x49   :  { %3429 = vmatmul.mubr.msk.f32.gmra.mrb[14].mxu0 %vm95_vm0, %v64_v6  ;;  %3608 = vmatprep.subr.bf16.mxu1 %v5722_v1  ;;  %7019 = vst [vmem:[#allocation11_spill] sm:$0xff] %v5767_v62  ;;  %v473_v16 = vld [vmem:[#allocation5 + $0xf8] sm:$0xff]  ;;  %v5779_v23 = vpack.c.bf16 %v464_v9, %v460_v4  ;;  %v5781_v26 = vpack.c.bf16 %v471_v13, %v467_v10  ;;  %v466_v30 = vld [vmem:[#allocation5 + $0xc0] sm:$0xff]  ;;  %v468_v40 = vld [vmem:[#allocation5 + $0xd0] sm:$0xff] }
  0x4a   :  { %3437 = vmatmul.mubr.msk.f32.gmra.mrb[14].mxu1 %vm95_vm0, %v64_v6  ;;  %3578 = vmatpush1.bf16.msra.mxu0 %v5729_v7  ;;  %v5770_v6 = vpack.c.bf16 %v465_v55, %v461_v53  ;;  %7021 = vst [vmem:[#allocation13_spill] sm:$0xff] %v5775_v20  ;;  %v470_v31 = vld [vmem:[#allocation5 + $0xe0] sm:$0xff]  ;;  %v5784_v41 = vpack.c.bf16 %v473_v16, %v469_v14  ;;  %v472_v44 = vld [vmem:[#allocation5 + $0xf0] sm:$0xff]  ;;  %v475_v48 = vld [vmem:[#allocation5 + $0x108] sm:$0xff] }
  0x4b   :  { %3610 = vmatpush1.bf16.msra.mxu1 %v5733_v12  ;;  %645 = vmatprep.mubr.f32.mxu0 %v6881_v0  ;;  %7022 = vst [vmem:[#allocation14_spill] sm:$0xff] %v5779_v23  ;;  %7023 = vst [vmem:[#allocation15_spill] sm:$0xff] %v5781_v26  ;;  %v479_v49 = vld [vmem:[#allocation5 + $0x128] sm:$0xff]  ;;  %v477_v51 = vld [vmem:[#allocation5 + $0x118] sm:$0xff]  ;;  %v5787_v55 = vpack.c.bf16 %v470_v31, %v466_v30  ;;  %v5791_v63 = vpack.c.bf16 %v472_v44, %v468_v40 }
  0x4c   :  { %716 = vmatprep.mubr.f32.mxu1 %v6881_v0  ;;  %3612 = vmatprep.subr.bf16.mxu0 %v5737_v18  ;;  %7020 = vst [vmem:[#allocation12_spill] sm:$0xff] %v5770_v6  ;;  %7024 = vst [vmem:[#allocation16_spill] sm:$0xff] %v5784_v41  ;;  %v481_v53 = vld [vmem:[#allocation5 + $0x138] sm:$0xff]  ;;  %v5793_v3 = vpack.c.bf16 %v479_v49, %v475_v48  ;;  %v474_v4 = vld [vmem:[#allocation5 + $0x100] sm:$0xff] }
  0x4d   :  { %646 = vmatmul.mubr.f32.vlgmr.msra.gmra.mrb[0].mxu0 %v6881_v0  ;;  %3676 = vmatprep.subr.bf16.mxu1 %v5741_v27  ;;  %7025 = vst [vmem:[#allocation17_spill] sm:$0xff] %v5787_v55  ;;  %7026 = vst [vmem:[#allocation18_spill] sm:$0xff] %v5791_v63  ;;  %v478_v9 = vld [vmem:[#allocation5 + $0x120] sm:$0xff]  ;;  %v5796_v10 = vpack.c.bf16 %v481_v53, %v477_v51  ;;  %v476_v13 = vld [vmem:[#allocation5 + $0x110] sm:$0xff] }
  0x4e   :  { %717 = vmatmul.mubr.f32.vlgmr.msra.gmra.mrb[0].mxu1 %v6881_v0  ;;  %3614 = vmatpush1.bf16.msra.mxu0 %v5745_v32  ;;  %7027 = vst [vmem:[#allocation19_spill] sm:$0xff] %v5793_v3  ;;  %v480_v14 = vld [vmem:[#allocation5 + $0x130] sm:$0xff]  ;;  %v5799_v16 = vpack.c.bf16 %v478_v9, %v474_v4  ;;  %v483_v31 = vld [vmem:[#allocation5 + $0x148] sm:$0xff]  ;;  %v485_v44 = vld [vmem:[#allocation5 + $0x158] sm:$0xff] }
  0x4f   :  { %3678 = vmatpush1.bf16.msra.mxu1 %v5749_v36  ;;  %3616 = vmatprep.subr.bf16.mxu0 %v5751_v37  ;;  %7028 = vst [vmem:[#allocation20_spill] sm:$0xff] %v5796_v10  ;;  %v5803_v30 = vpack.c.bf16 %v480_v14, %v476_v13  ;;  %v487_v40 = vld [vmem:[#allocation5 + $0x168] sm:$0xff]  ;;  %v489_v49 = vld [vmem:[#allocation5 + $0x178] sm:$0xff]  ;;  %v482_v51 = vld [vmem:[#allocation5 + $0x140] sm:$0xff] }
  0x50   :  { %3680 = vmatprep.subr.bf16.mxu1 %v5755_v45  ;;  %815 = vmatprep.mubr.f32.mxu0 %v6881_v0  ;;  %7029 = vst [vmem:[#allocation21_spill] sm:$0xff] %v5799_v16  ;;  %v5808_v48 = vpack.c.bf16 %v487_v40, %v483_v31  ;;  %v486_v53 = vld [vmem:[#allocation5 + $0x160] sm:$0xff]  ;;  %v5810_v4 = vpack.c.bf16 %v489_v49, %v485_v44  ;;  %v484_v13 = vld [vmem:[#allocation5 + $0x150] sm:$0xff]  ;;  %v495_v31 = vld [vmem:[#allocation5 + $0x1a8] sm:$0xff] }
  0x51   :  { %886 = vmatprep.mubr.f32.mxu1 %v6881_v0  ;;  %7030 = vst [vmem:[#allocation22_spill] sm:$0xff] %v5803_v30  ;;  %v5812_v9 = vpack.c.bf16 %v486_v53, %v482_v51  ;;  %v488_v14 = vld [vmem:[#allocation5 + $0x170] sm:$0xff]  ;;  %v493_v40 = vld [vmem:[#allocation5 + $0x198] sm:$0xff]  ;;  %v490_v49 = vld [vmem:[#allocation5 + $0x180] sm:$0xff] }
  0x52   :  { %3618 = vmatpush1.bf16.msra.mxu0 %v5761_v57  ;;  %7031 = vst [vmem:[#allocation23_spill] sm:$0xff] %v5808_v48  ;;  %7032 = vst [vmem:[#allocation24_spill] sm:$0xff] %v5810_v4  ;;  %v5815_v0 = vpack.c.bf16 %v488_v14, %v484_v13  ;;  %v497_v44 = vld [vmem:[#allocation5 + $0x1b8] sm:$0xff]  ;;  %v494_v51 = vld [vmem:[#allocation5 + $0x1a0] sm:$0xff] }
  0x53   :  { %3682 = vmatpush1.bf16.msra.mxu1 %v5765_v59  ;;  %3620 = vmatprep.subr.bf16.mxu0 %v5767_v62  ;;  %7033 = vst [vmem:[#allocation25_spill] sm:$0xff] %v5812_v9  ;;  %v5822_v53 = vpack.c.bf16 %v497_v44, %v493_v40  ;;  %v492_v13 = vld [vmem:[#allocation5 + $0x190] sm:$0xff]  ;;  %v505_v40 = vld [vmem:[#allocation5 + $0x1f8] sm:$0xff]  ;;  %v498_v44 = vld [vmem:[#allocation5 + $0x1c0] sm:$0xff] }
  0x54   :  { %3684 = vmatprep.subr.bf16.mxu1 %v5770_v6  ;;  %7034 = vst [vmem:[#allocation26_spill] sm:$0xff] %v5815_v0  ;;  %v496_v14 = vld [vmem:[#allocation5 + $0x1b0] sm:$0xff] }
  0x55   :  { %7036 = vst [vmem:[#allocation28_spill] sm:$0xff] %v5822_v53 }
  0x56   :  { %3622 = vmatpush1.bf16.msra.mxu0 %v5775_v20 }
  0x57   :  { %3686 = vmatpush1.bf16.msra.mxu1 %v5779_v23  ;;  %3624 = vmatprep.subr.bf16.mxu0 %v5781_v26 }
  0x58   :  { %3688 = vmatprep.subr.bf16.mxu1 %v5784_v41 }
  0x5a   :  { %3626 = vmatpush1.bf16.msra.mxu0 %v5787_v55 }
  0x5b   :  { %3690 = vmatpush1.bf16.msra.mxu1 %v5791_v63  ;;  %3628 = vmatprep.subr.bf16.mxu0 %v5793_v3  ;;  %v557_v3 = vld [vmem:[#allocation5 + $0x398] sm:$0xff] }
  0x5c   :  { %3692 = vmatprep.subr.bf16.mxu1 %v5796_v10  ;;  %v5824_v10 = vpack.c.bf16 %v494_v51, %v490_v49  ;;  %v502_v49 = vld [vmem:[#allocation5 + $0x1e0] sm:$0xff]  ;;  %v561_v63 = vld [vmem:[#allocation5 + $0x3b8] sm:$0xff] }
  0x5e   :  { %3630 = vmatpush1.bf16.msra.mxu0 %v5799_v16  ;;  %7037 = vst [vmem:[#allocation29_spill] sm:$0xff] %v5824_v10 }
  0x5f   :  { %3694 = vmatpush1.bf16.msra.mxu1 %v5803_v30  ;;  %3632 = vmatprep.subr.bf16.mxu0 %v5808_v48  ;;  %v491_v30 = vld [vmem:[#allocation5 + $0x188] sm:$0xff]  ;;  %v5836_v48 = vpack.c.bf16 %v502_v49, %v498_v44  ;;  %v510_v44 = vld [vmem:[#allocation5 + $0x220] sm:$0xff] }
  0x60   :  { %3696 = vmatprep.subr.bf16.mxu1 %v5810_v4  ;;  %v5820_v16 = vpack.c.bf16 %v495_v31, %v491_v30  ;;  %v5827_v4 = vpack.c.bf16 %v496_v14, %v492_v13  ;;  %v503_v30 = vld [vmem:[#allocation5 + $0x1e8] sm:$0xff]  ;;  %v501_v31 = vld [vmem:[#allocation5 + $0x1d8] sm:$0xff]  ;;  %v500_v13 = vld [vmem:[#allocation5 + $0x1d0] sm:$0xff] }
  0x61   :  { %v5834_v51 = vpack.c.bf16 %v505_v40, %v501_v31  ;;  %7041 = vst [vmem:[#allocation33_spill] sm:$0xff] %v5836_v48  ;;  %v504_v14 = vld [vmem:[#allocation5 + $0x1f0] sm:$0xff]  ;;  %v513_v31 = vld [vmem:[#allocation5 + $0x238] sm:$0xff]  ;;  %v506_v40 = vld [vmem:[#allocation5 + $0x200] sm:$0xff] }
  0x62   :  { %3634 = vmatpush1.bf16.msra.mxu0 %v5812_v9  ;;  %7035 = vst [vmem:[#allocation27_spill] sm:$0xff] %v5820_v16  ;;  %7038 = vst [vmem:[#allocation30_spill] sm:$0xff] %v5827_v4 }
  0x63   :  { %3698 = vmatpush1.bf16.msra.mxu1 %v5815_v0  ;;  %3636 = vmatprep.subr.bf16.mxu0 %v5820_v16  ;;  %v499_v0 = vld [vmem:[#allocation5 + $0x1c8] sm:$0xff]  ;;  %7040 = vst [vmem:[#allocation32_spill] sm:$0xff] %v5834_v51  ;;  %v5848_v16 = vpack.c.bf16 %v510_v44, %v506_v40  ;;  %v518_v40 = vld [vmem:[#allocation5 + $0x260] sm:$0xff] }
  0x64   :  { %3700 = vmatprep.subr.bf16.mxu1 %v5822_v53  ;;  %v5832_v9 = vpack.c.bf16 %v503_v30, %v499_v0  ;;  %v5839_v53 = vpack.c.bf16 %v504_v14, %v500_v13  ;;  %v511_v0 = vld [vmem:[#allocation5 + $0x228] sm:$0xff]  ;;  %v509_v30 = vld [vmem:[#allocation5 + $0x218] sm:$0xff]  ;;  %v508_v13 = vld [vmem:[#allocation5 + $0x210] sm:$0xff] }
  0x65   :  { %v5846_v49 = vpack.c.bf16 %v513_v31, %v509_v30  ;;  %7045 = vst [vmem:[#allocation37_spill] sm:$0xff] %v5848_v16  ;;  %v512_v14 = vld [vmem:[#allocation5 + $0x230] sm:$0xff]  ;;  %v521_v30 = vld [vmem:[#allocation5 + $0x278] sm:$0xff]  ;;  %v514_v31 = vld [vmem:[#allocation5 + $0x240] sm:$0xff] }
  0x66   :  { %3638 = vmatpush1.bf16.msra.mxu0 %v5824_v10  ;;  %7039 = vst [vmem:[#allocation31_spill] sm:$0xff] %v5832_v9  ;;  %7042 = vst [vmem:[#allocation34_spill] sm:$0xff] %v5839_v53 }
  0x67   :  { %3702 = vmatpush1.bf16.msra.mxu1 %v5827_v4  ;;  %3640 = vmatprep.subr.bf16.mxu0 %v5832_v9  ;;  %v507_v4 = vld [vmem:[#allocation5 + $0x208] sm:$0xff]  ;;  %7044 = vst [vmem:[#allocation36_spill] sm:$0xff] %v5846_v49  ;;  %v5860_v9 = vpack.c.bf16 %v518_v40, %v514_v31  ;;  %v526_v31 = vld [vmem:[#allocation5 + $0x2a0] sm:$0xff] }
  0x68   :  { %3704 = vmatprep.subr.bf16.mxu1 %v5834_v51  ;;  %v5844_v10 = vpack.c.bf16 %v511_v0, %v507_v4  ;;  %v5851_v51 = vpack.c.bf16 %v512_v14, %v508_v13  ;;  %v519_v4 = vld [vmem:[#allocation5 + $0x268] sm:$0xff]  ;;  %v517_v0 = vld [vmem:[#allocation5 + $0x258] sm:$0xff]  ;;  %v516_v13 = vld [vmem:[#allocation5 + $0x250] sm:$0xff] }
  0x69   :  { %v5858_v44 = vpack.c.bf16 %v521_v30, %v517_v0  ;;  %7049 = vst [vmem:[#allocation41_spill] sm:$0xff] %v5860_v9  ;;  %v520_v14 = vld [vmem:[#allocation5 + $0x270] sm:$0xff]  ;;  %v529_v0 = vld [vmem:[#allocation5 + $0x2b8] sm:$0xff]  ;;  %v522_v30 = vld [vmem:[#allocation5 + $0x280] sm:$0xff] }
  0x6a   :  { %3642 = vmatpush1.bf16.msra.mxu0 %v5836_v48  ;;  %7043 = vst [vmem:[#allocation35_spill] sm:$0xff] %v5844_v10  ;;  %7046 = vst [vmem:[#allocation38_spill] sm:$0xff] %v5851_v51 }
  0x6b   :  { %3706 = vmatpush1.bf16.msra.mxu1 %v5839_v53  ;;  %3644 = vmatprep.subr.bf16.mxu0 %v5844_v10  ;;  %v515_v53 = vld [vmem:[#allocation5 + $0x248] sm:$0xff]  ;;  %7048 = vst [vmem:[#allocation40_spill] sm:$0xff] %v5858_v44  ;;  %v5872_v10 = vpack.c.bf16 %v526_v31, %v522_v30  ;;  %v534_v30 = vld [vmem:[#allocation5 + $0x2e0] sm:$0xff] }
  0x6c   :  { %3708 = vmatprep.subr.bf16.mxu1 %v5846_v49  ;;  %v5856_v48 = vpack.c.bf16 %v519_v4, %v515_v53  ;;  %v5863_v49 = vpack.c.bf16 %v520_v14, %v516_v13  ;;  %v527_v53 = vld [vmem:[#allocation5 + $0x2a8] sm:$0xff]  ;;  %v525_v4 = vld [vmem:[#allocation5 + $0x298] sm:$0xff]  ;;  %v524_v13 = vld [vmem:[#allocation5 + $0x290] sm:$0xff] }
  0x6d   :  { %v5870_v40 = vpack.c.bf16 %v529_v0, %v525_v4  ;;  %7053 = vst [vmem:[#allocation45_spill] sm:$0xff] %v5872_v10  ;;  %v528_v14 = vld [vmem:[#allocation5 + $0x2b0] sm:$0xff]  ;;  %v537_v4 = vld [vmem:[#allocation5 + $0x2f8] sm:$0xff]  ;;  %v530_v0 = vld [vmem:[#allocation5 + $0x2c0] sm:$0xff] }
  0x6e   :  { %3646 = vmatpush1.bf16.msra.mxu0 %v5848_v16  ;;  %7047 = vst [vmem:[#allocation39_spill] sm:$0xff] %v5856_v48  ;;  %7050 = vst [vmem:[#allocation42_spill] sm:$0xff] %v5863_v49 }
  0x6f   :  { %3710 = vmatpush1.bf16.msra.mxu1 %v5851_v51  ;;  %3648 = vmatprep.subr.bf16.mxu0 %v5856_v48  ;;  %v523_v51 = vld [vmem:[#allocation5 + $0x288] sm:$0xff]  ;;  %7052 = vst [vmem:[#allocation44_spill] sm:$0xff] %v5870_v40  ;;  %v5884_v48 = vpack.c.bf16 %v534_v30, %v530_v0  ;;  %v542_v0 = vld [vmem:[#allocation5 + $0x320] sm:$0xff] }
  0x70   :  { %3712 = vmatprep.subr.bf16.mxu1 %v5858_v44  ;;  %v5868_v16 = vpack.c.bf16 %v527_v53, %v523_v51  ;;  %v5875_v44 = vpack.c.bf16 %v528_v14, %v524_v13  ;;  %v535_v51 = vld [vmem:[#allocation5 + $0x2e8] sm:$0xff]  ;;  %v533_v53 = vld [vmem:[#allocation5 + $0x2d8] sm:$0xff]  ;;  %v532_v13 = vld [vmem:[#allocation5 + $0x2d0] sm:$0xff] }
  0x71   :  { %v5882_v31 = vpack.c.bf16 %v537_v4, %v533_v53  ;;  %7057 = vst [vmem:[#allocation49_spill] sm:$0xff] %v5884_v48  ;;  %v536_v14 = vld [vmem:[#allocation5 + $0x2f0] sm:$0xff]  ;;  %v545_v53 = vld [vmem:[#allocation5 + $0x338] sm:$0xff]  ;;  %v538_v4 = vld [vmem:[#allocation5 + $0x300] sm:$0xff] }
  0x72   :  { %3650 = vmatpush1.bf16.msra.mxu0 %v5860_v9  ;;  %7051 = vst [vmem:[#allocation43_spill] sm:$0xff] %v5868_v16  ;;  %7054 = vst [vmem:[#allocation46_spill] sm:$0xff] %v5875_v44 }
  0x73   :  { %3714 = vmatpush1.bf16.msra.mxu1 %v5863_v49  ;;  %3652 = vmatprep.subr.bf16.mxu0 %v5868_v16  ;;  %v531_v49 = vld [vmem:[#allocation5 + $0x2c8] sm:$0xff]  ;;  %7056 = vst [vmem:[#allocation48_spill] sm:$0xff] %v5882_v31  ;;  %v5896_v16 = vpack.c.bf16 %v542_v0, %v538_v4  ;;  %v550_v4 = vld [vmem:[#allocation5 + $0x360] sm:$0xff] }
  0x74   :  { %3716 = vmatprep.subr.bf16.mxu1 %v5870_v40  ;;  %v5880_v9 = vpack.c.bf16 %v535_v51, %v531_v49  ;;  %v5887_v40 = vpack.c.bf16 %v536_v14, %v532_v13  ;;  %v543_v49 = vld [vmem:[#allocation5 + $0x328] sm:$0xff]  ;;  %v541_v51 = vld [vmem:[#allocation5 + $0x318] sm:$0xff]  ;;  %v540_v13 = vld [vmem:[#allocation5 + $0x310] sm:$0xff] }
  0x75   :  { %v5894_v30 = vpack.c.bf16 %v545_v53, %v541_v51  ;;  %7061 = vst [vmem:[#allocation53_spill] sm:$0xff] %v5896_v16  ;;  %v544_v14 = vld [vmem:[#allocation5 + $0x330] sm:$0xff]  ;;  %v553_v51 = vld [vmem:[#allocation5 + $0x378] sm:$0xff]  ;;  %v546_v53 = vld [vmem:[#allocation5 + $0x340] sm:$0xff] }
  0x76   :  { %3654 = vmatpush1.bf16.msra.mxu0 %v5872_v10  ;;  %7055 = vst [vmem:[#allocation47_spill] sm:$0xff] %v5880_v9  ;;  %7058 = vst [vmem:[#allocation50_spill] sm:$0xff] %v5887_v40 }
  0x77   :  { %3718 = vmatpush1.bf16.msra.mxu1 %v5875_v44  ;;  %3656 = vmatprep.subr.bf16.mxu0 %v5880_v9  ;;  %v539_v44 = vld [vmem:[#allocation5 + $0x308] sm:$0xff]  ;;  %7060 = vst [vmem:[#allocation52_spill] sm:$0xff] %v5894_v30  ;;  %v5908_v9 = vpack.c.bf16 %v550_v4, %v546_v53  ;;  %v556_v53 = vld [vmem:[#allocation5 + $0x390] sm:$0xff] }
  0x78   :  { %3720 = vmatprep.subr.bf16.mxu1 %v5882_v31  ;;  %v5892_v10 = vpack.c.bf16 %v543_v49, %v539_v44  ;;  %v5899_v31 = vpack.c.bf16 %v544_v14, %v540_v13  ;;  %v551_v44 = vld [vmem:[#allocation5 + $0x368] sm:$0xff]  ;;  %v549_v49 = vld [vmem:[#allocation5 + $0x358] sm:$0xff]  ;;  %v548_v13 = vld [vmem:[#allocation5 + $0x350] sm:$0xff] }
  0x79   :  { %v5906_v0 = vpack.c.bf16 %v553_v51, %v549_v49  ;;  %7065 = vst [vmem:[#allocation57_spill] sm:$0xff] %v5908_v9  ;;  %v552_v14 = vld [vmem:[#allocation5 + $0x370] sm:$0xff]  ;;  %v554_v49 = vld [vmem:[#allocation5 + $0x380] sm:$0xff] }
  0x7a   :  { %3658 = vmatpush1.bf16.msra.mxu0 %v5884_v48  ;;  %7059 = vst [vmem:[#allocation51_spill] sm:$0xff] %v5892_v10  ;;  %7062 = vst [vmem:[#allocation54_spill] sm:$0xff] %v5899_v31  ;;  %v558_v51 = vld [vmem:[#allocation5 + $0x3a0] sm:$0xff] }
  0x7b   :  { %3722 = vmatpush1.bf16.msra.mxu1 %v5887_v40  ;;  %3660 = vmatprep.subr.bf16.mxu0 %v5892_v10  ;;  %v547_v40 = vld [vmem:[#allocation5 + $0x348] sm:$0xff]  ;;  %7064 = vst [vmem:[#allocation56_spill] sm:$0xff] %v5906_v0  ;;  %v5920_v4 = vpack.c.bf16 %v558_v51, %v554_v49  ;;  %v568_v49 = vld [vmem:[#allocation5 + $0x3f0] sm:$0xff] }
  0x7c   :  { %3724 = vmatprep.subr.bf16.mxu1 %v5894_v30  ;;  %v5904_v48 = vpack.c.bf16 %v551_v44, %v547_v40  ;;  %v555_v10 = vld [vmem:[#allocation5 + $0x388] sm:$0xff]  ;;  %v5917_v44 = vpack.c.bf16 %v561_v63, %v557_v3  ;;  %v565_v63 = vld [vmem:[#allocation5 + $0x3d8] sm:$0xff] }
  0x7d   :  { %v559_v30 = vld [vmem:[#allocation5 + $0x3a8] sm:$0xff]  ;;  %7069 = vst [vmem:[#allocation61_spill] sm:$0xff] %v5920_v4  ;;  %v569_v3 = vld [vmem:[#allocation5 + $0x3f8] sm:$0xff] }
  0x7e   :  { %3662 = vmatpush1.bf16.msra.mxu0 %v5896_v16  ;;  %7063 = vst [vmem:[#allocation55_spill] sm:$0xff] %v5904_v48  ;;  %v5911_v16 = vpack.c.bf16 %v552_v14, %v548_v13  ;;  %v5915_v40 = vpack.c.bf16 %v559_v30, %v555_v10  ;;  %7068 = vst [vmem:[#allocation60_spill] sm:$0xff] %v5917_v44  ;;  %v560_v13 = vld [vmem:[#allocation5 + $0x3b0] sm:$0xff]  ;;  %v563_v14 = vld [vmem:[#allocation5 + $0x3c8] sm:$0xff] }
  0x7f   :  { %3726 = vmatpush1.bf16.msra.mxu1 %v5899_v31  ;;  %3664 = vmatprep.subr.bf16.mxu0 %v5904_v48  ;;  %v567_v48 = vld [vmem:[#allocation5 + $0x3e8] sm:$0xff]  ;;  %v562_v30 = vld [vmem:[#allocation5 + $0x3c0] sm:$0xff] }
  0x80   :  { %7066 = vst [vmem:[#allocation58_spill] sm:$0xff] %v5911_v16  ;;  %3728 = vmatprep.subr.bf16.mxu1 %v5906_v0  ;;  %7067 = vst [vmem:[#allocation59_spill] sm:$0xff] %v5915_v40  ;;  %v5924_v0 = vpack.c.bf16 %v560_v13, %v556_v53  ;;  %v5926_v10 = vpack.c.bf16 %v567_v48, %v563_v14  ;;  %v566_v31 = vld [vmem:[#allocation5 + $0x3e0] sm:$0xff]  ;;  %v75_v48 = vlaneseq }
  0x81   :  { %v5931_v51 = vpack.c.bf16 %v566_v31, %v562_v30  ;;  %v73_v14 = vld [vmem:[%s6875_s3] sm:$0xf] }
  0x82   :  { %3666 = vmatpush1.bf16.msra.mxu0 %v5908_v9  ;;  %7070 = vst [vmem:[#allocation62_spill] sm:$0xff] %v5924_v0  ;;  %7071 = vst [vmem:[#allocation63_spill] sm:$0xff] %v5926_v10  ;;  %v5928_v9 = vpack.c.bf16 %v569_v3, %v565_v63  ;;  %v76_v13 = vshrl.u32 %v75_v48, 7 }
  0x83   :  { %3730 = vmatpush1.bf16.msra.mxu1 %v5911_v16  ;;  %3668 = vmatprep.subr.bf16.mxu0 %v5915_v40  ;;  %v564_v16 = vld [vmem:[#allocation5 + $0x3d0] sm:$0xff]  ;;  %7073 = vst [vmem:[#allocation65_spill] sm:$0xff] %v5931_v51 }
  0x84   :  { %3732 = vmatprep.subr.bf16.mxu1 %v5917_v44  ;;  %7072 = vst [vmem:[#allocation64_spill] sm:$0xff] %v5928_v9  ;;  %v5935_v53 = vpack.c.bf16 %v568_v49, %v564_v16  ;;  %v77_v31 = vsub.s32 0, %v76_v13  ;;  %v81_v63 = vsub.s32 1, %v76_v13  ;;  %v89_v49 = vsub.s32 3, %v76_v13 }
  0x86   :  { %3670 = vmatpush1.bf16.msra.mxu0 %v5920_v4  ;;  %7074 = vst [vmem:[#allocation66_spill] sm:$0xff] %v5935_v53  ;;  %v5945_v16 = vrot.slane %v73_v14, %v77_v31  ;;  %v5947_v3 = vrot.slane %v73_v14, %v81_v63  ;;  %v85_v4 = vsub.s32 2, %v76_v13 }
  0x87   :  { %3734 = vmatpush1.bf16.msra.mxu1 %v5924_v0  ;;  %3672 = vmatprep.subr.bf16.mxu0 %v5926_v10  ;;  %v5951_v0 = vrot.slane %v73_v14, %v89_v49 }
  0x88   :  { %3736 = vmatprep.subr.bf16.mxu1 %v5928_v9  ;;  %7075 = vst [vmem:[#allocation67_spill] sm:$0xff] %v5945_v16  ;;  %v5954_v63 = vrot.slane %v73_v14, %v85_v4 }
  0x89   :  { %7076 = vst [vmem:[#allocation68_spill] sm:$0xff] %v5951_v0 }
  0x8a   :  { %3674 = vmatpush1.bf16.msra.mxu0 %v5931_v51 }
  0x8b   :  { %3738 = vmatpush1.bf16.msra.mxu1 %v5935_v53  ;;  %3740 = vmatprep.subr.bf16.mxu0 %v5595_v17 }
  0x8c   :  { %3772 = vmatprep.subr.bf16.mxu1 %v5597_v21 }
 0x120   :  { %v647_v30 = vpop.f32.mrb[0].mxu0 }
 0x121   :  { %v5107_v53 = vadd.f32 %v647_v30, %v5945_v16  ;;  %v718_v51 = vpop.f32.mrb[0].mxu1  ;;  %v649_v17 = vpop.f32.mrb[1].mxu0 }
 0x122   :  { %v5108_v21 = vadd.f32 %v649_v17, %v5947_v3  ;;  %v720_v9 = vpop.f32.mrb[1].mxu1  ;;  %v5123_v40 = vadd.f32 %v718_v51, %v5954_v63 }
 0x123   :  { %v3438_v48 = vmul.f32 -1.442695, %v5107_v53  ;;  %v5124_v31 = vadd.f32 %v720_v9, %v5951_v0 }
 0x124   :  { %v3439_v10 = vmul.f32 -1.442695, %v5108_v21 }
 0x125   :  { %5178 = vpow2.f32 %v3438_v48  ;;  %v3440_v44 = vmul.f32 -1.442695, %v5124_v31 }
 0x126   :  { %5180 = vpow2.f32 %v3439_v10 }
 0x127   :  { %5182 = vpow2.f32 %v3440_v44  ;;  %v7079_v44 = vld [vmem:[#allocation18_spill] sm:$0xff] }
 0x128   :  { %5184 = vtanh.f32 %v5123_v40  ;;  %v7078_v40 = vld [vmem:[#allocation17_spill] sm:$0xff] }
 0x12f   :  { %v5179_v30 = vpop.eup %5178 }
 0x130   :  { %v5181_v16 = vpop.eup %5180  ;;  %v730_v55 = vadd.f32 1.0, %v5179_v30  ;;  %v7081_v30 = vld [vmem:[#allocation20_spill] sm:$0xff] }
 0x131   :  { %v736_v17 = vadd.f32 1.0, %v5181_v16  ;;  %v5183_v21 = vpop.eup %5182  ;;  %v7080_v16 = vld [vmem:[#allocation19_spill] sm:$0xff] }
 0x132   :  { %5186 = vrcp.f32 %v730_v55  ;;  %v5185_v53 = vpop.eup %5184  ;;  %v743_v48 = vadd.f32 1.0, %v5183_v21  ;;  %v7077_v55 = vmov 0.0   ;;  %v7083_v21 = vld [vmem:[#allocation22_spill] sm:$0xff] }
 0x133   :  { %5188 = vrcp.f32 %v736_v17  ;;  %v7082_v17 = vld [vmem:[#allocation21_spill] sm:$0xff] }
 0x134   :  { %5190 = vrcp.f32 %v743_v48  ;;  %v7088_v48 = vld [vmem:[#allocation27_spill] sm:$0xff] }
 0x13c   :  { %v5187_v49 = vpop.eup %5186 }
 0x13d   :  { %v5189_v13 = vpop.eup %5188  ;;  %v747_v10 = vmul.f32 %v5187_v49, %v5185_v53  ;;  %v7084_v53 = vld [vmem:[#allocation23_spill] sm:$0xff]  ;;  %v7085_v49 = vld [vmem:[#allocation24_spill] sm:$0xff] }
 0x13e   :  { %v746_v9 = vmul.f32 0.0, %v5189_v13  ;;  %v5191_v51 = vpop.eup %5190  ;;  %v7086_v13 = vld [vmem:[#allocation25_spill] sm:$0xff] }
 0x140   :  { %v5957_v4 = vadd.f32 %v747_v10, %v746_v9  ;;  %v7087_v10 = vld [vmem:[#allocation26_spill] sm:$0xff]  ;;  %v7089_v9 = vld [vmem:[#allocation28_spill] sm:$0xff] }
 0x142   :  { %5192 = vtanh.f32 %v5957_v4 }
 0x14c   :  { %v5193_v14 = vpop.eup %5192 }
 0x14d   :  { %v750_v31 = vmul.f32 %v5193_v14, %v5191_v51  ;;  %v7090_v51 = vld [vmem:[#allocation29_spill] sm:$0xff]  ;;  %v7091_v14 = vld [vmem:[#allocation30_spill] sm:$0xff] }
 0x14f   :  { %816 = vmatmul.mubr.f32.vlgmr.msra.gmra.mrb[16].mxu0 %v750_v31  ;;  %887 = vmatmul.mubr.f32.vlgmr.msra.gmra.mrb[16].mxu1 %v750_v31 }
 0x150   :  { %3742 = vmatpush1.bf16.msra.mxu0 %v5599_v22  ;;  %3774 = vmatpush1.bf16.msra.mxu1 %v5602_v25 }
 0x151   :  { %3744 = vmatprep.subr.bf16.mxu0 %v5606_v29  ;;  %3776 = vmatprep.subr.bf16.mxu1 %v5613_v34 }
 0x152   :  { %988 = vmatprep.mubr.f32.mxu0 %v7077_v55  ;;  %1059 = vmatprep.mubr.f32.mxu1 %v7077_v55 }
 0x154   :  { %3746 = vmatpush1.bf16.msra.mxu0 %v5615_v35  ;;  %3778 = vmatpush1.bf16.msra.mxu1 %v5619_v38 }
 0x155   :  { %3748 = vmatprep.subr.bf16.mxu0 %v5623_v42  ;;  %3780 = vmatprep.subr.bf16.mxu1 %v5630_v47 }
 0x158   :  { %3750 = vmatpush1.bf16.msra.mxu0 %v5634_v50  ;;  %3782 = vmatpush1.bf16.msra.mxu1 %v5638_v54 }
 0x159   :  { %3752 = vmatprep.subr.bf16.mxu0 %v5642_v58  ;;  %3784 = vmatprep.subr.bf16.mxu1 %v5646_v61 }
 0x15c   :  { %3754 = vmatpush1.bf16.msra.mxu0 %v5653_v2  ;;  %3786 = vmatpush1.bf16.msra.mxu1 %v5657_v5 }
 0x15d   :  { %3756 = vmatprep.subr.bf16.mxu0 %v5661_v8  ;;  %3788 = vmatprep.subr.bf16.mxu1 %v5665_v11 }
 0x160   :  { %3758 = vmatpush1.bf16.msra.mxu0 %v5672_v15  ;;  %3790 = vmatpush1.bf16.msra.mxu1 %v5676_v19 }
 0x161   :  { %3760 = vmatprep.subr.bf16.mxu0 %v5680_v24  ;;  %3792 = vmatprep.subr.bf16.mxu1 %v5684_v28 }
 0x164   :  { %3762 = vmatpush1.bf16.msra.mxu0 %v5691_v33  ;;  %3794 = vmatpush1.bf16.msra.mxu1 %v5695_v39 }
 0x165   :  { %3764 = vmatprep.subr.bf16.mxu0 %v5699_v43  ;;  %3796 = vmatprep.subr.bf16.mxu1 %v5703_v46 }
 0x168   :  { %3766 = vmatpush1.bf16.msra.mxu0 %v5710_v52  ;;  %3798 = vmatpush1.bf16.msra.mxu1 %v5714_v56 }
 0x169   :  { %3768 = vmatprep.subr.bf16.mxu0 %v5718_v60  ;;  %3800 = vmatprep.subr.bf16.mxu1 %v5722_v1 }
 0x16c   :  { %3770 = vmatpush1.bf16.msra.mxu0 %v5729_v7  ;;  %3802 = vmatpush1.bf16.msra.mxu1 %v5733_v12 }
 0x16d   :  { %3804 = vmatprep.subr.bf16.mxu0 %v5737_v18  ;;  %3868 = vmatprep.subr.bf16.mxu1 %v5741_v27 }
 0x16f   :  { %989 = vmatmul.mubr.f32.vlgmr.msra.gmra.mrb[2].mxu0 %v750_v31  ;;  %1060 = vmatmul.mubr.f32.vlgmr.msra.gmra.mrb[2].mxu1 %v750_v31  ;;  %v7092_v31 = vld [vmem:[#allocation31_spill] sm:$0xff] }
 0x170   :  { %3806 = vmatpush1.bf16.msra.mxu0 %v5745_v32  ;;  %3870 = vmatpush1.bf16.msra.mxu1 %v5749_v36 }
 0x171   :  { %3808 = vmatprep.subr.bf16.mxu0 %v5751_v37  ;;  %3872 = vmatprep.subr.bf16.mxu1 %v5755_v45 }
 0x174   :  { %3810 = vmatpush1.bf16.msra.mxu0 %v5761_v57  ;;  %3874 = vmatpush1.bf16.msra.mxu1 %v5765_v59 }
 0x175   :  { %3812 = vmatprep.subr.bf16.mxu0 %v5767_v62  ;;  %3876 = vmatprep.subr.bf16.mxu1 %v5770_v6 }
 0x178   :  { %3814 = vmatpush1.bf16.msra.mxu0 %v5775_v20  ;;  %3878 = vmatpush1.bf16.msra.mxu1 %v5779_v23 }
 0x179   :  { %3816 = vmatprep.subr.bf16.mxu0 %v5781_v26  ;;  %3880 = vmatprep.subr.bf16.mxu1 %v5784_v41 }
 0x17c   :  { %3818 = vmatpush1.bf16.msra.mxu0 %v7078_v40  ;;  %3882 = vmatpush1.bf16.msra.mxu1 %v7079_v44 }
 0x17d   :  { %3820 = vmatprep.subr.bf16.mxu0 %v7080_v16  ;;  %3884 = vmatprep.subr.bf16.mxu1 %v7081_v30  ;;  %v6079_v16 = vld [vmem:[%s6877_s5 + $0x10] sm:$0xff] }
 0x17e   :  { %7133 = vst [vmem:[#allocation72_spill] sm:$0xff] %v6079_v16 }
 0x180   :  { %3822 = vmatpush1.bf16.msra.mxu0 %v7082_v17  ;;  %3886 = vmatpush1.bf16.msra.mxu1 %v7083_v21  ;;  %v7093_v17 = vld [vmem:[#allocation32_spill] sm:$0xff]  ;;  %v7094_v21 = vld [vmem:[#allocation33_spill] sm:$0xff] }
 0x181   :  { %3824 = vmatprep.subr.bf16.mxu0 %v7084_v53  ;;  %3888 = vmatprep.subr.bf16.mxu1 %v7085_v49  ;;  %v7095_v53 = vld [vmem:[#allocation34_spill] sm:$0xff]  ;;  %v7096_v49 = vld [vmem:[#allocation35_spill] sm:$0xff] }
 0x184   :  { %3826 = vmatpush1.bf16.msra.mxu0 %v7086_v13  ;;  %3890 = vmatpush1.bf16.msra.mxu1 %v7087_v10  ;;  %v7097_v13 = vld [vmem:[#allocation36_spill] sm:$0xff]  ;;  %v7098_v10 = vld [vmem:[#allocation37_spill] sm:$0xff] }
 0x185   :  { %3828 = vmatprep.subr.bf16.mxu0 %v7088_v48  ;;  %3892 = vmatprep.subr.bf16.mxu1 %v7089_v9  ;;  %v7099_v48 = vld [vmem:[#allocation38_spill] sm:$0xff]  ;;  %v7100_v9 = vld [vmem:[#allocation39_spill] sm:$0xff] }
 0x188   :  { %3830 = vmatpush1.bf16.msra.mxu0 %v7090_v51  ;;  %3894 = vmatpush1.bf16.msra.mxu1 %v7091_v14  ;;  %v7101_v51 = vld [vmem:[#allocation40_spill] sm:$0xff]  ;;  %v7102_v14 = vld [vmem:[#allocation41_spill] sm:$0xff] }
 0x189   :  { %3832 = vmatprep.subr.bf16.mxu0 %v7092_v31  ;;  %3896 = vmatprep.subr.bf16.mxu1 %v7093_v17  ;;  %v7103_v31 = vld [vmem:[#allocation42_spill] sm:$0xff]  ;;  %v7104_v17 = vld [vmem:[#allocation43_spill] sm:$0xff] }
 0x18c   :  { %3834 = vmatpush1.bf16.msra.mxu0 %v7094_v21  ;;  %3898 = vmatpush1.bf16.msra.mxu1 %v7095_v53  ;;  %v7105_v21 = vld [vmem:[#allocation44_spill] sm:$0xff]  ;;  %v7106_v53 = vld [vmem:[#allocation45_spill] sm:$0xff] }
 0x18d   :  { %3836 = vmatprep.subr.bf16.mxu0 %v7096_v49  ;;  %3900 = vmatprep.subr.bf16.mxu1 %v7097_v13  ;;  %v7107_v49 = vld [vmem:[#allocation46_spill] sm:$0xff]  ;;  %v7108_v13 = vld [vmem:[#allocation47_spill] sm:$0xff] }
 0x190   :  { %3838 = vmatpush1.bf16.msra.mxu0 %v7098_v10  ;;  %3902 = vmatpush1.bf16.msra.mxu1 %v7099_v48  ;;  %v7109_v10 = vld [vmem:[#allocation48_spill] sm:$0xff]  ;;  %v7110_v48 = vld [vmem:[#allocation49_spill] sm:$0xff] }
 0x191   :  { %3840 = vmatprep.subr.bf16.mxu0 %v7100_v9  ;;  %3904 = vmatprep.subr.bf16.mxu1 %v7101_v51  ;;  %v7111_v9 = vld [vmem:[#allocation50_spill] sm:$0xff]  ;;  %v7112_v51 = vld [vmem:[#allocation51_spill] sm:$0xff] }
 0x194   :  { %3842 = vmatpush1.bf16.msra.mxu0 %v7102_v14  ;;  %3906 = vmatpush1.bf16.msra.mxu1 %v7103_v31  ;;  %v7113_v14 = vld [vmem:[#allocation52_spill] sm:$0xff]  ;;  %v7114_v31 = vld [vmem:[#allocation53_spill] sm:$0xff] }
 0x195   :  { %3844 = vmatprep.subr.bf16.mxu0 %v7104_v17  ;;  %3908 = vmatprep.subr.bf16.mxu1 %v7105_v21  ;;  %v7115_v17 = vld [vmem:[#allocation54_spill] sm:$0xff]  ;;  %v7116_v21 = vld [vmem:[#allocation55_spill] sm:$0xff] }
 0x198   :  { %3846 = vmatpush1.bf16.msra.mxu0 %v7106_v53  ;;  %3910 = vmatpush1.bf16.msra.mxu1 %v7107_v49  ;;  %v7117_v53 = vld [vmem:[#allocation56_spill] sm:$0xff]  ;;  %v7118_v49 = vld [vmem:[#allocation57_spill] sm:$0xff] }
 0x199   :  { %3848 = vmatprep.subr.bf16.mxu0 %v7108_v13  ;;  %3912 = vmatprep.subr.bf16.mxu1 %v7109_v10  ;;  %v7119_v13 = vld [vmem:[#allocation58_spill] sm:$0xff]  ;;  %v7120_v10 = vld [vmem:[#allocation59_spill] sm:$0xff] }
 0x19c   :  { %3850 = vmatpush1.bf16.msra.mxu0 %v7110_v48  ;;  %3914 = vmatpush1.bf16.msra.mxu1 %v7111_v9  ;;  %v7121_v48 = vld [vmem:[#allocation60_spill] sm:$0xff]  ;;  %v7122_v9 = vld [vmem:[#allocation61_spill] sm:$0xff] }
 0x19d   :  { %3852 = vmatprep.subr.bf16.mxu0 %v7112_v51  ;;  %3916 = vmatprep.subr.bf16.mxu1 %v7113_v14  ;;  %v7123_v51 = vld [vmem:[#allocation62_spill] sm:$0xff]  ;;  %v7124_v14 = vld [vmem:[#allocation63_spill] sm:$0xff] }
 0x1a0   :  { %3854 = vmatpush1.bf16.msra.mxu0 %v7114_v31  ;;  %3918 = vmatpush1.bf16.msra.mxu1 %v7115_v17  ;;  %v7125_v31 = vld [vmem:[#allocation64_spill] sm:$0xff]  ;;  %v7126_v17 = vld [vmem:[#allocation65_spill] sm:$0xff] }
 0x1a1   :  { %3856 = vmatprep.subr.bf16.mxu0 %v7116_v21  ;;  %3920 = vmatprep.subr.bf16.mxu1 %v7117_v53  ;;  %v7127_v21 = vld [vmem:[#allocation66_spill] sm:$0xff]  ;;  %v7128_v53 = vld [vmem:[#allocation9_spill] sm:$0xff] }
 0x1a4   :  { %3858 = vmatpush1.bf16.msra.mxu0 %v7118_v49  ;;  %3922 = vmatpush1.bf16.msra.mxu1 %v7119_v13  ;;  %v7129_v49 = vld [vmem:[#allocation10_spill] sm:$0xff]  ;;  %v6073_v13 = vld [vmem:[%s6877_s5 + $0x18] sm:$0xff] }
 0x1a5   :  { %3860 = vmatprep.subr.bf16.mxu0 %v7120_v10  ;;  %3924 = vmatprep.subr.bf16.mxu1 %v7121_v48  ;;  %v6061_v48 = vld [vmem:[%s6877_s5] sm:$0xff]  ;;  %7132 = vst [vmem:[#allocation71_spill] sm:$0xff] %v6073_v13 }
 0x1a6   :  { %7130 = vst [vmem:[#allocation69_spill] sm:$0xff] %v6061_v48 }
 0x1a8   :  { %3862 = vmatpush1.bf16.msra.mxu0 %v7122_v9  ;;  %3926 = vmatpush1.bf16.msra.mxu1 %v7123_v51  ;;  %v6066_v51 = vld [vmem:[%s6877_s5 + $0x8] sm:$0xff] }
 0x1a9   :  { %3864 = vmatprep.subr.bf16.mxu0 %v7124_v14  ;;  %3928 = vmatprep.subr.bf16.mxu1 %v7125_v31  ;;  %7131 = vst [vmem:[#allocation70_spill] sm:$0xff] %v6066_v51 }
 0x1ac   :  { %3866 = vmatpush1.bf16.msra.mxu0 %v7126_v17  ;;  %3930 = vmatpush1.bf16.msra.mxu1 %v7127_v21 }
 0x1ad   :  { %3932 = vmatprep.subr.bf16.mxu0 %v7128_v53  ;;  %3964 = vmatprep.subr.bf16.mxu1 %v7129_v49 }
 0x222   :  { %v817_v14 = vpop.f32.mrb[16].mxu0  ;;  %v888_v31 = vpop.f32.mrb[16].mxu1 }
 0x223   :  { %v818_v17 = vadd.f32 %v817_v14, %v6061_v48  ;;  %v819_v9 = vpop.f32.mrb[17].mxu0  ;;  %v890_v21 = vpop.f32.mrb[17].mxu1  ;;  %v889_v48 = vadd.f32 %v888_v31, %v6079_v16  ;;  %v7134_v31 = vld [vmem:[#allocation67_spill] sm:$0xff] }
 0x224   :  { %v820_v53 = vadd.f32 %v819_v9, %v6066_v51  ;;  %v891_v30 = vadd.f32 %v890_v21, %v6073_v13 }
 0x225   :  { %v3441_v10 = vmul.f32 -1.442695, %v818_v17 }
 0x226   :  { %v3442_v49 = vmul.f32 -1.442695, %v820_v53  ;;  %v3443_v14 = vmul.f32 -1.442695, %v891_v30 }
 0x227   :  { %5194 = vpow2.f32 %v3441_v10 }
 0x228   :  { %5196 = vpow2.f32 %v3442_v49 }
 0x229   :  { %5198 = vpow2.f32 %v3443_v14 }
 0x22a   :  { %5200 = vtanh.f32 %v889_v48 }
 0x231   :  { %v5195_v9 = vpop.eup %5194 }
 0x232   :  { %v5197_v17 = vpop.eup %5196  ;;  %v896_v53 = vadd.f32 1.0, %v5195_v9 }
 0x233   :  { %v902_v10 = vadd.f32 1.0, %v5197_v17  ;;  %v5199_v51 = vpop.eup %5198 }
 0x234   :  { %5202 = vrcp.f32 %v896_v53  ;;  %v5201_v49 = vpop.eup %5200  ;;  %v909_v40 = vadd.f32 1.0, %v5199_v51 }
 0x235   :  { %5204 = vrcp.f32 %v902_v10 }
 0x236   :  { %5206 = vrcp.f32 %v909_v40 }
 0x23e   :  { %v5203_v44 = vpop.eup %5202 }
 0x23f   :  { %v5205_v21 = vpop.eup %5204  ;;  %v913_v13 = vmul.f32 %v5203_v44, %v5201_v49 }
 0x240   :  { %v912_v41 = vmul.f32 0.0, %v5205_v21  ;;  %v5207_v51 = vpop.eup %5206 }
 0x242   :  { %v6082_v26 = vadd.f32 %v913_v13, %v912_v41  ;;  %v990_v30 = vpop.f32.mrb[2].mxu0  ;;  %v1061_v23 = vpop.f32.mrb[2].mxu1 }
 0x243   :  { %v5109_v16 = vadd.f32 %v990_v30, %v7134_v31  ;;  %v992_v9 = vpop.f32.mrb[3].mxu0  ;;  %v1063_v14 = vpop.f32.mrb[3].mxu1  ;;  %v5125_v10 = vadd.f32 %v1061_v23, %v5954_v63 }
 0x244   :  { %5208 = vtanh.f32 %v6082_v26  ;;  %v5110_v48 = vadd.f32 %v992_v9, %v5947_v3  ;;  %v5126_v44 = vadd.f32 %v1063_v14, %v5951_v0 }
 0x245   :  { %v3444_v17 = vmul.f32 -1.442695, %v5109_v16 }
 0x246   :  { %v3445_v53 = vmul.f32 -1.442695, %v5110_v48  ;;  %v3446_v13 = vmul.f32 -1.442695, %v5126_v44 }
 0x247   :  { %5210 = vpow2.f32 %v3444_v17 }
 0x248   :  { %5212 = vpow2.f32 %v3445_v53 }
 0x249   :  { %5214 = vpow2.f32 %v3446_v13 }
 0x24a   :  { %5216 = vtanh.f32 %v5125_v10  ;;  %v7137_v10 = vld [vmem:[#allocation16_spill] sm:$0xff] }
 0x24e   :  { %v5209_v41 = vpop.eup %5208 }
 0x24f   :  { %v916_v40 = vmul.f32 %v5209_v41, %v5207_v51 }
 0x251   :  { %v5211_v49 = vpop.eup %5210  ;;  %1158 = vmatprep.mubr.f32.mxu0 %v916_v40  ;;  %1229 = vmatprep.mubr.f32.mxu1 %v916_v40  ;;  %v7138_v40 = vld [vmem:[#allocation17_spill] sm:$0xff] }
 0x252   :  { %v5213_v21 = vpop.eup %5212  ;;  %v1073_v30 = vadd.f32 1.0, %v5211_v49  ;;  %v7139_v49 = vld [vmem:[#allocation18_spill] sm:$0xff] }
 0x253   :  { %v1079_v9 = vadd.f32 1.0, %v5213_v21  ;;  %v5215_v16 = vpop.eup %5214  ;;  %v7140_v21 = vld [vmem:[#allocation19_spill] sm:$0xff] }
 0x254   :  { %5218 = vrcp.f32 %v1073_v30  ;;  %v5217_v48 = vpop.eup %5216  ;;  %v1086_v0 = vadd.f32 1.0, %v5215_v16  ;;  %v7141_v30 = vld [vmem:[#allocation20_spill] sm:$0xff]  ;;  %v7143_v16 = vld [vmem:[#allocation22_spill] sm:$0xff] }
 0x255   :  { %5220 = vrcp.f32 %v1079_v9  ;;  %v7142_v9 = vld [vmem:[#allocation21_spill] sm:$0xff] }
 0x256   :  { %5222 = vrcp.f32 %v1086_v0  ;;  %v7135_v0 = vld [vmem:[#allocation14_spill] sm:$0xff] }
 0x25e   :  { %v5219_v17 = vpop.eup %5218 }
 0x25f   :  { %v5221_v14 = vpop.eup %5220  ;;  %v1090_v53 = vmul.f32 %v5219_v17, %v5217_v48  ;;  %v7144_v48 = vld [vmem:[#allocation23_spill] sm:$0xff]  ;;  %v7145_v17 = vld [vmem:[#allocation24_spill] sm:$0xff] }
 0x260   :  { %v1089_v44 = vmul.f32 %v5221_v14, %v5957_v4  ;;  %v5223_v51 = vpop.eup %5222  ;;  %v7136_v4 = vld [vmem:[#allocation15_spill] sm:$0xff]  ;;  %v7146_v14 = vld [vmem:[#allocation25_spill] sm:$0xff] }
 0x262   :  { %v6090_v23 = vadd.f32 %v1090_v53, %v1089_v44  ;;  %v7147_v53 = vld [vmem:[#allocation26_spill] sm:$0xff]  ;;  %v7148_v44 = vld [vmem:[#allocation27_spill] sm:$0xff] }
 0x264   :  { %5224 = vtanh.f32 %v6090_v23 }
 0x26e   :  { %v5225_v41 = vpop.eup %5224 }
 0x26f   :  { %v1093_v13 = vmul.f32 %v5225_v41, %v5223_v51  ;;  %v7149_v51 = vld [vmem:[#allocation28_spill] sm:$0xff]  ;;  %v7150_v41 = vld [vmem:[#allocation29_spill] sm:$0xff] }
 0x271   :  { %1159 = vmatmul.mubr.f32.vlgmr.msra.gmra.mrb[18].mxu0 %v1093_v13  ;;  %1230 = vmatmul.mubr.f32.vlgmr.msra.gmra.mrb[18].mxu1 %v1093_v13 }
 0x272   :  { %3934 = vmatpush1.bf16.msra.mxu0 %v5599_v22  ;;  %3966 = vmatpush1.bf16.msra.mxu1 %v5602_v25 }
 0x273   :  { %3936 = vmatprep.subr.bf16.mxu0 %v5606_v29  ;;  %3968 = vmatprep.subr.bf16.mxu1 %v5613_v34 }
 0x274   :  { %1331 = vmatprep.mubr.f32.mxu0 %v7077_v55  ;;  %1402 = vmatprep.mubr.f32.mxu1 %v7077_v55 }
 0x276   :  { %3938 = vmatpush1.bf16.msra.mxu0 %v5615_v35  ;;  %3970 = vmatpush1.bf16.msra.mxu1 %v5619_v38 }
 0x277   :  { %3940 = vmatprep.subr.bf16.mxu0 %v5623_v42  ;;  %3972 = vmatprep.subr.bf16.mxu1 %v5630_v47 }
 0x27a   :  { %3942 = vmatpush1.bf16.msra.mxu0 %v5634_v50  ;;  %3974 = vmatpush1.bf16.msra.mxu1 %v5638_v54 }
 0x27b   :  { %3944 = vmatprep.subr.bf16.mxu0 %v5642_v58  ;;  %3976 = vmatprep.subr.bf16.mxu1 %v5646_v61 }
 0x27e   :  { %3946 = vmatpush1.bf16.msra.mxu0 %v5653_v2  ;;  %3978 = vmatpush1.bf16.msra.mxu1 %v5657_v5 }
 0x27f   :  { %3948 = vmatprep.subr.bf16.mxu0 %v5661_v8  ;;  %3980 = vmatprep.subr.bf16.mxu1 %v5665_v11 }
 0x282   :  { %3950 = vmatpush1.bf16.msra.mxu0 %v5672_v15  ;;  %3982 = vmatpush1.bf16.msra.mxu1 %v5676_v19 }
 0x283   :  { %3952 = vmatprep.subr.bf16.mxu0 %v5680_v24  ;;  %3984 = vmatprep.subr.bf16.mxu1 %v5684_v28 }
 0x286   :  { %3954 = vmatpush1.bf16.msra.mxu0 %v5691_v33  ;;  %3986 = vmatpush1.bf16.msra.mxu1 %v5695_v39 }
 0x287   :  { %3956 = vmatprep.subr.bf16.mxu0 %v5699_v43  ;;  %3988 = vmatprep.subr.bf16.mxu1 %v5703_v46 }
 0x28a   :  { %3958 = vmatpush1.bf16.msra.mxu0 %v5710_v52  ;;  %3990 = vmatpush1.bf16.msra.mxu1 %v5714_v56 }
 0x28b   :  { %3960 = vmatprep.subr.bf16.mxu0 %v5718_v60  ;;  %3992 = vmatprep.subr.bf16.mxu1 %v5722_v1 }
 0x28e   :  { %3962 = vmatpush1.bf16.msra.mxu0 %v5729_v7  ;;  %3994 = vmatpush1.bf16.msra.mxu1 %v5733_v12 }
 0x28f   :  { %3996 = vmatprep.subr.bf16.mxu0 %v5737_v18  ;;  %4060 = vmatprep.subr.bf16.mxu1 %v5741_v27 }
 0x291   :  { %1332 = vmatmul.mubr.f32.vlgmr.msra.gmra.mrb[4].mxu0 %v1093_v13  ;;  %1403 = vmatmul.mubr.f32.vlgmr.msra.gmra.mrb[4].mxu1 %v1093_v13  ;;  %v7151_v13 = vld [vmem:[#allocation30_spill] sm:$0xff] }
 0x292   :  { %3998 = vmatpush1.bf16.msra.mxu0 %v5745_v32  ;;  %4062 = vmatpush1.bf16.msra.mxu1 %v5749_v36 }
 0x293   :  { %4000 = vmatprep.subr.bf16.mxu0 %v5751_v37  ;;  %4064 = vmatprep.subr.bf16.mxu1 %v5755_v45 }
 0x296   :  { %4002 = vmatpush1.bf16.msra.mxu0 %v5761_v57  ;;  %4066 = vmatpush1.bf16.msra.mxu1 %v5765_v59 }
 0x297   :  { %4004 = vmatprep.subr.bf16.mxu0 %v5767_v62  ;;  %4068 = vmatprep.subr.bf16.mxu1 %v5770_v6 }
 0x29a   :  { %4006 = vmatpush1.bf16.msra.mxu0 %v5775_v20  ;;  %4070 = vmatpush1.bf16.msra.mxu1 %v7135_v0 }
 0x29b   :  { %4008 = vmatprep.subr.bf16.mxu0 %v7136_v4  ;;  %4072 = vmatprep.subr.bf16.mxu1 %v7137_v10 }
 0x29e   :  { %4010 = vmatpush1.bf16.msra.mxu0 %v7138_v40  ;;  %4074 = vmatpush1.bf16.msra.mxu1 %v7139_v49  ;;  %v7191_v40 = vld [vmem:[#allocation70_spill] sm:$0xff] }
 0x29f   :  { %4012 = vmatprep.subr.bf16.mxu0 %v7140_v21  ;;  %4076 = vmatprep.subr.bf16.mxu1 %v7141_v30  ;;  %v7152_v30 = vld [vmem:[#allocation31_spill] sm:$0xff]  ;;  %v7190_v21 = vld [vmem:[#allocation69_spill] sm:$0xff] }
 0x2a2   :  { %4014 = vmatpush1.bf16.msra.mxu0 %v7142_v9  ;;  %4078 = vmatpush1.bf16.msra.mxu1 %v7143_v16  ;;  %v7153_v9 = vld [vmem:[#allocation32_spill] sm:$0xff]  ;;  %v7154_v16 = vld [vmem:[#allocation33_spill] sm:$0xff] }
 0x2a3   :  { %4016 = vmatprep.subr.bf16.mxu0 %v7144_v48  ;;  %4080 = vmatprep.subr.bf16.mxu1 %v7145_v17  ;;  %v7155_v48 = vld [vmem:[#allocation34_spill] sm:$0xff]  ;;  %v7156_v17 = vld [vmem:[#allocation35_spill] sm:$0xff] }
 0x2a6   :  { %4018 = vmatpush1.bf16.msra.mxu0 %v7146_v14  ;;  %4082 = vmatpush1.bf16.msra.mxu1 %v7147_v53  ;;  %v7157_v14 = vld [vmem:[#allocation36_spill] sm:$0xff]  ;;  %v7158_v53 = vld [vmem:[#allocation37_spill] sm:$0xff] }
 0x2a7   :  { %4020 = vmatprep.subr.bf16.mxu0 %v7148_v44  ;;  %4084 = vmatprep.subr.bf16.mxu1 %v7149_v51  ;;  %v7159_v44 = vld [vmem:[#allocation38_spill] sm:$0xff]  ;;  %v7160_v51 = vld [vmem:[#allocation39_spill] sm:$0xff] }
 0x2aa   :  { %4022 = vmatpush1.bf16.msra.mxu0 %v7150_v41  ;;  %4086 = vmatpush1.bf16.msra.mxu1 %v7151_v13  ;;  %v7161_v41 = vld [vmem:[#allocation40_spill] sm:$0xff]  ;;  %v7162_v13 = vld [vmem:[#allocation41_spill] sm:$0xff] }
 0x2ab   :  { %4024 = vmatprep.subr.bf16.mxu0 %v7152_v30  ;;  %4088 = vmatprep.subr.bf16.mxu1 %v7153_v9  ;;  %v7163_v30 = vld [vmem:[#allocation42_spill] sm:$0xff]  ;;  %v7164_v9 = vld [vmem:[#allocation43_spill] sm:$0xff] }
 0x2ae   :  { %4026 = vmatpush1.bf16.msra.mxu0 %v7154_v16  ;;  %4090 = vmatpush1.bf16.msra.mxu1 %v7155_v48  ;;  %v7165_v16 = vld [vmem:[#allocation44_spill] sm:$0xff]  ;;  %v7166_v48 = vld [vmem:[#allocation45_spill] sm:$0xff] }
 0x2af   :  { %4028 = vmatprep.subr.bf16.mxu0 %v7156_v17  ;;  %4092 = vmatprep.subr.bf16.mxu1 %v7157_v14  ;;  %v7167_v17 = vld [vmem:[#allocation46_spill] sm:$0xff]  ;;  %v7168_v14 = vld [vmem:[#allocation47_spill] sm:$0xff] }
 0x2b2   :  { %4030 = vmatpush1.bf16.msra.mxu0 %v7158_v53  ;;  %4094 = vmatpush1.bf16.msra.mxu1 %v7159_v44  ;;  %v7169_v53 = vld [vmem:[#allocation48_spill] sm:$0xff]  ;;  %v7170_v44 = vld [vmem:[#allocation49_spill] sm:$0xff] }
 0x2b3   :  { %4032 = vmatprep.subr.bf16.mxu0 %v7160_v51  ;;  %4096 = vmatprep.subr.bf16.mxu1 %v7161_v41  ;;  %v7171_v51 = vld [vmem:[#allocation50_spill] sm:$0xff]  ;;  %v7172_v41 = vld [vmem:[#allocation51_spill] sm:$0xff] }
 0x2b6   :  { %4034 = vmatpush1.bf16.msra.mxu0 %v7162_v13  ;;  %4098 = vmatpush1.bf16.msra.mxu1 %v7163_v30  ;;  %v7173_v13 = vld [vmem:[#allocation52_spill] sm:$0xff]  ;;  %v7174_v30 = vld [vmem:[#allocation53_spill] sm:$0xff] }
 0x2b7   :  { %4036 = vmatprep.subr.bf16.mxu0 %v7164_v9  ;;  %4100 = vmatprep.subr.bf16.mxu1 %v7165_v16  ;;  %v7175_v9 = vld [vmem:[#allocation54_spill] sm:$0xff]  ;;  %v7176_v16 = vld [vmem:[#allocation55_spill] sm:$0xff] }
 0x2ba   :  { %4038 = vmatpush1.bf16.msra.mxu0 %v7166_v48  ;;  %4102 = vmatpush1.bf16.msra.mxu1 %v7167_v17  ;;  %v7177_v48 = vld [vmem:[#allocation56_spill] sm:$0xff]  ;;  %v7178_v17 = vld [vmem:[#allocation57_spill] sm:$0xff] }
 0x2bb   :  { %4040 = vmatprep.subr.bf16.mxu0 %v7168_v14  ;;  %4104 = vmatprep.subr.bf16.mxu1 %v7169_v53  ;;  %v7179_v14 = vld [vmem:[#allocation58_spill] sm:$0xff]  ;;  %v7180_v53 = vld [vmem:[#allocation59_spill] sm:$0xff] }
 0x2be   :  { %4042 = vmatpush1.bf16.msra.mxu0 %v7170_v44  ;;  %4106 = vmatpush1.bf16.msra.mxu1 %v7171_v51  ;;  %v7181_v44 = vld [vmem:[#allocation60_spill] sm:$0xff]  ;;  %v7182_v51 = vld [vmem:[#allocation61_spill] sm:$0xff] }
 0x2bf   :  { %4044 = vmatprep.subr.bf16.mxu0 %v7172_v41  ;;  %4108 = vmatprep.subr.bf16.mxu1 %v7173_v13  ;;  %v7183_v41 = vld [vmem:[#allocation62_spill] sm:$0xff]  ;;  %v7184_v13 = vld [vmem:[#allocation63_spill] sm:$0xff] }
 0x2c2   :  { %4046 = vmatpush1.bf16.msra.mxu0 %v7174_v30  ;;  %4110 = vmatpush1.bf16.msra.mxu1 %v7175_v9  ;;  %v7185_v30 = vld [vmem:[#allocation64_spill] sm:$0xff]  ;;  %v7186_v9 = vld [vmem:[#allocation65_spill] sm:$0xff] }
 0x2c3   :  { %4048 = vmatprep.subr.bf16.mxu0 %v7176_v16  ;;  %4112 = vmatprep.subr.bf16.mxu1 %v7177_v48  ;;  %v7187_v16 = vld [vmem:[#allocation66_spill] sm:$0xff]  ;;  %v7188_v48 = vld [vmem:[#allocation9_spill] sm:$0xff] }
 0x2c6   :  { %4050 = vmatpush1.bf16.msra.mxu0 %v7178_v17  ;;  %4114 = vmatpush1.bf16.msra.mxu1 %v7179_v14  ;;  %v7189_v17 = vld [vmem:[#allocation10_spill] sm:$0xff] }
 0x2c7   :  { %4052 = vmatprep.subr.bf16.mxu0 %v7180_v53  ;;  %4116 = vmatprep.subr.bf16.mxu1 %v7181_v44 }
 0x2ca   :  { %4054 = vmatpush1.bf16.msra.mxu0 %v7182_v51  ;;  %4118 = vmatpush1.bf16.msra.mxu1 %v7183_v41 }
 0x2cb   :  { %4056 = vmatprep.subr.bf16.mxu0 %v7184_v13  ;;  %4120 = vmatprep.subr.bf16.mxu1 %v7185_v30  ;;  %v7192_v30 = vld [vmem:[#allocation71_spill] sm:$0xff] }
 0x2ce   :  { %4058 = vmatpush1.bf16.msra.mxu0 %v7186_v9  ;;  %4122 = vmatpush1.bf16.msra.mxu1 %v7187_v16  ;;  %v7193_v16 = vld [vmem:[#allocation72_spill] sm:$0xff] }
 0x2cf   :  { %4124 = vmatprep.subr.bf16.mxu0 %v7188_v48  ;;  %4156 = vmatprep.subr.bf16.mxu1 %v7189_v17 }
 0x344   :  { %v1160_v14 = vpop.f32.mrb[18].mxu0  ;;  %v1231_v53 = vpop.f32.mrb[18].mxu1 }
 0x345   :  { %v1161_v44 = vadd.f32 %v1160_v14, %v7190_v21  ;;  %v1162_v49 = vpop.f32.mrb[19].mxu0  ;;  %v1233_v51 = vpop.f32.mrb[19].mxu1  ;;  %v1232_v0 = vadd.f32 %v1231_v53, %v7193_v16 }
 0x346   :  { %v1163_v41 = vadd.f32 %v1162_v49, %v7191_v40  ;;  %v1234_v9 = vadd.f32 %v1233_v51, %v7192_v30 }
 0x347   :  { %v3447_v10 = vmul.f32 -1.442695, %v1161_v44 }
 0x348   :  { %v3448_v13 = vmul.f32 -1.442695, %v1163_v41  ;;  %v3449_v4 = vmul.f32 -1.442695, %v1234_v9 }
 0x349   :  { %5226 = vpow2.f32 %v3447_v10 }
 0x34a   :  { %5228 = vpow2.f32 %v3448_v13 }
 0x34b   :  { %5230 = vpow2.f32 %v3449_v4 }
 0x34c   :  { %5232 = vtanh.f32 %v1232_v0 }
 0x353   :  { %v5227_v48 = vpop.eup %5226 }
 0x354   :  { %v5229_v20 = vpop.eup %5228  ;;  %v1239_v17 = vadd.f32 1.0, %v5227_v48 }
 0x355   :  { %v1245_v6 = vadd.f32 1.0, %v5229_v20  ;;  %v5231_v14 = vpop.eup %5230 }
 0x356   :  { %5234 = vrcp.f32 %v1239_v17  ;;  %v5233_v21 = vpop.eup %5232  ;;  %v1252_v10 = vadd.f32 1.0, %v5231_v14 }
 0x357   :  { %5236 = vrcp.f32 %v1245_v6 }
 0x358   :  { %5238 = vrcp.f32 %v1252_v10 }
 0x360   :  { %v5235_v49 = vpop.eup %5234 }
 0x361   :  { %v5237_v44 = vpop.eup %5236  ;;  %v1256_v41 = vmul.f32 %v5235_v49, %v5233_v21  ;;  %v7194_v21 = vld [vmem:[#allocation68_spill] sm:$0xff] }
 0x362   :  { %v1255_v13 = vmul.f32 %v5237_v44, %v6082_v26  ;;  %v5239_v26 = vpop.eup %5238 }
 0x364   :  { %v1333_v51 = vpop.f32.mrb[4].mxu0  ;;  %v1404_v9 = vpop.f32.mrb[4].mxu1  ;;  %v6196_v30 = vadd.f32 %v1256_v41, %v1255_v13 }
 0x365   :  { %v5111_v48 = vadd.f32 %v1333_v51, %v7134_v31  ;;  %v1335_v4 = vpop.f32.mrb[5].mxu0  ;;  %v1406_v0 = vpop.f32.mrb[5].mxu1  ;;  %v5127_v44 = vadd.f32 %v1404_v9, %v5954_v63 }
 0x366   :  { %v5112_v20 = vadd.f32 %v1335_v4, %v5947_v3  ;;  %5240 = vtanh.f32 %v6196_v30  ;;  %v5128_v53 = vadd.f32 %v1406_v0, %v7194_v21 }
 0x367   :  { %v3450_v6 = vmul.f32 -1.442695, %v5111_v48 }
 0x368   :  { %v3451_v17 = vmul.f32 -1.442695, %v5112_v20  ;;  %v3452_v49 = vmul.f32 -1.442695, %v5128_v53 }
 0x369   :  { %5242 = vpow2.f32 %v3450_v6 }
 0x36a   :  { %5244 = vpow2.f32 %v3451_v17 }
 0x36b   :  { %5246 = vpow2.f32 %v3452_v49 }
 0x36c   :  { %5248 = vtanh.f32 %v5127_v44  ;;  %v7197_v44 = vld [vmem:[#allocation14_spill] sm:$0xff] }
 0x370   :  { %v5241_v14 = vpop.eup %5240 }
 0x371   :  { %v1259_v41 = vmul.f32 %v5241_v14, %v5239_v26 }
 0x373   :  { %v5243_v10 = vpop.eup %5242  ;;  %1501 = vmatprep.mubr.f32.mxu0 %v1259_v41  ;;  %1572 = vmatprep.mubr.f32.mxu1 %v1259_v41  ;;  %v7198_v41 = vld [vmem:[#allocation15_spill] sm:$0xff] }
 0x374   :  { %v5245_v13 = vpop.eup %5244  ;;  %v1416_v51 = vadd.f32 1.0, %v5243_v10  ;;  %v7199_v10 = vld [vmem:[#allocation16_spill] sm:$0xff] }
 0x375   :  { %v1422_v4 = vadd.f32 1.0, %v5245_v13  ;;  %v5247_v48 = vpop.eup %5246  ;;  %v7200_v13 = vld [vmem:[#allocation17_spill] sm:$0xff] }
 0x376   :  { %5250 = vrcp.f32 %v1416_v51  ;;  %v5249_v20 = vpop.eup %5248  ;;  %v1429_v21 = vadd.f32 1.0, %v5247_v48  ;;  %v7201_v51 = vld [vmem:[#allocation18_spill] sm:$0xff]  ;;  %v7203_v48 = vld [vmem:[#allocation20_spill] sm:$0xff] }
 0x377   :  { %5252 = vrcp.f32 %v1422_v4  ;;  %v7202_v4 = vld [vmem:[#allocation19_spill] sm:$0xff] }
 0x378   :  { %5254 = vrcp.f32 %v1429_v21  ;;  %v7196_v21 = vld [vmem:[#allocation13_spill] sm:$0xff] }
 0x380   :  { %v5251_v6 = vpop.eup %5250 }
 0x381   :  { %v5253_v0 = vpop.eup %5252  ;;  %v1433_v17 = vmul.f32 %v5251_v6, %v5249_v20  ;;  %v7204_v20 = vld [vmem:[#allocation21_spill] sm:$0xff]  ;;  %v7205_v6 = vld [vmem:[#allocation22_spill] sm:$0xff] }
 0x382   :  { %v1432_v53 = vmul.f32 %v5253_v0, %v6090_v23  ;;  %v5255_v26 = vpop.eup %5254  ;;  %v7195_v23 = vld [vmem:[#allocation12_spill] sm:$0xff]  ;;  %v7206_v0 = vld [vmem:[#allocation23_spill] sm:$0xff] }
 0x384   :  { %v6204_v9 = vadd.f32 %v1433_v17, %v1432_v53  ;;  %v7207_v17 = vld [vmem:[#allocation24_spill] sm:$0xff]  ;;  %v7208_v53 = vld [vmem:[#allocation25_spill] sm:$0xff] }
 0x386   :  { %5256 = vtanh.f32 %v6204_v9 }
 0x390   :  { %v5257_v14 = vpop.eup %5256 }
 0x391   :  { %v1436_v49 = vmul.f32 %v5257_v14, %v5255_v26  ;;  %v7209_v26 = vld [vmem:[#allocation26_spill] sm:$0xff]  ;;  %v7210_v14 = vld [vmem:[#allocation27_spill] sm:$0xff] }
 0x393   :  { %1502 = vmatmul.mubr.f32.vlgmr.msra.gmra.mrb[20].mxu0 %v1436_v49  ;;  %1573 = vmatmul.mubr.f32.vlgmr.msra.gmra.mrb[20].mxu1 %v1436_v49 }
 0x394   :  { %4126 = vmatpush1.bf16.msra.mxu0 %v5599_v22  ;;  %4158 = vmatpush1.bf16.msra.mxu1 %v5602_v25 }
 0x395   :  { %4128 = vmatprep.subr.bf16.mxu0 %v5606_v29  ;;  %4160 = vmatprep.subr.bf16.mxu1 %v5613_v34 }
 0x396   :  { %1674 = vmatprep.mubr.f32.mxu0 %v7077_v55  ;;  %1745 = vmatprep.mubr.f32.mxu1 %v7077_v55 }
 0x398   :  { %4130 = vmatpush1.bf16.msra.mxu0 %v5615_v35  ;;  %4162 = vmatpush1.bf16.msra.mxu1 %v5619_v38 }
 0x399   :  { %4132 = vmatprep.subr.bf16.mxu0 %v5623_v42  ;;  %4164 = vmatprep.subr.bf16.mxu1 %v5630_v47 }
 0x39c   :  { %4134 = vmatpush1.bf16.msra.mxu0 %v5634_v50  ;;  %4166 = vmatpush1.bf16.msra.mxu1 %v5638_v54 }
 0x39d   :  { %4136 = vmatprep.subr.bf16.mxu0 %v5642_v58  ;;  %4168 = vmatprep.subr.bf16.mxu1 %v5646_v61 }
 0x3a0   :  { %4138 = vmatpush1.bf16.msra.mxu0 %v5653_v2  ;;  %4170 = vmatpush1.bf16.msra.mxu1 %v5657_v5 }
 0x3a1   :  { %4140 = vmatprep.subr.bf16.mxu0 %v5661_v8  ;;  %4172 = vmatprep.subr.bf16.mxu1 %v5665_v11 }
 0x3a4   :  { %4142 = vmatpush1.bf16.msra.mxu0 %v5672_v15  ;;  %4174 = vmatpush1.bf16.msra.mxu1 %v5676_v19 }
 0x3a5   :  { %4144 = vmatprep.subr.bf16.mxu0 %v5680_v24  ;;  %4176 = vmatprep.subr.bf16.mxu1 %v5684_v28 }
 0x3a8   :  { %4146 = vmatpush1.bf16.msra.mxu0 %v5691_v33  ;;  %4178 = vmatpush1.bf16.msra.mxu1 %v5695_v39 }
 0x3a9   :  { %4148 = vmatprep.subr.bf16.mxu0 %v5699_v43  ;;  %4180 = vmatprep.subr.bf16.mxu1 %v5703_v46 }
 0x3ac   :  { %4150 = vmatpush1.bf16.msra.mxu0 %v5710_v52  ;;  %4182 = vmatpush1.bf16.msra.mxu1 %v5714_v56 }
 0x3ad   :  { %4152 = vmatprep.subr.bf16.mxu0 %v5718_v60  ;;  %4184 = vmatprep.subr.bf16.mxu1 %v5722_v1 }
 0x3b0   :  { %4154 = vmatpush1.bf16.msra.mxu0 %v5729_v7  ;;  %4186 = vmatpush1.bf16.msra.mxu1 %v5733_v12 }
 0x3b1   :  { %4188 = vmatprep.subr.bf16.mxu0 %v5737_v18  ;;  %4252 = vmatprep.subr.bf16.mxu1 %v5741_v27 }
 0x3b3   :  { %1675 = vmatmul.mubr.f32.vlgmr.msra.gmra.mrb[6].mxu0 %v1436_v49  ;;  %1746 = vmatmul.mubr.f32.vlgmr.msra.gmra.mrb[6].mxu1 %v1436_v49  ;;  %v7211_v49 = vld [vmem:[#allocation28_spill] sm:$0xff] }
 0x3b4   :  { %4190 = vmatpush1.bf16.msra.mxu0 %v5745_v32  ;;  %4254 = vmatpush1.bf16.msra.mxu1 %v5749_v36 }
 0x3b5   :  { %4192 = vmatprep.subr.bf16.mxu0 %v5751_v37  ;;  %4256 = vmatprep.subr.bf16.mxu1 %v5755_v45 }
 0x3b8   :  { %4194 = vmatpush1.bf16.msra.mxu0 %v5761_v57  ;;  %4258 = vmatpush1.bf16.msra.mxu1 %v5765_v59 }
 0x3b9   :  { %4196 = vmatprep.subr.bf16.mxu0 %v5767_v62  ;;  %4260 = vmatprep.subr.bf16.mxu1 %v7195_v23 }
 0x3bc   :  { %4198 = vmatpush1.bf16.msra.mxu0 %v7196_v21  ;;  %4262 = vmatpush1.bf16.msra.mxu1 %v7197_v44 }
 0x3bd   :  { %4200 = vmatprep.subr.bf16.mxu0 %v7198_v41  ;;  %4264 = vmatprep.subr.bf16.mxu1 %v7199_v10 }
 0x3c0   :  { %4202 = vmatpush1.bf16.msra.mxu0 %v7200_v13  ;;  %4266 = vmatpush1.bf16.msra.mxu1 %v7201_v51  ;;  %v7212_v51 = vld [vmem:[#allocation29_spill] sm:$0xff] }
 0x3c1   :  { %4204 = vmatprep.subr.bf16.mxu0 %v7202_v4  ;;  %4268 = vmatprep.subr.bf16.mxu1 %v7203_v48  ;;  %v7213_v4 = vld [vmem:[#allocation30_spill] sm:$0xff]  ;;  %v7214_v48 = vld [vmem:[#allocation31_spill] sm:$0xff]  ;;  %v7252_v13 = vld [vmem:[#allocation69_spill] sm:$0xff] }
 0x3c4   :  { %4206 = vmatpush1.bf16.msra.mxu0 %v7204_v20  ;;  %4270 = vmatpush1.bf16.msra.mxu1 %v7205_v6  ;;  %v7215_v20 = vld [vmem:[#allocation32_spill] sm:$0xff]  ;;  %v7216_v6 = vld [vmem:[#allocation33_spill] sm:$0xff] }
 0x3c5   :  { %4208 = vmatprep.subr.bf16.mxu0 %v7206_v0  ;;  %4272 = vmatprep.subr.bf16.mxu1 %v7207_v17  ;;  %v7217_v0 = vld [vmem:[#allocation34_spill] sm:$0xff]  ;;  %v7218_v17 = vld [vmem:[#allocation35_spill] sm:$0xff] }
 0x3c8   :  { %4210 = vmatpush1.bf16.msra.mxu0 %v7208_v53  ;;  %4274 = vmatpush1.bf16.msra.mxu1 %v7209_v26  ;;  %v7219_v53 = vld [vmem:[#allocation36_spill] sm:$0xff]  ;;  %v7220_v26 = vld [vmem:[#allocation37_spill] sm:$0xff] }
 0x3c9   :  { %4212 = vmatprep.subr.bf16.mxu0 %v7210_v14  ;;  %4276 = vmatprep.subr.bf16.mxu1 %v7211_v49  ;;  %v7221_v14 = vld [vmem:[#allocation38_spill] sm:$0xff]  ;;  %v7222_v49 = vld [vmem:[#allocation39_spill] sm:$0xff] }
 0x3cc   :  { %4214 = vmatpush1.bf16.msra.mxu0 %v7212_v51  ;;  %4278 = vmatpush1.bf16.msra.mxu1 %v7213_v4  ;;  %v7223_v51 = vld [vmem:[#allocation40_spill] sm:$0xff]  ;;  %v7224_v4 = vld [vmem:[#allocation41_spill] sm:$0xff] }
 0x3cd   :  { %4216 = vmatprep.subr.bf16.mxu0 %v7214_v48  ;;  %4280 = vmatprep.subr.bf16.mxu1 %v7215_v20  ;;  %v7225_v48 = vld [vmem:[#allocation42_spill] sm:$0xff]  ;;  %v7226_v20 = vld [vmem:[#allocation43_spill] sm:$0xff] }
 0x3d0   :  { %4218 = vmatpush1.bf16.msra.mxu0 %v7216_v6  ;;  %4282 = vmatpush1.bf16.msra.mxu1 %v7217_v0  ;;  %v7227_v6 = vld [vmem:[#allocation44_spill] sm:$0xff]  ;;  %v7228_v0 = vld [vmem:[#allocation45_spill] sm:$0xff] }
 0x3d1   :  { %4220 = vmatprep.subr.bf16.mxu0 %v7218_v17  ;;  %4284 = vmatprep.subr.bf16.mxu1 %v7219_v53  ;;  %v7229_v17 = vld [vmem:[#allocation46_spill] sm:$0xff]  ;;  %v7230_v53 = vld [vmem:[#allocation47_spill] sm:$0xff] }
 0x3d4   :  { %4222 = vmatpush1.bf16.msra.mxu0 %v7220_v26  ;;  %4286 = vmatpush1.bf16.msra.mxu1 %v7221_v14  ;;  %v7231_v26 = vld [vmem:[#allocation48_spill] sm:$0xff]  ;;  %v7232_v14 = vld [vmem:[#allocation49_spill] sm:$0xff] }
 0x3d5   :  { %4224 = vmatprep.subr.bf16.mxu0 %v7222_v49  ;;  %4288 = vmatprep.subr.bf16.mxu1 %v7223_v51  ;;  %v7233_v49 = vld [vmem:[#allocation50_spill] sm:$0xff]  ;;  %v7234_v51 = vld [vmem:[#allocation51_spill] sm:$0xff] }
 0x3d8   :  { %4226 = vmatpush1.bf16.msra.mxu0 %v7224_v4  ;;  %4290 = vmatpush1.bf16.msra.mxu1 %v7225_v48  ;;  %v7235_v4 = vld [vmem:[#allocation52_spill] sm:$0xff]  ;;  %v7236_v48 = vld [vmem:[#allocation53_spill] sm:$0xff] }
 0x3d9   :  { %4228 = vmatprep.subr.bf16.mxu0 %v7226_v20  ;;  %4292 = vmatprep.subr.bf16.mxu1 %v7227_v6  ;;  %v7237_v20 = vld [vmem:[#allocation54_spill] sm:$0xff]  ;;  %v7238_v6 = vld [vmem:[#allocation55_spill] sm:$0xff] }
 0x3dc   :  { %4230 = vmatpush1.bf16.msra.mxu0 %v7228_v0  ;;  %4294 = vmatpush1.bf16.msra.mxu1 %v7229_v17  ;;  %v7239_v0 = vld [vmem:[#allocation56_spill] sm:$0xff]  ;;  %v7240_v17 = vld [vmem:[#allocation57_spill] sm:$0xff] }
 0x3dd   :  { %4232 = vmatprep.subr.bf16.mxu0 %v7230_v53  ;;  %4296 = vmatprep.subr.bf16.mxu1 %v7231_v26  ;;  %v7241_v53 = vld [vmem:[#allocation58_spill] sm:$0xff]  ;;  %v7242_v26 = vld [vmem:[#allocation59_spill] sm:$0xff] }
 0x3e0   :  { %4234 = vmatpush1.bf16.msra.mxu0 %v7232_v14  ;;  %4298 = vmatpush1.bf16.msra.mxu1 %v7233_v49  ;;  %v7243_v14 = vld [vmem:[#allocation60_spill] sm:$0xff]  ;;  %v7244_v49 = vld [vmem:[#allocation61_spill] sm:$0xff] }
 0x3e1   :  { %4236 = vmatprep.subr.bf16.mxu0 %v7234_v51  ;;  %4300 = vmatprep.subr.bf16.mxu1 %v7235_v4  ;;  %v7245_v51 = vld [vmem:[#allocation62_spill] sm:$0xff]  ;;  %v7246_v4 = vld [vmem:[#allocation63_spill] sm:$0xff] }
 0x3e4   :  { %4238 = vmatpush1.bf16.msra.mxu0 %v7236_v48  ;;  %4302 = vmatpush1.bf16.msra.mxu1 %v7237_v20  ;;  %v7247_v48 = vld [vmem:[#allocation64_spill] sm:$0xff]  ;;  %v7248_v20 = vld [vmem:[#allocation65_spill] sm:$0xff] }
 0x3e5   :  { %4240 = vmatprep.subr.bf16.mxu0 %v7238_v6  ;;  %4304 = vmatprep.subr.bf16.mxu1 %v7239_v0  ;;  %v7249_v6 = vld [vmem:[#allocation66_spill] sm:$0xff]  ;;  %v7250_v0 = vld [vmem:[#allocation9_spill] sm:$0xff] }
 0x3e8   :  { %4242 = vmatpush1.bf16.msra.mxu0 %v7240_v17  ;;  %4306 = vmatpush1.bf16.msra.mxu1 %v7241_v53  ;;  %v7251_v17 = vld [vmem:[#allocation10_spill] sm:$0xff] }
 0x3e9   :  { %4244 = vmatprep.subr.bf16.mxu0 %v7242_v26  ;;  %4308 = vmatprep.subr.bf16.mxu1 %v7243_v14 }
 0x3ec   :  { %4246 = vmatpush1.bf16.msra.mxu0 %v7244_v49  ;;  %4310 = vmatpush1.bf16.msra.mxu1 %v7245_v51 }
 0x3ed   :  { %4248 = vmatprep.subr.bf16.mxu0 %v7246_v4  ;;  %4312 = vmatprep.subr.bf16.mxu1 %v7247_v48  ;;  %v7253_v48 = vld [vmem:[#allocation71_spill] sm:$0xff] }
 0x3f0   :  { %4250 = vmatpush1.bf16.msra.mxu0 %v7248_v20  ;;  %4314 = vmatpush1.bf16.msra.mxu1 %v7249_v6 }
 0x3f1   :  { %4316 = vmatprep.subr.bf16.mxu0 %v7250_v0  ;;  %4348 = vmatprep.subr.bf16.mxu1 %v7251_v17 }
 0x466   :  { %v1503_v53 = vpop.f32.mrb[20].mxu0  ;;  %v1574_v26 = vpop.f32.mrb[20].mxu1 }
 0x467   :  { %v1504_v14 = vadd.f32 %v1503_v53, %v7252_v13  ;;  %v1505_v10 = vpop.f32.mrb[21].mxu0  ;;  %v1576_v49 = vpop.f32.mrb[21].mxu1  ;;  %v1575_v6 = vadd.f32 %v1574_v26, %v7193_v16 }
 0x468   :  { %v1506_v51 = vadd.f32 %v1505_v10, %v7191_v40  ;;  %v1577_v20 = vadd.f32 %v1576_v49, %v7253_v48 }
 0x469   :  { %v3453_v41 = vmul.f32 -1.442695, %v1504_v14 }
 0x46a   :  { %v3454_v4 = vmul.f32 -1.442695, %v1506_v51  ;;  %v3455_v44 = vmul.f32 -1.442695, %v1577_v20 }
 0x46b   :  { %5258 = vpow2.f32 %v3453_v41 }
 0x46c   :  { %5260 = vpow2.f32 %v3454_v4 }
 0x46d   :  { %5262 = vpow2.f32 %v3455_v44 }
 0x46e   :  { %5264 = vtanh.f32 %v1575_v6 }
 0x475   :  { %v5259_v0 = vpop.eup %5258 }
 0x476   :  { %v5261_v21 = vpop.eup %5260  ;;  %v1582_v17 = vadd.f32 1.0, %v5259_v0 }
 0x477   :  { %v1588_v23 = vadd.f32 1.0, %v5261_v21  ;;  %v5263_v13 = vpop.eup %5262 }
 0x478   :  { %5266 = vrcp.f32 %v1582_v17  ;;  %v5265_v53 = vpop.eup %5264  ;;  %v1595_v41 = vadd.f32 1.0, %v5263_v13  ;;  %v7254_v17 = vld [vmem:[#allocation68_spill] sm:$0xff] }
 0x479   :  { %5268 = vrcp.f32 %v1588_v23 }
 0x47a   :  { %5270 = vrcp.f32 %v1595_v41 }
 0x482   :  { %v5267_v40 = vpop.eup %5266 }
 0x483   :  { %v5269_v10 = vpop.eup %5268  ;;  %v1599_v51 = vmul.f32 %v5267_v40, %v5265_v53 }
 0x484   :  { %v1598_v4 = vmul.f32 %v5269_v10, %v6196_v30  ;;  %v5271_v30 = vpop.eup %5270 }
 0x486   :  { %v1676_v48 = vpop.f32.mrb[6].mxu0  ;;  %v1747_v20 = vpop.f32.mrb[6].mxu1  ;;  %v6310_v14 = vadd.f32 %v1599_v51, %v1598_v4 }
 0x487   :  { %v5113_v16 = vadd.f32 %v1676_v48, %v7134_v31  ;;  %v1678_v44 = vpop.f32.mrb[7].mxu0  ;;  %v1749_v6 = vpop.f32.mrb[7].mxu1  ;;  %v5129_v53 = vadd.f32 %v1747_v20, %v5954_v63 }
 0x488   :  { %v5114_v21 = vadd.f32 %v1678_v44, %v5947_v3  ;;  %5272 = vtanh.f32 %v6310_v14  ;;  %v5130_v26 = vadd.f32 %v1749_v6, %v7254_v17 }
 0x489   :  { %v3456_v23 = vmul.f32 -1.442695, %v5113_v16 }
 0x48a   :  { %v3457_v0 = vmul.f32 -1.442695, %v5114_v21  ;;  %v3458_v13 = vmul.f32 -1.442695, %v5130_v26 }
 0x48b   :  { %5274 = vpow2.f32 %v3456_v23 }
 0x48c   :  { %5276 = vpow2.f32 %v3457_v0 }
 0x48d   :  { %5278 = vpow2.f32 %v3458_v13  ;;  %v7256_v13 = vld [vmem:[#allocation13_spill] sm:$0xff] }
 0x48e   :  { %5280 = vtanh.f32 %v5129_v53  ;;  %v7257_v53 = vld [vmem:[#allocation14_spill] sm:$0xff] }
 0x492   :  { %v5273_v49 = vpop.eup %5272 }
 0x493   :  { %v1602_v40 = vmul.f32 %v5273_v49, %v5271_v30 }
 0x495   :  { %v5275_v10 = vpop.eup %5274  ;;  %1844 = vmatprep.mubr.f32.mxu0 %v1602_v40  ;;  %1915 = vmatprep.mubr.f32.mxu1 %v1602_v40  ;;  %v7258_v40 = vld [vmem:[#allocation15_spill] sm:$0xff] }
 0x496   :  { %v5277_v51 = vpop.eup %5276  ;;  %v1759_v41 = vadd.f32 1.0, %v5275_v10  ;;  %v7259_v10 = vld [vmem:[#allocation16_spill] sm:$0xff] }
 0x497   :  { %v1765_v4 = vadd.f32 1.0, %v5277_v51  ;;  %v5279_v48 = vpop.eup %5278  ;;  %v7260_v51 = vld [vmem:[#allocation17_spill] sm:$0xff] }
 0x498   :  { %5282 = vrcp.f32 %v1759_v41  ;;  %v5281_v16 = vpop.eup %5280  ;;  %v1772_v23 = vadd.f32 1.0, %v5279_v48  ;;  %v7261_v41 = vld [vmem:[#allocation18_spill] sm:$0xff]  ;;  %v7263_v48 = vld [vmem:[#allocation20_spill] sm:$0xff] }
 0x499   :  { %5284 = vrcp.f32 %v1765_v4  ;;  %v7262_v4 = vld [vmem:[#allocation19_spill] sm:$0xff] }
 0x49a   :  { %5286 = vrcp.f32 %v1772_v23  ;;  %v7268_v23 = vld [vmem:[#allocation25_spill] sm:$0xff] }
 0x4a2   :  { %v5283_v44 = vpop.eup %5282 }
 0x4a3   :  { %v5285_v6 = vpop.eup %5284  ;;  %v1776_v21 = vmul.f32 %v5283_v44, %v5281_v16  ;;  %v7264_v16 = vld [vmem:[#allocation21_spill] sm:$0xff]  ;;  %v7265_v44 = vld [vmem:[#allocation22_spill] sm:$0xff] }
 0x4a4   :  { %v1775_v0 = vmul.f32 %v5285_v6, %v6204_v9  ;;  %v5287_v26 = vpop.eup %5286  ;;  %v7255_v9 = vld [vmem:[#allocation12_spill] sm:$0xff]  ;;  %v7266_v6 = vld [vmem:[#allocation23_spill] sm:$0xff] }
 0x4a6   :  { %v6318_v20 = vadd.f32 %v1776_v21, %v1775_v0  ;;  %v7267_v21 = vld [vmem:[#allocation24_spill] sm:$0xff]  ;;  %v7269_v0 = vld [vmem:[#allocation26_spill] sm:$0xff] }
 0x4a8   :  { %5288 = vtanh.f32 %v6318_v20 }
 0x4b2   :  { %v5289_v30 = vpop.eup %5288 }
 0x4b3   :  { %v1779_v49 = vmul.f32 %v5289_v30, %v5287_v26  ;;  %v7270_v26 = vld [vmem:[#allocation27_spill] sm:$0xff]  ;;  %v7271_v30 = vld [vmem:[#allocation28_spill] sm:$0xff] }
 0x4b5   :  { %1845 = vmatmul.mubr.f32.vlgmr.msra.gmra.mrb[22].mxu0 %v1779_v49  ;;  %1916 = vmatmul.mubr.f32.vlgmr.msra.gmra.mrb[22].mxu1 %v1779_v49 }
 0x4b6   :  { %4318 = vmatpush1.bf16.msra.mxu0 %v5599_v22  ;;  %4350 = vmatpush1.bf16.msra.mxu1 %v5602_v25 }
 0x4b7   :  { %4320 = vmatprep.subr.bf16.mxu0 %v5606_v29  ;;  %4352 = vmatprep.subr.bf16.mxu1 %v5613_v34 }
 0x4b8   :  { %2017 = vmatprep.mubr.f32.mxu0 %v7077_v55  ;;  %2088 = vmatprep.mubr.f32.mxu1 %v7077_v55 }
 0x4ba   :  { %4322 = vmatpush1.bf16.msra.mxu0 %v5615_v35  ;;  %4354 = vmatpush1.bf16.msra.mxu1 %v5619_v38 }
 0x4bb   :  { %4324 = vmatprep.subr.bf16.mxu0 %v5623_v42  ;;  %4356 = vmatprep.subr.bf16.mxu1 %v5630_v47 }
 0x4be   :  { %4326 = vmatpush1.bf16.msra.mxu0 %v5634_v50  ;;  %4358 = vmatpush1.bf16.msra.mxu1 %v5638_v54 }
 0x4bf   :  { %4328 = vmatprep.subr.bf16.mxu0 %v5642_v58  ;;  %4360 = vmatprep.subr.bf16.mxu1 %v5646_v61 }
 0x4c2   :  { %4330 = vmatpush1.bf16.msra.mxu0 %v5653_v2  ;;  %4362 = vmatpush1.bf16.msra.mxu1 %v5657_v5 }
 0x4c3   :  { %4332 = vmatprep.subr.bf16.mxu0 %v5661_v8  ;;  %4364 = vmatprep.subr.bf16.mxu1 %v5665_v11 }
 0x4c6   :  { %4334 = vmatpush1.bf16.msra.mxu0 %v5672_v15  ;;  %4366 = vmatpush1.bf16.msra.mxu1 %v5676_v19 }
 0x4c7   :  { %4336 = vmatprep.subr.bf16.mxu0 %v5680_v24  ;;  %4368 = vmatprep.subr.bf16.mxu1 %v5684_v28 }
 0x4ca   :  { %4338 = vmatpush1.bf16.msra.mxu0 %v5691_v33  ;;  %4370 = vmatpush1.bf16.msra.mxu1 %v5695_v39 }
 0x4cb   :  { %4340 = vmatprep.subr.bf16.mxu0 %v5699_v43  ;;  %4372 = vmatprep.subr.bf16.mxu1 %v5703_v46 }
 0x4ce   :  { %4342 = vmatpush1.bf16.msra.mxu0 %v5710_v52  ;;  %4374 = vmatpush1.bf16.msra.mxu1 %v5714_v56 }
 0x4cf   :  { %4344 = vmatprep.subr.bf16.mxu0 %v5718_v60  ;;  %4376 = vmatprep.subr.bf16.mxu1 %v5722_v1 }
 0x4d2   :  { %4346 = vmatpush1.bf16.msra.mxu0 %v5729_v7  ;;  %4378 = vmatpush1.bf16.msra.mxu1 %v5733_v12 }
 0x4d3   :  { %4380 = vmatprep.subr.bf16.mxu0 %v5737_v18  ;;  %4444 = vmatprep.subr.bf16.mxu1 %v5741_v27 }
 0x4d5   :  { %2018 = vmatmul.mubr.f32.vlgmr.msra.gmra.mrb[8].mxu0 %v1779_v49  ;;  %2089 = vmatmul.mubr.f32.vlgmr.msra.gmra.mrb[8].mxu1 %v1779_v49  ;;  %v7272_v49 = vld [vmem:[#allocation29_spill] sm:$0xff] }
 0x4d6   :  { %4382 = vmatpush1.bf16.msra.mxu0 %v5745_v32  ;;  %4446 = vmatpush1.bf16.msra.mxu1 %v5749_v36 }
 0x4d7   :  { %4384 = vmatprep.subr.bf16.mxu0 %v5751_v37  ;;  %4448 = vmatprep.subr.bf16.mxu1 %v5755_v45 }
 0x4da   :  { %4386 = vmatpush1.bf16.msra.mxu0 %v5761_v57  ;;  %4450 = vmatpush1.bf16.msra.mxu1 %v5765_v59 }
 0x4db   :  { %4388 = vmatprep.subr.bf16.mxu0 %v5767_v62  ;;  %4452 = vmatprep.subr.bf16.mxu1 %v7255_v9 }
 0x4de   :  { %4390 = vmatpush1.bf16.msra.mxu0 %v7256_v13  ;;  %4454 = vmatpush1.bf16.msra.mxu1 %v7257_v53 }
 0x4df   :  { %4392 = vmatprep.subr.bf16.mxu0 %v7258_v40  ;;  %4456 = vmatprep.subr.bf16.mxu1 %v7259_v10 }
 0x4e2   :  { %4394 = vmatpush1.bf16.msra.mxu0 %v7260_v51  ;;  %4458 = vmatpush1.bf16.msra.mxu1 %v7261_v41  ;;  %v6440_v41 = vld [vmem:[%s6877_s5 + $0x10] sm:$0xff] }
 0x4e3   :  { %4396 = vmatprep.subr.bf16.mxu0 %v7262_v4  ;;  %4460 = vmatprep.subr.bf16.mxu1 %v7263_v48  ;;  %v7273_v4 = vld [vmem:[#allocation30_spill] sm:$0xff]  ;;  %v7274_v48 = vld [vmem:[#allocation31_spill] sm:$0xff] }
 0x4e6   :  { %4398 = vmatpush1.bf16.msra.mxu0 %v7264_v16  ;;  %4462 = vmatpush1.bf16.msra.mxu1 %v7265_v44  ;;  %v7275_v16 = vld [vmem:[#allocation32_spill] sm:$0xff]  ;;  %v7276_v44 = vld [vmem:[#allocation33_spill] sm:$0xff] }
 0x4e7   :  { %4400 = vmatprep.subr.bf16.mxu0 %v7266_v6  ;;  %4464 = vmatprep.subr.bf16.mxu1 %v7267_v21  ;;  %v7277_v6 = vld [vmem:[#allocation34_spill] sm:$0xff]  ;;  %v7278_v21 = vld [vmem:[#allocation35_spill] sm:$0xff] }
 0x4ea   :  { %4402 = vmatpush1.bf16.msra.mxu0 %v7268_v23  ;;  %4466 = vmatpush1.bf16.msra.mxu1 %v7269_v0  ;;  %v7279_v23 = vld [vmem:[#allocation36_spill] sm:$0xff]  ;;  %v7280_v0 = vld [vmem:[#allocation37_spill] sm:$0xff] }
 0x4eb   :  { %4404 = vmatprep.subr.bf16.mxu0 %v7270_v26  ;;  %4468 = vmatprep.subr.bf16.mxu1 %v7271_v30  ;;  %v7281_v26 = vld [vmem:[#allocation38_spill] sm:$0xff]  ;;  %v7282_v30 = vld [vmem:[#allocation39_spill] sm:$0xff] }
 0x4ee   :  { %4406 = vmatpush1.bf16.msra.mxu0 %v7272_v49  ;;  %4470 = vmatpush1.bf16.msra.mxu1 %v7273_v4  ;;  %v7283_v49 = vld [vmem:[#allocation40_spill] sm:$0xff]  ;;  %v7284_v4 = vld [vmem:[#allocation41_spill] sm:$0xff] }
 0x4ef   :  { %4408 = vmatprep.subr.bf16.mxu0 %v7274_v48  ;;  %4472 = vmatprep.subr.bf16.mxu1 %v7275_v16  ;;  %v7285_v48 = vld [vmem:[#allocation42_spill] sm:$0xff]  ;;  %v7286_v16 = vld [vmem:[#allocation43_spill] sm:$0xff] }
 0x4f2   :  { %4410 = vmatpush1.bf16.msra.mxu0 %v7276_v44  ;;  %4474 = vmatpush1.bf16.msra.mxu1 %v7277_v6  ;;  %v7287_v44 = vld [vmem:[#allocation44_spill] sm:$0xff]  ;;  %v7288_v6 = vld [vmem:[#allocation45_spill] sm:$0xff] }
 0x4f3   :  { %4412 = vmatprep.subr.bf16.mxu0 %v7278_v21  ;;  %4476 = vmatprep.subr.bf16.mxu1 %v7279_v23  ;;  %v7289_v21 = vld [vmem:[#allocation46_spill] sm:$0xff]  ;;  %v7290_v23 = vld [vmem:[#allocation47_spill] sm:$0xff] }
 0x4f6   :  { %4414 = vmatpush1.bf16.msra.mxu0 %v7280_v0  ;;  %4478 = vmatpush1.bf16.msra.mxu1 %v7281_v26  ;;  %v7291_v0 = vld [vmem:[#allocation48_spill] sm:$0xff]  ;;  %v7292_v26 = vld [vmem:[#allocation49_spill] sm:$0xff] }
 0x4f7   :  { %4416 = vmatprep.subr.bf16.mxu0 %v7282_v30  ;;  %4480 = vmatprep.subr.bf16.mxu1 %v7283_v49  ;;  %v7293_v30 = vld [vmem:[#allocation50_spill] sm:$0xff]  ;;  %v7294_v49 = vld [vmem:[#allocation51_spill] sm:$0xff] }
 0x4fa   :  { %4418 = vmatpush1.bf16.msra.mxu0 %v7284_v4  ;;  %4482 = vmatpush1.bf16.msra.mxu1 %v7285_v48  ;;  %v7295_v4 = vld [vmem:[#allocation52_spill] sm:$0xff]  ;;  %v7296_v48 = vld [vmem:[#allocation53_spill] sm:$0xff] }
 0x4fb   :  { %4420 = vmatprep.subr.bf16.mxu0 %v7286_v16  ;;  %4484 = vmatprep.subr.bf16.mxu1 %v7287_v44  ;;  %v7297_v16 = vld [vmem:[#allocation54_spill] sm:$0xff]  ;;  %v7298_v44 = vld [vmem:[#allocation55_spill] sm:$0xff] }
 0x4fe   :  { %4422 = vmatpush1.bf16.msra.mxu0 %v7288_v6  ;;  %4486 = vmatpush1.bf16.msra.mxu1 %v7289_v21  ;;  %v7299_v6 = vld [vmem:[#allocation56_spill] sm:$0xff]  ;;  %v7300_v21 = vld [vmem:[#allocation57_spill] sm:$0xff] }
 0x4ff   :  { %4424 = vmatprep.subr.bf16.mxu0 %v7290_v23  ;;  %4488 = vmatprep.subr.bf16.mxu1 %v7291_v0  ;;  %v7301_v23 = vld [vmem:[#allocation58_spill] sm:$0xff]  ;;  %v7302_v0 = vld [vmem:[#allocation59_spill] sm:$0xff] }
 0x502   :  { %4426 = vmatpush1.bf16.msra.mxu0 %v7292_v26  ;;  %4490 = vmatpush1.bf16.msra.mxu1 %v7293_v30  ;;  %v7303_v26 = vld [vmem:[#allocation60_spill] sm:$0xff]  ;;  %v7304_v30 = vld [vmem:[#allocation61_spill] sm:$0xff] }
 0x503   :  { %4428 = vmatprep.subr.bf16.mxu0 %v7294_v49  ;;  %4492 = vmatprep.subr.bf16.mxu1 %v7295_v4  ;;  %v7305_v49 = vld [vmem:[#allocation62_spill] sm:$0xff]  ;;  %v7306_v4 = vld [vmem:[#allocation63_spill] sm:$0xff] }
 0x506   :  { %4430 = vmatpush1.bf16.msra.mxu0 %v7296_v48  ;;  %4494 = vmatpush1.bf16.msra.mxu1 %v7297_v16  ;;  %v7307_v48 = vld [vmem:[#allocation64_spill] sm:$0xff]  ;;  %v7308_v16 = vld [vmem:[#allocation65_spill] sm:$0xff] }
 0x507   :  { %4432 = vmatprep.subr.bf16.mxu0 %v7298_v44  ;;  %4496 = vmatprep.subr.bf16.mxu1 %v7299_v6  ;;  %v7309_v44 = vld [vmem:[#allocation66_spill] sm:$0xff]  ;;  %v7310_v6 = vld [vmem:[#allocation9_spill] sm:$0xff] }
 0x50a   :  { %4434 = vmatpush1.bf16.msra.mxu0 %v7300_v21  ;;  %4498 = vmatpush1.bf16.msra.mxu1 %v7301_v23  ;;  %v7311_v21 = vld [vmem:[#allocation10_spill] sm:$0xff] }
 0x50b   :  { %4436 = vmatprep.subr.bf16.mxu0 %v7302_v0  ;;  %4500 = vmatprep.subr.bf16.mxu1 %v7303_v26 }
 0x50e   :  { %4438 = vmatpush1.bf16.msra.mxu0 %v7304_v30  ;;  %4502 = vmatpush1.bf16.msra.mxu1 %v7305_v49  ;;  %v6422_v30 = vld [vmem:[%s6877_s5] sm:$0xff] }
 0x50f   :  { %4440 = vmatprep.subr.bf16.mxu0 %v7306_v4  ;;  %4504 = vmatprep.subr.bf16.mxu1 %v7307_v48  ;;  %7312 = vst [vmem:[#allocation67_spill] sm:$0xff] %v6422_v30  ;;  %v6434_v48 = vld [vmem:[%s6877_s5 + $0x18] sm:$0xff] }
 0x510   :  { %7314 = vst [vmem:[#allocation72_spill] sm:$0xff] %v6434_v48 }
 0x512   :  { %4442 = vmatpush1.bf16.msra.mxu0 %v7308_v16  ;;  %4506 = vmatpush1.bf16.msra.mxu1 %v7309_v44  ;;  %v6428_v16 = vld [vmem:[%s6877_s5 + $0x8] sm:$0xff] }
 0x513   :  { %4508 = vmatprep.subr.bf16.mxu0 %v7310_v6  ;;  %4540 = vmatprep.subr.bf16.mxu1 %v7311_v21  ;;  %7313 = vst [vmem:[#allocation70_spill] sm:$0xff] %v6428_v16 }
 0x588   :  { %v1846_v23 = vpop.f32.mrb[22].mxu0  ;;  %v1917_v0 = vpop.f32.mrb[22].mxu1 }
 0x589   :  { %v1847_v49 = vadd.f32 %v6422_v30, %v1846_v23  ;;  %v1848_v4 = vpop.f32.mrb[23].mxu0  ;;  %v1919_v26 = vpop.f32.mrb[23].mxu1  ;;  %v1918_v51 = vadd.f32 %v6440_v41, %v1917_v0 }
 0x58a   :  { %v1849_v6 = vadd.f32 %v6428_v16, %v1848_v4  ;;  %v1920_v23 = vadd.f32 %v6434_v48, %v1919_v26 }
 0x58b   :  { %v3459_v44 = vmul.f32 -1.442695, %v1847_v49 }
 0x58c   :  { %v3460_v21 = vmul.f32 -1.442695, %v1849_v6  ;;  %v3461_v30 = vmul.f32 -1.442695, %v1920_v23 }
 0x58d   :  { %5290 = vpow2.f32 %v3459_v44 }
 0x58e   :  { %5292 = vpow2.f32 %v3460_v21 }
 0x58f   :  { %5294 = vpow2.f32 %v3461_v30 }
 0x590   :  { %5296 = vtanh.f32 %v1918_v51 }
 0x597   :  { %v5291_v4 = vpop.eup %5290 }
 0x598   :  { %v5293_v49 = vpop.eup %5292  ;;  %v1925_v6 = vadd.f32 1.0, %v5291_v4 }
 0x599   :  { %v1931_v44 = vadd.f32 1.0, %v5293_v49  ;;  %v5295_v21 = vpop.eup %5294 }
 0x59a   :  { %5298 = vrcp.f32 %v1925_v6  ;;  %v5297_v16 = vpop.eup %5296  ;;  %v1938_v48 = vadd.f32 1.0, %v5295_v21 }
 0x59b   :  { %5300 = vrcp.f32 %v1931_v44 }
 0x59c   :  { %5302 = vrcp.f32 %v1938_v48 }
 0x5a4   :  { %v5299_v10 = vpop.eup %5298 }
 0x5a5   :  { %v5301_v26 = vpop.eup %5300  ;;  %v1942_v23 = vmul.f32 %v5299_v10, %v5297_v16 }
 0x5a6   :  { %v1941_v40 = vmul.f32 %v5301_v26, %v6310_v14  ;;  %v5303_v14 = vpop.eup %5302 }
 0x5a8   :  { %v2019_v53 = vpop.f32.mrb[8].mxu0  ;;  %v2090_v13 = vpop.f32.mrb[8].mxu1  ;;  %v6444_v9 = vadd.f32 %v1942_v23, %v1941_v40 }
 0x5a9   :  { %v5115_v0 = vadd.f32 %v2019_v53, %v7134_v31  ;;  %v2021_v30 = vpop.f32.mrb[9].mxu0  ;;  %v2092_v51 = vpop.f32.mrb[9].mxu1  ;;  %v5131_v40 = vadd.f32 %v2090_v13, %v5954_v63 }
 0x5aa   :  { %v5116_v4 = vadd.f32 %v2021_v30, %v5947_v3  ;;  %5304 = vtanh.f32 %v6444_v9  ;;  %v5132_v10 = vadd.f32 %v2092_v51, %v7254_v17 }
 0x5ab   :  { %v3462_v49 = vmul.f32 -1.442695, %v5115_v0 }
 0x5ac   :  { %v3463_v6 = vmul.f32 -1.442695, %v5116_v4  ;;  %v3464_v44 = vmul.f32 -1.442695, %v5132_v10 }
 0x5ad   :  { %5306 = vpow2.f32 %v3462_v49 }
 0x5ae   :  { %5308 = vpow2.f32 %v3463_v6 }
 0x5af   :  { %5310 = vpow2.f32 %v3464_v44 }
 0x5b0   :  { %5312 = vtanh.f32 %v5131_v40  ;;  %v7316_v40 = vld [vmem:[#allocation13_spill] sm:$0xff] }
 0x5b4   :  { %v5305_v16 = vpop.eup %5304 }
 0x5b5   :  { %v1945_v48 = vmul.f32 %v5305_v16, %v5303_v14 }
 0x5b7   :  { %v5307_v21 = vpop.eup %5306  ;;  %2187 = vmatprep.mubr.f32.mxu0 %v1945_v48  ;;  %2258 = vmatprep.mubr.f32.mxu1 %v1945_v48  ;;  %v7317_v48 = vld [vmem:[#allocation14_spill] sm:$0xff] }
 0x5b8   :  { %v5309_v53 = vpop.eup %5308  ;;  %v2102_v26 = vadd.f32 1.0, %v5307_v21  ;;  %v7318_v21 = vld [vmem:[#allocation15_spill] sm:$0xff] }
 0x5b9   :  { %v2108_v23 = vadd.f32 1.0, %v5309_v53  ;;  %v5311_v0 = vpop.eup %5310  ;;  %v7319_v53 = vld [vmem:[#allocation16_spill] sm:$0xff] }
 0x5ba   :  { %5314 = vrcp.f32 %v2102_v26  ;;  %v5313_v30 = vpop.eup %5312  ;;  %v2115_v6 = vadd.f32 1.0, %v5311_v0  ;;  %v7320_v26 = vld [vmem:[#allocation17_spill] sm:$0xff]  ;;  %v7322_v0 = vld [vmem:[#allocation19_spill] sm:$0xff] }
 0x5bb   :  { %5316 = vrcp.f32 %v2108_v23  ;;  %v7321_v23 = vld [vmem:[#allocation18_spill] sm:$0xff] }
 0x5bc   :  { %5318 = vrcp.f32 %v2115_v6  ;;  %v7327_v6 = vld [vmem:[#allocation24_spill] sm:$0xff] }
 0x5c4   :  { %v5315_v4 = vpop.eup %5314 }
 0x5c5   :  { %v5317_v51 = vpop.eup %5316  ;;  %v2119_v49 = vmul.f32 %v5315_v4, %v5313_v30  ;;  %v7323_v30 = vld [vmem:[#allocation20_spill] sm:$0xff]  ;;  %v7324_v4 = vld [vmem:[#allocation21_spill] sm:$0xff] }
 0x5c6   :  { %v2118_v10 = vmul.f32 %v5317_v51, %v6318_v20  ;;  %v5319_v14 = vpop.eup %5318  ;;  %v7315_v20 = vld [vmem:[#allocation12_spill] sm:$0xff]  ;;  %v7325_v51 = vld [vmem:[#allocation22_spill] sm:$0xff] }
 0x5c8   :  { %v6452_v13 = vadd.f32 %v2119_v49, %v2118_v10  ;;  %v7326_v49 = vld [vmem:[#allocation23_spill] sm:$0xff]  ;;  %v7328_v10 = vld [vmem:[#allocation25_spill] sm:$0xff] }
 0x5ca   :  { %5320 = vtanh.f32 %v6452_v13 }
 0x5d4   :  { %v5321_v16 = vpop.eup %5320 }
 0x5d5   :  { %v2122_v44 = vmul.f32 %v5321_v16, %v5319_v14  ;;  %v7329_v14 = vld [vmem:[#allocation26_spill] sm:$0xff]  ;;  %v7330_v16 = vld [vmem:[#allocation27_spill] sm:$0xff] }
 0x5d7   :  { %2188 = vmatmul.mubr.f32.vlgmr.msra.gmra.mrb[24].mxu0 %v2122_v44  ;;  %2259 = vmatmul.mubr.f32.vlgmr.msra.gmra.mrb[24].mxu1 %v2122_v44 }
 0x5d8   :  { %4510 = vmatpush1.bf16.msra.mxu0 %v5599_v22  ;;  %4542 = vmatpush1.bf16.msra.mxu1 %v5602_v25 }
 0x5d9   :  { %4512 = vmatprep.subr.bf16.mxu0 %v5606_v29  ;;  %4544 = vmatprep.subr.bf16.mxu1 %v5613_v34 }
 0x5da   :  { %2360 = vmatprep.mubr.f32.mxu0 %v7077_v55  ;;  %2431 = vmatprep.mubr.f32.mxu1 %v7077_v55 }
 0x5dc   :  { %4514 = vmatpush1.bf16.msra.mxu0 %v5615_v35  ;;  %4546 = vmatpush1.bf16.msra.mxu1 %v5619_v38 }
 0x5dd   :  { %4516 = vmatprep.subr.bf16.mxu0 %v5623_v42  ;;  %4548 = vmatprep.subr.bf16.mxu1 %v5630_v47 }
 0x5e0   :  { %4518 = vmatpush1.bf16.msra.mxu0 %v5634_v50  ;;  %4550 = vmatpush1.bf16.msra.mxu1 %v5638_v54 }
 0x5e1   :  { %4520 = vmatprep.subr.bf16.mxu0 %v5642_v58  ;;  %4552 = vmatprep.subr.bf16.mxu1 %v5646_v61 }
 0x5e4   :  { %4522 = vmatpush1.bf16.msra.mxu0 %v5653_v2  ;;  %4554 = vmatpush1.bf16.msra.mxu1 %v5657_v5 }
 0x5e5   :  { %4524 = vmatprep.subr.bf16.mxu0 %v5661_v8  ;;  %4556 = vmatprep.subr.bf16.mxu1 %v5665_v11 }
 0x5e8   :  { %4526 = vmatpush1.bf16.msra.mxu0 %v5672_v15  ;;  %4558 = vmatpush1.bf16.msra.mxu1 %v5676_v19 }
 0x5e9   :  { %4528 = vmatprep.subr.bf16.mxu0 %v5680_v24  ;;  %4560 = vmatprep.subr.bf16.mxu1 %v5684_v28 }
 0x5ec   :  { %4530 = vmatpush1.bf16.msra.mxu0 %v5691_v33  ;;  %4562 = vmatpush1.bf16.msra.mxu1 %v5695_v39 }
 0x5ed   :  { %4532 = vmatprep.subr.bf16.mxu0 %v5699_v43  ;;  %4564 = vmatprep.subr.bf16.mxu1 %v5703_v46 }
 0x5f0   :  { %4534 = vmatpush1.bf16.msra.mxu0 %v5710_v52  ;;  %4566 = vmatpush1.bf16.msra.mxu1 %v5714_v56 }
 0x5f1   :  { %4536 = vmatprep.subr.bf16.mxu0 %v5718_v60  ;;  %4568 = vmatprep.subr.bf16.mxu1 %v5722_v1 }
 0x5f4   :  { %4538 = vmatpush1.bf16.msra.mxu0 %v5729_v7  ;;  %4570 = vmatpush1.bf16.msra.mxu1 %v5733_v12 }
 0x5f5   :  { %4572 = vmatprep.subr.bf16.mxu0 %v5737_v18  ;;  %4636 = vmatprep.subr.bf16.mxu1 %v5741_v27 }
 0x5f7   :  { %2361 = vmatmul.mubr.f32.vlgmr.msra.gmra.mrb[10].mxu0 %v2122_v44  ;;  %2432 = vmatmul.mubr.f32.vlgmr.msra.gmra.mrb[10].mxu1 %v2122_v44  ;;  %v7331_v44 = vld [vmem:[#allocation28_spill] sm:$0xff] }
 0x5f8   :  { %4574 = vmatpush1.bf16.msra.mxu0 %v5745_v32  ;;  %4638 = vmatpush1.bf16.msra.mxu1 %v5749_v36 }
 0x5f9   :  { %4576 = vmatprep.subr.bf16.mxu0 %v5751_v37  ;;  %4640 = vmatprep.subr.bf16.mxu1 %v5755_v45 }
 0x5fc   :  { %4578 = vmatpush1.bf16.msra.mxu0 %v5761_v57  ;;  %4642 = vmatpush1.bf16.msra.mxu1 %v5765_v59 }
 0x5fd   :  { %4580 = vmatprep.subr.bf16.mxu0 %v5767_v62  ;;  %4644 = vmatprep.subr.bf16.mxu1 %v7315_v20 }
 0x600   :  { %4582 = vmatpush1.bf16.msra.mxu0 %v7316_v40  ;;  %4646 = vmatpush1.bf16.msra.mxu1 %v7317_v48 }
 0x601   :  { %4584 = vmatprep.subr.bf16.mxu0 %v7318_v21  ;;  %4648 = vmatprep.subr.bf16.mxu1 %v7319_v53  ;;  %v7373_v21 = vld [vmem:[#allocation70_spill] sm:$0xff] }
 0x604   :  { %4586 = vmatpush1.bf16.msra.mxu0 %v7320_v26  ;;  %4650 = vmatpush1.bf16.msra.mxu1 %v7321_v23  ;;  %v7332_v23 = vld [vmem:[#allocation29_spill] sm:$0xff]  ;;  %v7372_v26 = vld [vmem:[#allocation67_spill] sm:$0xff] }
 0x605   :  { %4588 = vmatprep.subr.bf16.mxu0 %v7322_v0  ;;  %4652 = vmatprep.subr.bf16.mxu1 %v7323_v30  ;;  %v7333_v0 = vld [vmem:[#allocation30_spill] sm:$0xff]  ;;  %v7334_v30 = vld [vmem:[#allocation31_spill] sm:$0xff] }
 0x608   :  { %4590 = vmatpush1.bf16.msra.mxu0 %v7324_v4  ;;  %4654 = vmatpush1.bf16.msra.mxu1 %v7325_v51  ;;  %v7335_v4 = vld [vmem:[#allocation32_spill] sm:$0xff]  ;;  %v7336_v51 = vld [vmem:[#allocation33_spill] sm:$0xff] }
 0x609   :  { %4592 = vmatprep.subr.bf16.mxu0 %v7326_v49  ;;  %4656 = vmatprep.subr.bf16.mxu1 %v7327_v6  ;;  %v7337_v49 = vld [vmem:[#allocation34_spill] sm:$0xff]  ;;  %v7338_v6 = vld [vmem:[#allocation35_spill] sm:$0xff] }
 0x60c   :  { %4594 = vmatpush1.bf16.msra.mxu0 %v7328_v10  ;;  %4658 = vmatpush1.bf16.msra.mxu1 %v7329_v14  ;;  %v7339_v10 = vld [vmem:[#allocation36_spill] sm:$0xff]  ;;  %v7340_v14 = vld [vmem:[#allocation37_spill] sm:$0xff] }
 0x60d   :  { %4596 = vmatprep.subr.bf16.mxu0 %v7330_v16  ;;  %4660 = vmatprep.subr.bf16.mxu1 %v7331_v44  ;;  %v7341_v16 = vld [vmem:[#allocation38_spill] sm:$0xff]  ;;  %v7342_v44 = vld [vmem:[#allocation39_spill] sm:$0xff] }
 0x610   :  { %4598 = vmatpush1.bf16.msra.mxu0 %v7332_v23  ;;  %4662 = vmatpush1.bf16.msra.mxu1 %v7333_v0  ;;  %v7343_v23 = vld [vmem:[#allocation40_spill] sm:$0xff]  ;;  %v7344_v0 = vld [vmem:[#allocation41_spill] sm:$0xff] }
 0x611   :  { %4600 = vmatprep.subr.bf16.mxu0 %v7334_v30  ;;  %4664 = vmatprep.subr.bf16.mxu1 %v7335_v4  ;;  %v7345_v30 = vld [vmem:[#allocation42_spill] sm:$0xff]  ;;  %v7346_v4 = vld [vmem:[#allocation43_spill] sm:$0xff] }
 0x614   :  { %4602 = vmatpush1.bf16.msra.mxu0 %v7336_v51  ;;  %4666 = vmatpush1.bf16.msra.mxu1 %v7337_v49  ;;  %v7347_v51 = vld [vmem:[#allocation44_spill] sm:$0xff]  ;;  %v7348_v49 = vld [vmem:[#allocation45_spill] sm:$0xff] }
 0x615   :  { %4604 = vmatprep.subr.bf16.mxu0 %v7338_v6  ;;  %4668 = vmatprep.subr.bf16.mxu1 %v7339_v10  ;;  %v7349_v6 = vld [vmem:[#allocation46_spill] sm:$0xff]  ;;  %v7350_v10 = vld [vmem:[#allocation47_spill] sm:$0xff] }
 0x618   :  { %4606 = vmatpush1.bf16.msra.mxu0 %v7340_v14  ;;  %4670 = vmatpush1.bf16.msra.mxu1 %v7341_v16  ;;  %v7351_v14 = vld [vmem:[#allocation48_spill] sm:$0xff]  ;;  %v7352_v16 = vld [vmem:[#allocation49_spill] sm:$0xff] }
 0x619   :  { %4608 = vmatprep.subr.bf16.mxu0 %v7342_v44  ;;  %4672 = vmatprep.subr.bf16.mxu1 %v7343_v23  ;;  %v7353_v44 = vld [vmem:[#allocation50_spill] sm:$0xff]  ;;  %v7354_v23 = vld [vmem:[#allocation51_spill] sm:$0xff] }
 0x61c   :  { %4610 = vmatpush1.bf16.msra.mxu0 %v7344_v0  ;;  %4674 = vmatpush1.bf16.msra.mxu1 %v7345_v30  ;;  %v7355_v0 = vld [vmem:[#allocation52_spill] sm:$0xff]  ;;  %v7356_v30 = vld [vmem:[#allocation53_spill] sm:$0xff] }
 0x61d   :  { %4612 = vmatprep.subr.bf16.mxu0 %v7346_v4  ;;  %4676 = vmatprep.subr.bf16.mxu1 %v7347_v51  ;;  %v7357_v4 = vld [vmem:[#allocation54_spill] sm:$0xff]  ;;  %v7358_v51 = vld [vmem:[#allocation55_spill] sm:$0xff] }
 0x620   :  { %4614 = vmatpush1.bf16.msra.mxu0 %v7348_v49  ;;  %4678 = vmatpush1.bf16.msra.mxu1 %v7349_v6  ;;  %v7359_v49 = vld [vmem:[#allocation56_spill] sm:$0xff]  ;;  %v7360_v6 = vld [vmem:[#allocation57_spill] sm:$0xff] }
 0x621   :  { %4616 = vmatprep.subr.bf16.mxu0 %v7350_v10  ;;  %4680 = vmatprep.subr.bf16.mxu1 %v7351_v14  ;;  %v7361_v10 = vld [vmem:[#allocation58_spill] sm:$0xff]  ;;  %v7362_v14 = vld [vmem:[#allocation59_spill] sm:$0xff] }
 0x624   :  { %4618 = vmatpush1.bf16.msra.mxu0 %v7352_v16  ;;  %4682 = vmatpush1.bf16.msra.mxu1 %v7353_v44  ;;  %v7363_v16 = vld [vmem:[#allocation60_spill] sm:$0xff]  ;;  %v7364_v44 = vld [vmem:[#allocation61_spill] sm:$0xff] }
 0x625   :  { %4620 = vmatprep.subr.bf16.mxu0 %v7354_v23  ;;  %4684 = vmatprep.subr.bf16.mxu1 %v7355_v0  ;;  %v7365_v23 = vld [vmem:[#allocation62_spill] sm:$0xff]  ;;  %v7366_v0 = vld [vmem:[#allocation63_spill] sm:$0xff] }
 0x628   :  { %4622 = vmatpush1.bf16.msra.mxu0 %v7356_v30  ;;  %4686 = vmatpush1.bf16.msra.mxu1 %v7357_v4  ;;  %v7367_v30 = vld [vmem:[#allocation64_spill] sm:$0xff]  ;;  %v7368_v4 = vld [vmem:[#allocation65_spill] sm:$0xff] }
 0x629   :  { %4624 = vmatprep.subr.bf16.mxu0 %v7358_v51  ;;  %4688 = vmatprep.subr.bf16.mxu1 %v7359_v49  ;;  %v7369_v51 = vld [vmem:[#allocation66_spill] sm:$0xff]  ;;  %v7370_v49 = vld [vmem:[#allocation9_spill] sm:$0xff] }
 0x62c   :  { %4626 = vmatpush1.bf16.msra.mxu0 %v7360_v6  ;;  %4690 = vmatpush1.bf16.msra.mxu1 %v7361_v10  ;;  %v7371_v6 = vld [vmem:[#allocation10_spill] sm:$0xff] }
 0x62d   :  { %4628 = vmatprep.subr.bf16.mxu0 %v7362_v14  ;;  %4692 = vmatprep.subr.bf16.mxu1 %v7363_v16 }
 0x630   :  { %4630 = vmatpush1.bf16.msra.mxu0 %v7364_v44  ;;  %4694 = vmatpush1.bf16.msra.mxu1 %v7365_v23 }
 0x631   :  { %4632 = vmatprep.subr.bf16.mxu0 %v7366_v0  ;;  %4696 = vmatprep.subr.bf16.mxu1 %v7367_v30  ;;  %v7374_v30 = vld [vmem:[#allocation72_spill] sm:$0xff] }
 0x634   :  { %4634 = vmatpush1.bf16.msra.mxu0 %v7368_v4  ;;  %4698 = vmatpush1.bf16.msra.mxu1 %v7369_v51 }
 0x635   :  { %4700 = vmatprep.subr.bf16.mxu0 %v7370_v49  ;;  %4732 = vmatprep.subr.bf16.mxu1 %v7371_v6 }
 0x6aa   :  { %v2189_v10 = vpop.f32.mrb[24].mxu0  ;;  %v2260_v14 = vpop.f32.mrb[24].mxu1 }
 0x6ab   :  { %v2190_v16 = vadd.f32 %v7372_v26, %v2189_v10  ;;  %v2191_v53 = vpop.f32.mrb[25].mxu0  ;;  %v2262_v44 = vpop.f32.mrb[25].mxu1  ;;  %v2261_v51 = vadd.f32 %v6440_v41, %v2260_v14 }
 0x6ac   :  { %v2192_v23 = vadd.f32 %v7373_v21, %v2191_v53  ;;  %v2263_v4 = vadd.f32 %v7374_v30, %v2262_v44 }
 0x6ad   :  { %v3465_v48 = vmul.f32 -1.442695, %v2190_v16 }
 0x6ae   :  { %v3466_v0 = vmul.f32 -1.442695, %v2192_v23  ;;  %v3467_v40 = vmul.f32 -1.442695, %v2263_v4 }
 0x6af   :  { %5322 = vpow2.f32 %v3465_v48 }
 0x6b0   :  { %5324 = vpow2.f32 %v3466_v0 }
 0x6b1   :  { %5326 = vpow2.f32 %v3467_v40 }
 0x6b2   :  { %5328 = vtanh.f32 %v2261_v51 }
 0x6b9   :  { %v5323_v49 = vpop.eup %5322 }
 0x6ba   :  { %v5325_v20 = vpop.eup %5324  ;;  %v2268_v6 = vadd.f32 1.0, %v5323_v49 }
 0x6bb   :  { %v2274_v62 = vadd.f32 1.0, %v5325_v20  ;;  %v5327_v10 = vpop.eup %5326 }
 0x6bc   :  { %5330 = vrcp.f32 %v2268_v6  ;;  %v5329_v26 = vpop.eup %5328  ;;  %v2281_v48 = vadd.f32 1.0, %v5327_v10 }
 0x6bd   :  { %5332 = vrcp.f32 %v2274_v62 }
 0x6be   :  { %5334 = vrcp.f32 %v2281_v48 }
 0x6c6   :  { %v5331_v53 = vpop.eup %5330 }
 0x6c7   :  { %v5333_v16 = vpop.eup %5332  ;;  %v2285_v23 = vmul.f32 %v5331_v53, %v5329_v26 }
 0x6c8   :  { %v2284_v0 = vmul.f32 %v5333_v16, %v6444_v9  ;;  %v5335_v9 = vpop.eup %5334 }
 0x6ca   :  { %v2362_v44 = vpop.f32.mrb[10].mxu0  ;;  %v2433_v4 = vpop.f32.mrb[10].mxu1  ;;  %v6558_v30 = vadd.f32 %v2285_v23, %v2284_v0 }
 0x6cb   :  { %v5117_v49 = vadd.f32 %v2362_v44, %v7134_v31  ;;  %v2364_v40 = vpop.f32.mrb[11].mxu0  ;;  %v2435_v51 = vpop.f32.mrb[11].mxu1  ;;  %v5133_v53 = vadd.f32 %v2433_v4, %v5954_v63 }
 0x6cc   :  { %v5118_v20 = vadd.f32 %v2364_v40, %v5947_v3  ;;  %5336 = vtanh.f32 %v6558_v30  ;;  %v5134_v26 = vadd.f32 %v2435_v51, %v7254_v17 }
 0x6cd   :  { %v3468_v62 = vmul.f32 -1.442695, %v5117_v49 }
 0x6ce   :  { %v3469_v6 = vmul.f32 -1.442695, %v5118_v20  ;;  %v3470_v10 = vmul.f32 -1.442695, %v5134_v26 }
 0x6cf   :  { %5338 = vpow2.f32 %v3468_v62 }
 0x6d0   :  { %5340 = vpow2.f32 %v3469_v6 }
 0x6d1   :  { %5342 = vpow2.f32 %v3470_v10 }
 0x6d2   :  { %5344 = vtanh.f32 %v5133_v53  ;;  %v7376_v53 = vld [vmem:[#allocation12_spill] sm:$0xff] }
 0x6d6   :  { %v5337_v14 = vpop.eup %5336 }
 0x6d7   :  { %v2288_v16 = vmul.f32 %v5337_v14, %v5335_v9 }
 0x6d9   :  { %v5339_v23 = vpop.eup %5338  ;;  %2530 = vmatprep.mubr.f32.mxu0 %v2288_v16  ;;  %2601 = vmatprep.mubr.f32.mxu1 %v2288_v16  ;;  %v7377_v16 = vld [vmem:[#allocation13_spill] sm:$0xff] }
 0x6da   :  { %v5341_v48 = vpop.eup %5340  ;;  %v2445_v0 = vadd.f32 1.0, %v5339_v23  ;;  %v7378_v23 = vld [vmem:[#allocation14_spill] sm:$0xff] }
 0x6db   :  { %v2451_v44 = vadd.f32 1.0, %v5341_v48  ;;  %v5343_v49 = vpop.eup %5342  ;;  %v7379_v48 = vld [vmem:[#allocation15_spill] sm:$0xff] }
 0x6dc   :  { %5346 = vrcp.f32 %v2445_v0  ;;  %v5345_v40 = vpop.eup %5344  ;;  %v2458_v6 = vadd.f32 1.0, %v5343_v49  ;;  %v7380_v0 = vld [vmem:[#allocation16_spill] sm:$0xff]  ;;  %v7382_v49 = vld [vmem:[#allocation18_spill] sm:$0xff] }
 0x6dd   :  { %5348 = vrcp.f32 %v2451_v44  ;;  %v7381_v44 = vld [vmem:[#allocation17_spill] sm:$0xff] }
 0x6de   :  { %5350 = vrcp.f32 %v2458_v6  ;;  %v7387_v6 = vld [vmem:[#allocation23_spill] sm:$0xff] }
 0x6e6   :  { %v5347_v20 = vpop.eup %5346 }
 0x6e7   :  { %v5349_v51 = vpop.eup %5348  ;;  %v2462_v62 = vmul.f32 %v5347_v20, %v5345_v40  ;;  %v7383_v40 = vld [vmem:[#allocation19_spill] sm:$0xff]  ;;  %v7384_v20 = vld [vmem:[#allocation20_spill] sm:$0xff] }
 0x6e8   :  { %v2461_v26 = vmul.f32 %v5349_v51, %v6452_v13  ;;  %v5351_v9 = vpop.eup %5350  ;;  %v7375_v13 = vld [vmem:[#allocation11_spill] sm:$0xff]  ;;  %v7385_v51 = vld [vmem:[#allocation21_spill] sm:$0xff] }
 0x6ea   :  { %v6566_v4 = vadd.f32 %v2462_v62, %v2461_v26  ;;  %v7386_v62 = vld [vmem:[#allocation22_spill] sm:$0xff]  ;;  %v7388_v26 = vld [vmem:[#allocation24_spill] sm:$0xff] }
 0x6ec   :  { %5352 = vtanh.f32 %v6566_v4 }
 0x6f6   :  { %v5353_v14 = vpop.eup %5352 }
 0x6f7   :  { %v2465_v10 = vmul.f32 %v5353_v14, %v5351_v9  ;;  %v7389_v9 = vld [vmem:[#allocation25_spill] sm:$0xff]  ;;  %v7390_v14 = vld [vmem:[#allocation26_spill] sm:$0xff] }
 0x6f9   :  { %2531 = vmatmul.mubr.f32.vlgmr.msra.gmra.mrb[26].mxu0 %v2465_v10  ;;  %2602 = vmatmul.mubr.f32.vlgmr.msra.gmra.mrb[26].mxu1 %v2465_v10 }
 0x6fa   :  { %4702 = vmatpush1.bf16.msra.mxu0 %v5599_v22  ;;  %4734 = vmatpush1.bf16.msra.mxu1 %v5602_v25 }
 0x6fb   :  { %4704 = vmatprep.subr.bf16.mxu0 %v5606_v29  ;;  %4736 = vmatprep.subr.bf16.mxu1 %v5613_v34 }
 0x6fc   :  { %2703 = vmatprep.mubr.f32.mxu0 %v7077_v55  ;;  %2774 = vmatprep.mubr.f32.mxu1 %v7077_v55 }
 0x6fe   :  { %4706 = vmatpush1.bf16.msra.mxu0 %v5615_v35  ;;  %4738 = vmatpush1.bf16.msra.mxu1 %v5619_v38 }
 0x6ff   :  { %4708 = vmatprep.subr.bf16.mxu0 %v5623_v42  ;;  %4740 = vmatprep.subr.bf16.mxu1 %v5630_v47 }
 0x702   :  { %4710 = vmatpush1.bf16.msra.mxu0 %v5634_v50  ;;  %4742 = vmatpush1.bf16.msra.mxu1 %v5638_v54 }
 0x703   :  { %4712 = vmatprep.subr.bf16.mxu0 %v5642_v58  ;;  %4744 = vmatprep.subr.bf16.mxu1 %v5646_v61 }
 0x706   :  { %4714 = vmatpush1.bf16.msra.mxu0 %v5653_v2  ;;  %4746 = vmatpush1.bf16.msra.mxu1 %v5657_v5 }
 0x707   :  { %4716 = vmatprep.subr.bf16.mxu0 %v5661_v8  ;;  %4748 = vmatprep.subr.bf16.mxu1 %v5665_v11 }
 0x70a   :  { %4718 = vmatpush1.bf16.msra.mxu0 %v5672_v15  ;;  %4750 = vmatpush1.bf16.msra.mxu1 %v5676_v19 }
 0x70b   :  { %4720 = vmatprep.subr.bf16.mxu0 %v5680_v24  ;;  %4752 = vmatprep.subr.bf16.mxu1 %v5684_v28 }
 0x70e   :  { %4722 = vmatpush1.bf16.msra.mxu0 %v5691_v33  ;;  %4754 = vmatpush1.bf16.msra.mxu1 %v5695_v39 }
 0x70f   :  { %4724 = vmatprep.subr.bf16.mxu0 %v5699_v43  ;;  %4756 = vmatprep.subr.bf16.mxu1 %v5703_v46 }
 0x712   :  { %4726 = vmatpush1.bf16.msra.mxu0 %v5710_v52  ;;  %4758 = vmatpush1.bf16.msra.mxu1 %v5714_v56 }
 0x713   :  { %4728 = vmatprep.subr.bf16.mxu0 %v5718_v60  ;;  %4760 = vmatprep.subr.bf16.mxu1 %v5722_v1 }
 0x716   :  { %4730 = vmatpush1.bf16.msra.mxu0 %v5729_v7  ;;  %4762 = vmatpush1.bf16.msra.mxu1 %v5733_v12 }
 0x717   :  { %4764 = vmatprep.subr.bf16.mxu0 %v5737_v18  ;;  %4828 = vmatprep.subr.bf16.mxu1 %v5741_v27 }
 0x719   :  { %2704 = vmatmul.mubr.f32.vlgmr.msra.gmra.mrb[12].mxu0 %v2465_v10  ;;  %2775 = vmatmul.mubr.f32.vlgmr.msra.gmra.mrb[12].mxu1 %v2465_v10  ;;  %v7391_v10 = vld [vmem:[#allocation27_spill] sm:$0xff] }
 0x71a   :  { %4766 = vmatpush1.bf16.msra.mxu0 %v5745_v32  ;;  %4830 = vmatpush1.bf16.msra.mxu1 %v5749_v36 }
 0x71b   :  { %4768 = vmatprep.subr.bf16.mxu0 %v5751_v37  ;;  %4832 = vmatprep.subr.bf16.mxu1 %v5755_v45 }
 0x71e   :  { %4770 = vmatpush1.bf16.msra.mxu0 %v5761_v57  ;;  %4834 = vmatpush1.bf16.msra.mxu1 %v5765_v59 }
 0x71f   :  { %4772 = vmatprep.subr.bf16.mxu0 %v7375_v13  ;;  %4836 = vmatprep.subr.bf16.mxu1 %v7376_v53 }
 0x722   :  { %4774 = vmatpush1.bf16.msra.mxu0 %v7377_v16  ;;  %4838 = vmatpush1.bf16.msra.mxu1 %v7378_v23 }
 0x723   :  { %4776 = vmatprep.subr.bf16.mxu0 %v7379_v48  ;;  %4840 = vmatprep.subr.bf16.mxu1 %v7380_v0  ;;  %v7433_v0 = vld [vmem:[#allocation67_spill] sm:$0xff] }
 0x726   :  { %4778 = vmatpush1.bf16.msra.mxu0 %v7381_v44  ;;  %4842 = vmatpush1.bf16.msra.mxu1 %v7382_v49  ;;  %v7392_v44 = vld [vmem:[#allocation28_spill] sm:$0xff]  ;;  %v7393_v49 = vld [vmem:[#allocation29_spill] sm:$0xff] }
 0x727   :  { %4780 = vmatprep.subr.bf16.mxu0 %v7383_v40  ;;  %4844 = vmatprep.subr.bf16.mxu1 %v7384_v20  ;;  %v7394_v40 = vld [vmem:[#allocation30_spill] sm:$0xff]  ;;  %v7395_v20 = vld [vmem:[#allocation31_spill] sm:$0xff] }
 0x72a   :  { %4782 = vmatpush1.bf16.msra.mxu0 %v7385_v51  ;;  %4846 = vmatpush1.bf16.msra.mxu1 %v7386_v62  ;;  %v7396_v51 = vld [vmem:[#allocation32_spill] sm:$0xff]  ;;  %v7397_v62 = vld [vmem:[#allocation33_spill] sm:$0xff] }
 0x72b   :  { %4784 = vmatprep.subr.bf16.mxu0 %v7387_v6  ;;  %4848 = vmatprep.subr.bf16.mxu1 %v7388_v26  ;;  %v7398_v6 = vld [vmem:[#allocation34_spill] sm:$0xff]  ;;  %v7399_v26 = vld [vmem:[#allocation35_spill] sm:$0xff] }
 0x72e   :  { %4786 = vmatpush1.bf16.msra.mxu0 %v7389_v9  ;;  %4850 = vmatpush1.bf16.msra.mxu1 %v7390_v14  ;;  %v7400_v9 = vld [vmem:[#allocation36_spill] sm:$0xff]  ;;  %v7401_v14 = vld [vmem:[#allocation37_spill] sm:$0xff] }
 0x72f   :  { %4788 = vmatprep.subr.bf16.mxu0 %v7391_v10  ;;  %4852 = vmatprep.subr.bf16.mxu1 %v7392_v44  ;;  %v7402_v10 = vld [vmem:[#allocation38_spill] sm:$0xff]  ;;  %v7403_v44 = vld [vmem:[#allocation39_spill] sm:$0xff] }
 0x732   :  { %4790 = vmatpush1.bf16.msra.mxu0 %v7393_v49  ;;  %4854 = vmatpush1.bf16.msra.mxu1 %v7394_v40  ;;  %v7404_v49 = vld [vmem:[#allocation40_spill] sm:$0xff]  ;;  %v7405_v40 = vld [vmem:[#allocation41_spill] sm:$0xff] }
 0x733   :  { %4792 = vmatprep.subr.bf16.mxu0 %v7395_v20  ;;  %4856 = vmatprep.subr.bf16.mxu1 %v7396_v51  ;;  %v7406_v20 = vld [vmem:[#allocation42_spill] sm:$0xff]  ;;  %v7407_v51 = vld [vmem:[#allocation43_spill] sm:$0xff] }
 0x736   :  { %4794 = vmatpush1.bf16.msra.mxu0 %v7397_v62  ;;  %4858 = vmatpush1.bf16.msra.mxu1 %v7398_v6  ;;  %v7408_v62 = vld [vmem:[#allocation44_spill] sm:$0xff]  ;;  %v7409_v6 = vld [vmem:[#allocation45_spill] sm:$0xff] }
 0x737   :  { %4796 = vmatprep.subr.bf16.mxu0 %v7399_v26  ;;  %4860 = vmatprep.subr.bf16.mxu1 %v7400_v9  ;;  %v7410_v26 = vld [vmem:[#allocation46_spill] sm:$0xff]  ;;  %v7411_v9 = vld [vmem:[#allocation47_spill] sm:$0xff] }
 0x73a   :  { %4798 = vmatpush1.bf16.msra.mxu0 %v7401_v14  ;;  %4862 = vmatpush1.bf16.msra.mxu1 %v7402_v10  ;;  %v7412_v14 = vld [vmem:[#allocation48_spill] sm:$0xff]  ;;  %v7413_v10 = vld [vmem:[#allocation49_spill] sm:$0xff] }
 0x73b   :  { %4800 = vmatprep.subr.bf16.mxu0 %v7403_v44  ;;  %4864 = vmatprep.subr.bf16.mxu1 %v7404_v49  ;;  %v7414_v44 = vld [vmem:[#allocation50_spill] sm:$0xff]  ;;  %v7415_v49 = vld [vmem:[#allocation51_spill] sm:$0xff] }
 0x73e   :  { %4802 = vmatpush1.bf16.msra.mxu0 %v7405_v40  ;;  %4866 = vmatpush1.bf16.msra.mxu1 %v7406_v20  ;;  %v7416_v40 = vld [vmem:[#allocation52_spill] sm:$0xff]  ;;  %v7417_v20 = vld [vmem:[#allocation53_spill] sm:$0xff] }
 0x73f   :  { %4804 = vmatprep.subr.bf16.mxu0 %v7407_v51  ;;  %4868 = vmatprep.subr.bf16.mxu1 %v7408_v62  ;;  %v7418_v51 = vld [vmem:[#allocation54_spill] sm:$0xff]  ;;  %v7419_v62 = vld [vmem:[#allocation55_spill] sm:$0xff] }
 0x742   :  { %4806 = vmatpush1.bf16.msra.mxu0 %v7409_v6  ;;  %4870 = vmatpush1.bf16.msra.mxu1 %v7410_v26  ;;  %v7420_v6 = vld [vmem:[#allocation56_spill] sm:$0xff]  ;;  %v7421_v26 = vld [vmem:[#allocation57_spill] sm:$0xff] }
 0x743   :  { %4808 = vmatprep.subr.bf16.mxu0 %v7411_v9  ;;  %4872 = vmatprep.subr.bf16.mxu1 %v7412_v14  ;;  %v7422_v9 = vld [vmem:[#allocation58_spill] sm:$0xff]  ;;  %v7423_v14 = vld [vmem:[#allocation59_spill] sm:$0xff] }
 0x746   :  { %4810 = vmatpush1.bf16.msra.mxu0 %v7413_v10  ;;  %4874 = vmatpush1.bf16.msra.mxu1 %v7414_v44  ;;  %v7424_v10 = vld [vmem:[#allocation60_spill] sm:$0xff]  ;;  %v7425_v44 = vld [vmem:[#allocation61_spill] sm:$0xff] }
 0x747   :  { %4812 = vmatprep.subr.bf16.mxu0 %v7415_v49  ;;  %4876 = vmatprep.subr.bf16.mxu1 %v7416_v40  ;;  %v7426_v49 = vld [vmem:[#allocation62_spill] sm:$0xff]  ;;  %v7427_v40 = vld [vmem:[#allocation63_spill] sm:$0xff] }
 0x74a   :  { %4814 = vmatpush1.bf16.msra.mxu0 %v7417_v20  ;;  %4878 = vmatpush1.bf16.msra.mxu1 %v7418_v51  ;;  %v7428_v20 = vld [vmem:[#allocation64_spill] sm:$0xff]  ;;  %v7429_v51 = vld [vmem:[#allocation65_spill] sm:$0xff] }
 0x74b   :  { %4816 = vmatprep.subr.bf16.mxu0 %v7419_v62  ;;  %4880 = vmatprep.subr.bf16.mxu1 %v7420_v6  ;;  %v7430_v62 = vld [vmem:[#allocation66_spill] sm:$0xff]  ;;  %v7431_v6 = vld [vmem:[#allocation9_spill] sm:$0xff] }
 0x74e   :  { %4818 = vmatpush1.bf16.msra.mxu0 %v7421_v26  ;;  %4882 = vmatpush1.bf16.msra.mxu1 %v7422_v9  ;;  %v7432_v26 = vld [vmem:[#allocation10_spill] sm:$0xff] }
 0x74f   :  { %4820 = vmatprep.subr.bf16.mxu0 %v7423_v14  ;;  %4884 = vmatprep.subr.bf16.mxu1 %v7424_v10 }
 0x752   :  { %4822 = vmatpush1.bf16.msra.mxu0 %v7425_v44  ;;  %4886 = vmatpush1.bf16.msra.mxu1 %v7426_v49 }
 0x753   :  { %4824 = vmatprep.subr.bf16.mxu0 %v7427_v40  ;;  %4888 = vmatprep.subr.bf16.mxu1 %v7428_v20  ;;  %v7434_v20 = vld [vmem:[#allocation72_spill] sm:$0xff] }
 0x756   :  { %4826 = vmatpush1.bf16.msra.mxu0 %v7429_v51  ;;  %4890 = vmatpush1.bf16.msra.mxu1 %v7430_v62 }
 0x757   :  { %4892 = vmatprep.subr.bf16.mxu0 %v7431_v6  ;;  %4924 = vmatprep.subr.bf16.mxu1 %v7432_v26 }
 0x7cc   :  { %v2532_v9 = vpop.f32.mrb[26].mxu0  ;;  %v2603_v14 = vpop.f32.mrb[26].mxu1 }
 0x7cd   :  { %v2533_v10 = vadd.f32 %v7433_v0, %v2532_v9  ;;  %v2534_v48 = vpop.f32.mrb[27].mxu0  ;;  %v2605_v44 = vpop.f32.mrb[27].mxu1  ;;  %v2604_v62 = vadd.f32 %v6440_v41, %v2603_v14 }
 0x7ce   :  { %v2535_v49 = vadd.f32 %v7373_v21, %v2534_v48  ;;  %v2606_v51 = vadd.f32 %v7434_v20, %v2605_v44 }
 0x7cf   :  { %v3471_v23 = vmul.f32 -1.442695, %v2533_v10 }
 0x7d0   :  { %v3472_v40 = vmul.f32 -1.442695, %v2535_v49  ;;  %v3473_v16 = vmul.f32 -1.442695, %v2606_v51 }
 0x7d1   :  { %5354 = vpow2.f32 %v3471_v23 }
 0x7d2   :  { %5356 = vpow2.f32 %v3472_v40 }
 0x7d3   :  { %5358 = vpow2.f32 %v3473_v16 }
 0x7d4   :  { %5360 = vtanh.f32 %v2604_v62 }
 0x7db   :  { %v5355_v6 = vpop.eup %5354 }
 0x7dc   :  { %v5357_v53 = vpop.eup %5356  ;;  %v2611_v26 = vadd.f32 1.0, %v5355_v6 }
 0x7dd   :  { %v2617_v13 = vadd.f32 1.0, %v5357_v53  ;;  %v5359_v0 = vpop.eup %5358 }
 0x7de   :  { %5362 = vrcp.f32 %v2611_v26  ;;  %v5361_v9 = vpop.eup %5360  ;;  %v2624_v23 = vadd.f32 1.0, %v5359_v0 }
 0x7df   :  { %5364 = vrcp.f32 %v2617_v13 }
 0x7e0   :  { %5366 = vrcp.f32 %v2624_v23 }
 0x7e8   :  { %v5363_v21 = vpop.eup %5362 }
 0x7e9   :  { %v5365_v48 = vpop.eup %5364  ;;  %v2628_v49 = vmul.f32 %v5363_v21, %v5361_v9 }
 0x7ea   :  { %v2627_v40 = vmul.f32 %v5365_v48, %v6558_v30  ;;  %v5367_v30 = vpop.eup %5366 }
 0x7ec   :  { %v2705_v44 = vpop.f32.mrb[12].mxu0  ;;  %v2776_v20 = vpop.f32.mrb[12].mxu1  ;;  %v6672_v51 = vadd.f32 %v2628_v49, %v2627_v40 }
 0x7ed   :  { %v5119_v41 = vadd.f32 %v2705_v44, %v7134_v31  ;;  %v2707_v16 = vpop.f32.mrb[13].mxu0  ;;  %v2778_v62 = vpop.f32.mrb[13].mxu1  ;;  %v5135_v0 = vadd.f32 %v2776_v20, %v5954_v63 }
 0x7ee   :  { %v5120_v53 = vadd.f32 %v2707_v16, %v5947_v3  ;;  %5368 = vtanh.f32 %v6672_v51  ;;  %v5136_v10 = vadd.f32 %v2778_v62, %v7254_v17 }
 0x7ef   :  { %v3474_v13 = vmul.f32 -1.442695, %v5119_v41 }
 0x7f0   :  { %v3475_v14 = vmul.f32 -1.442695, %v5120_v53  ;;  %v3476_v26 = vmul.f32 -1.442695, %v5136_v10 }
 0x7f1   :  { %5370 = vpow2.f32 %v3474_v13 }
 0x7f2   :  { %5372 = vpow2.f32 %v3475_v14 }
 0x7f3   :  { %5374 = vpow2.f32 %v3476_v26  ;;  %v7475_v26 = vld [vmem:[#allocation51_spill] sm:$0xff] }
 0x7f4   :  { %5376 = vtanh.f32 %v5135_v0  ;;  %v7476_v0 = vld [vmem:[#allocation52_spill] sm:$0xff] }
 0x7f8   :  { %v5369_v6 = vpop.eup %5368 }
 0x7f9   :  { %v2631_v9 = vmul.f32 %v5369_v6, %v5367_v30  ;;  %v7474_v6 = vld [vmem:[#allocation50_spill] sm:$0xff] }
 0x7fb   :  { %v5371_v21 = vpop.eup %5370  ;;  %2873 = vmatprep.mubr.f32.mxu0 %v2631_v9  ;;  %2944 = vmatprep.mubr.f32.mxu1 %v2631_v9  ;;  %v7477_v9 = vld [vmem:[#allocation53_spill] sm:$0xff] }
 0x7fc   :  { %v5373_v48 = vpop.eup %5372  ;;  %v2788_v49 = vadd.f32 1.0, %v5371_v21  ;;  %v7478_v21 = vld [vmem:[#allocation54_spill] sm:$0xff] }
 0x7fd   :  { %v2794_v23 = vadd.f32 1.0, %v5373_v48  ;;  %v5375_v40 = vpop.eup %5374  ;;  %v7479_v48 = vld [vmem:[#allocation55_spill] sm:$0xff] }
 0x7fe   :  { %5378 = vrcp.f32 %v2788_v49  ;;  %v5377_v44 = vpop.eup %5376  ;;  %v2801_v53 = vadd.f32 1.0, %v5375_v40  ;;  %v7480_v49 = vld [vmem:[#allocation56_spill] sm:$0xff]  ;;  %v7482_v40 = vld [vmem:[#allocation58_spill] sm:$0xff] }
 0x7ff   :  { %5380 = vrcp.f32 %v2794_v23  ;;  %v7481_v23 = vld [vmem:[#allocation57_spill] sm:$0xff] }
 0x800   :  { %5382 = vrcp.f32 %v2801_v53  ;;  %v7487_v53 = vld [vmem:[#allocation63_spill] sm:$0xff] }
 0x808   :  { %v5379_v41 = vpop.eup %5378 }
 0x809   :  { %v5381_v16 = vpop.eup %5380  ;;  %v2805_v62 = vmul.f32 %v5379_v41, %v5377_v44  ;;  %v7483_v44 = vld [vmem:[#allocation59_spill] sm:$0xff]  ;;  %v7484_v41 = vld [vmem:[#allocation60_spill] sm:$0xff] }
 0x80a   :  { %v2804_v13 = vmul.f32 %v5381_v16, %v6566_v4  ;;  %v5383_v14 = vpop.eup %5382  ;;  %v7473_v4 = vld [vmem:[#allocation49_spill] sm:$0xff] }
 0x80b   :  { %v7485_v16 = vld [vmem:[#allocation61_spill] sm:$0xff] }
 0x80c   :  { %v6680_v20 = vadd.f32 %v2805_v62, %v2804_v13  ;;  %v7486_v62 = vld [vmem:[#allocation62_spill] sm:$0xff]  ;;  %v7488_v13 = vld [vmem:[#allocation64_spill] sm:$0xff] }
 0x80e   :  { %5384 = vtanh.f32 %v6680_v20 }
 0x818   :  { %v5385_v10 = vpop.eup %5384 }
 0x819   :  { %v2808_v30 = vmul.f32 %v5385_v10, %v5383_v14  ;;  %v7489_v14 = vld [vmem:[#allocation65_spill] sm:$0xff]  ;;  %v7490_v10 = vld [vmem:[#allocation66_spill] sm:$0xff] }
 0x81b   :  { %2874 = vmatmul.mubr.f32.vlgmr.msra.gmra.mrb[28].mxu0 %v2808_v30  ;;  %2945 = vmatmul.mubr.f32.vlgmr.msra.gmra.mrb[28].mxu1 %v2808_v30 }
 0x81c   :  { %4894 = vmatpush1.bf16.msra.mxu0 %v5599_v22  ;;  %4926 = vmatpush1.bf16.msra.mxu1 %v5602_v25  ;;  %v7435_v22 = vld [vmem:[#allocation11_spill] sm:$0xff]  ;;  %v7436_v25 = vld [vmem:[#allocation12_spill] sm:$0xff] }
 0x81d   :  { %4896 = vmatprep.subr.bf16.mxu0 %v5606_v29  ;;  %4928 = vmatprep.subr.bf16.mxu1 %v5613_v34  ;;  %v7437_v29 = vld [vmem:[#allocation13_spill] sm:$0xff]  ;;  %v7438_v34 = vld [vmem:[#allocation14_spill] sm:$0xff] }
 0x81e   :  { %3046 = vmatprep.mubr.f32.mxu0 %v7077_v55  ;;  %3117 = vmatprep.mubr.f32.mxu1 %v7077_v55 }
 0x820   :  { %4898 = vmatpush1.bf16.msra.mxu0 %v5615_v35  ;;  %4930 = vmatpush1.bf16.msra.mxu1 %v5619_v38  ;;  %v7439_v35 = vld [vmem:[#allocation15_spill] sm:$0xff]  ;;  %v7440_v38 = vld [vmem:[#allocation16_spill] sm:$0xff] }
 0x821   :  { %4900 = vmatprep.subr.bf16.mxu0 %v5623_v42  ;;  %4932 = vmatprep.subr.bf16.mxu1 %v5630_v47  ;;  %v7441_v42 = vld [vmem:[#allocation17_spill] sm:$0xff]  ;;  %v7442_v47 = vld [vmem:[#allocation18_spill] sm:$0xff] }
 0x824   :  { %4902 = vmatpush1.bf16.msra.mxu0 %v5634_v50  ;;  %4934 = vmatpush1.bf16.msra.mxu1 %v5638_v54  ;;  %v7443_v50 = vld [vmem:[#allocation19_spill] sm:$0xff]  ;;  %v7444_v54 = vld [vmem:[#allocation20_spill] sm:$0xff] }
 0x825   :  { %4904 = vmatprep.subr.bf16.mxu0 %v5642_v58  ;;  %4936 = vmatprep.subr.bf16.mxu1 %v5646_v61  ;;  %v7445_v58 = vld [vmem:[#allocation21_spill] sm:$0xff]  ;;  %v7446_v61 = vld [vmem:[#allocation22_spill] sm:$0xff] }
 0x828   :  { %4906 = vmatpush1.bf16.msra.mxu0 %v5653_v2  ;;  %4938 = vmatpush1.bf16.msra.mxu1 %v5657_v5  ;;  %v7447_v2 = vld [vmem:[#allocation23_spill] sm:$0xff]  ;;  %v7448_v5 = vld [vmem:[#allocation24_spill] sm:$0xff] }
 0x829   :  { %4908 = vmatprep.subr.bf16.mxu0 %v5661_v8  ;;  %4940 = vmatprep.subr.bf16.mxu1 %v5665_v11  ;;  %v7449_v8 = vld [vmem:[#allocation25_spill] sm:$0xff]  ;;  %v7450_v11 = vld [vmem:[#allocation26_spill] sm:$0xff] }
 0x82c   :  { %4910 = vmatpush1.bf16.msra.mxu0 %v5672_v15  ;;  %4942 = vmatpush1.bf16.msra.mxu1 %v5676_v19  ;;  %v7451_v15 = vld [vmem:[#allocation27_spill] sm:$0xff]  ;;  %v7452_v19 = vld [vmem:[#allocation28_spill] sm:$0xff] }
 0x82d   :  { %4912 = vmatprep.subr.bf16.mxu0 %v5680_v24  ;;  %4944 = vmatprep.subr.bf16.mxu1 %v5684_v28  ;;  %v7453_v24 = vld [vmem:[#allocation29_spill] sm:$0xff]  ;;  %v7454_v28 = vld [vmem:[#allocation30_spill] sm:$0xff] }
 0x830   :  { %4914 = vmatpush1.bf16.msra.mxu0 %v5691_v33  ;;  %4946 = vmatpush1.bf16.msra.mxu1 %v5695_v39  ;;  %v7455_v33 = vld [vmem:[#allocation31_spill] sm:$0xff]  ;;  %v7456_v39 = vld [vmem:[#allocation32_spill] sm:$0xff] }
 0x831   :  { %4916 = vmatprep.subr.bf16.mxu0 %v5699_v43  ;;  %4948 = vmatprep.subr.bf16.mxu1 %v5703_v46  ;;  %v7457_v43 = vld [vmem:[#allocation33_spill] sm:$0xff]  ;;  %v7458_v46 = vld [vmem:[#allocation34_spill] sm:$0xff] }
 0x834   :  { %4918 = vmatpush1.bf16.msra.mxu0 %v5710_v52  ;;  %4950 = vmatpush1.bf16.msra.mxu1 %v5714_v56  ;;  %v7459_v52 = vld [vmem:[#allocation35_spill] sm:$0xff]  ;;  %v7460_v56 = vld [vmem:[#allocation36_spill] sm:$0xff] }
 0x835   :  { %4920 = vmatprep.subr.bf16.mxu0 %v5718_v60  ;;  %4952 = vmatprep.subr.bf16.mxu1 %v5722_v1  ;;  %v7461_v60 = vld [vmem:[#allocation37_spill] sm:$0xff]  ;;  %v7462_v1 = vld [vmem:[#allocation38_spill] sm:$0xff] }
 0x838   :  { %4922 = vmatpush1.bf16.msra.mxu0 %v5729_v7  ;;  %4954 = vmatpush1.bf16.msra.mxu1 %v5733_v12  ;;  %v7463_v7 = vld [vmem:[#allocation39_spill] sm:$0xff]  ;;  %v7464_v12 = vld [vmem:[#allocation40_spill] sm:$0xff] }
 0x839   :  { %4956 = vmatprep.subr.bf16.mxu0 %v5737_v18  ;;  %5020 = vmatprep.subr.bf16.mxu1 %v5741_v27  ;;  %v7465_v18 = vld [vmem:[#allocation41_spill] sm:$0xff]  ;;  %v7466_v27 = vld [vmem:[#allocation42_spill] sm:$0xff] }
 0x83b   :  { %3047 = vmatmul.mubr.f32.vlgmr.msra.gmra.mrb[14].mxu0 %v2808_v30  ;;  %3118 = vmatmul.mubr.f32.vlgmr.msra.gmra.mrb[14].mxu1 %v2808_v30 }
 0x83c   :  { %4958 = vmatpush1.bf16.msra.mxu0 %v5745_v32  ;;  %5022 = vmatpush1.bf16.msra.mxu1 %v5749_v36  ;;  %v7467_v32 = vld [vmem:[#allocation43_spill] sm:$0xff]  ;;  %v7468_v36 = vld [vmem:[#allocation44_spill] sm:$0xff] }
 0x83d   :  { %4960 = vmatprep.subr.bf16.mxu0 %v5751_v37  ;;  %5024 = vmatprep.subr.bf16.mxu1 %v5755_v45  ;;  %v7469_v37 = vld [vmem:[#allocation45_spill] sm:$0xff]  ;;  %v7470_v45 = vld [vmem:[#allocation46_spill] sm:$0xff] }
 0x840   :  { %4962 = vmatpush1.bf16.msra.mxu0 %v5761_v57  ;;  %5026 = vmatpush1.bf16.msra.mxu1 %v5765_v59  ;;  %v7471_v57 = vld [vmem:[#allocation47_spill] sm:$0xff]  ;;  %v7472_v59 = vld [vmem:[#allocation48_spill] sm:$0xff] }
 0x841   :  { %4964 = vmatprep.subr.bf16.mxu0 %v7435_v22  ;;  %5028 = vmatprep.subr.bf16.mxu1 %v7436_v25  ;;  %v6782_v25 = vld [vmem:[%s6877_s5] sm:$0xff] }
 0x844   :  { %4966 = vmatpush1.bf16.msra.mxu0 %v7437_v29  ;;  %5030 = vmatpush1.bf16.msra.mxu1 %v7438_v34 }
 0x845   :  { %4968 = vmatprep.subr.bf16.mxu0 %v7439_v35  ;;  %5032 = vmatprep.subr.bf16.mxu1 %v7440_v38  ;;  %v6788_v38 = vld [vmem:[%s6877_s5 + $0x8] sm:$0xff] }
 0x848   :  { %4970 = vmatpush1.bf16.msra.mxu0 %v7441_v42  ;;  %5034 = vmatpush1.bf16.msra.mxu1 %v7442_v47 }
 0x849   :  { %4972 = vmatprep.subr.bf16.mxu0 %v7443_v50  ;;  %5036 = vmatprep.subr.bf16.mxu1 %v7444_v54  ;;  %v6794_v54 = vld [vmem:[%s6877_s5 + $0x18] sm:$0xff] }
 0x84c   :  { %4974 = vmatpush1.bf16.msra.mxu0 %v7445_v58  ;;  %5038 = vmatpush1.bf16.msra.mxu1 %v7446_v61 }
 0x84d   :  { %4976 = vmatprep.subr.bf16.mxu0 %v7447_v2  ;;  %5040 = vmatprep.subr.bf16.mxu1 %v7448_v5  ;;  %v6800_v2 = vld [vmem:[%s6877_s5 + $0x10] sm:$0xff] }
 0x850   :  { %4978 = vmatpush1.bf16.msra.mxu0 %v7449_v8  ;;  %5042 = vmatpush1.bf16.msra.mxu1 %v7450_v11 }
 0x851   :  { %4980 = vmatprep.subr.bf16.mxu0 %v7451_v15  ;;  %5044 = vmatprep.subr.bf16.mxu1 %v7452_v19 }
 0x854   :  { %4982 = vmatpush1.bf16.msra.mxu0 %v7453_v24  ;;  %5046 = vmatpush1.bf16.msra.mxu1 %v7454_v28 }
 0x855   :  { %4984 = vmatprep.subr.bf16.mxu0 %v7455_v33  ;;  %5048 = vmatprep.subr.bf16.mxu1 %v7456_v39 }
 0x858   :  { %4986 = vmatpush1.bf16.msra.mxu0 %v7457_v43  ;;  %5050 = vmatpush1.bf16.msra.mxu1 %v7458_v46 }
 0x859   :  { %4988 = vmatprep.subr.bf16.mxu0 %v7459_v52  ;;  %5052 = vmatprep.subr.bf16.mxu1 %v7460_v56 }
 0x85c   :  { %4990 = vmatpush1.bf16.msra.mxu0 %v7461_v60  ;;  %5054 = vmatpush1.bf16.msra.mxu1 %v7462_v1 }
 0x85d   :  { %4992 = vmatprep.subr.bf16.mxu0 %v7463_v7  ;;  %5056 = vmatprep.subr.bf16.mxu1 %v7464_v12 }
 0x860   :  { %4994 = vmatpush1.bf16.msra.mxu0 %v7465_v18  ;;  %5058 = vmatpush1.bf16.msra.mxu1 %v7466_v27 }
 0x861   :  { %4996 = vmatprep.subr.bf16.mxu0 %v7467_v32  ;;  %5060 = vmatprep.subr.bf16.mxu1 %v7468_v36 }
 0x864   :  { %4998 = vmatpush1.bf16.msra.mxu0 %v7469_v37  ;;  %5062 = vmatpush1.bf16.msra.mxu1 %v7470_v45 }
 0x865   :  { %5000 = vmatprep.subr.bf16.mxu0 %v7471_v57  ;;  %5064 = vmatprep.subr.bf16.mxu1 %v7472_v59 }
 0x868   :  { %5002 = vmatpush1.bf16.msra.mxu0 %v7473_v4  ;;  %5066 = vmatpush1.bf16.msra.mxu1 %v7474_v6 }
 0x869   :  { %5004 = vmatprep.subr.bf16.mxu0 %v7475_v26  ;;  %5068 = vmatprep.subr.bf16.mxu1 %v7476_v0 }
 0x86c   :  { %5006 = vmatpush1.bf16.msra.mxu0 %v7477_v9  ;;  %5070 = vmatpush1.bf16.msra.mxu1 %v7478_v21 }
 0x86d   :  { %5008 = vmatprep.subr.bf16.mxu0 %v7479_v48  ;;  %5072 = vmatprep.subr.bf16.mxu1 %v7480_v49 }
 0x870   :  { %5010 = vmatpush1.bf16.msra.mxu0 %v7481_v23  ;;  %5074 = vmatpush1.bf16.msra.mxu1 %v7482_v40 }
 0x871   :  { %5012 = vmatprep.subr.bf16.mxu0 %v7483_v44  ;;  %5076 = vmatprep.subr.bf16.mxu1 %v7484_v41 }
 0x874   :  { %5014 = vmatpush1.bf16.msra.mxu0 %v7485_v16  ;;  %5078 = vmatpush1.bf16.msra.mxu1 %v7486_v62  ;;  %v3318_v16 = vld [vmem:[%s6878_s6] sm:$0xff]  ;;  %v3319_v62 = vld [vmem:[%s6878_s6 + $0x8] sm:$0xff] }
 0x875   :  { %5016 = vmatprep.subr.bf16.mxu0 %v7487_v53  ;;  %5080 = vmatprep.subr.bf16.mxu1 %v7488_v13  ;;  %v5084_v53 = vpack.c.bf16 %v3319_v62, %v3318_v16  ;;  %v5495_v13 = vmov 0.0|0.0  }
 0x878   :  { %5018 = vmatpush1.bf16.msra.mxu0 %v7489_v14  ;;  %5082 = vmatpush1.bf16.msra.mxu1 %v7490_v10  ;;  %v3321_v14 = vld [vmem:[%s6878_s6 + $0x18] sm:$0xff] }
 0x879   :  { %5083 = vmatprep.subr.bf16.mxu0 %v5495_v13 }
 0x8ee   :  { %v2875_v30 = vpop.f32.mrb[28].mxu0  ;;  %v2946_v22 = vpop.f32.mrb[28].mxu1 }
 0x8ef   :  { %v2876_v29 = vadd.f32 %v6782_v25, %v2875_v30  ;;  %v2877_v34 = vpop.f32.mrb[29].mxu0  ;;  %v2948_v35 = vpop.f32.mrb[29].mxu1  ;;  %v2947_v5 = vadd.f32 %v6800_v2, %v2946_v22  ;;  %v3322_v30 = vld [vmem:[%s6878_s6 + $0x20] sm:$0xff]  ;;  %v3323_v22 = vld [vmem:[%s6878_s6 + $0x28] sm:$0xff] }
 0x8f0   :  { %v2878_v42 = vadd.f32 %v6788_v38, %v2877_v34  ;;  %v2949_v58 = vadd.f32 %v6794_v54, %v2948_v35  ;;  %v3324_v34 = vld [vmem:[%s6878_s6 + $0x30] sm:$0xff]  ;;  %v3325_v35 = vld [vmem:[%s6878_s6 + $0x38] sm:$0xff] }
 0x8f1   :  { %v3477_v47 = vmul.f32 -1.442695, %v2876_v29  ;;  %v5090_v29 = vpack.c.bf16 %v3323_v22, %v3322_v30 }
 0x8f2   :  { %v3478_v50 = vmul.f32 -1.442695, %v2878_v42  ;;  %v3479_v61 = vmul.f32 -1.442695, %v2949_v58  ;;  %v5093_v42 = vpack.c.bf16 %v3325_v35, %v3324_v34 }
 0x8f3   :  { %5386 = vpow2.f32 %v3477_v47  ;;  %v3326_v47 = vld [vmem:[%s6878_s6 + $0x40] sm:$0xff] }
 0x8f4   :  { %5388 = vpow2.f32 %v3478_v50  ;;  %v3327_v50 = vld [vmem:[%s6878_s6 + $0x48] sm:$0xff] }
 0x8f5   :  { %5390 = vpow2.f32 %v3479_v61  ;;  %v5096_v58 = vpack.c.bf16 %v3327_v50, %v3326_v47  ;;  %v3328_v61 = vld [vmem:[%s6878_s6 + $0x50] sm:$0xff] }
 0x8f6   :  { %5392 = vtanh.f32 %v2947_v5  ;;  %v3329_v5 = vld [vmem:[%s6878_s6 + $0x58] sm:$0xff] }
 0x8fd   :  { %v5387_v8 = vpop.eup %5386 }
 0x8fe   :  { %v5389_v11 = vpop.eup %5388  ;;  %v2954_v15 = vadd.f32 1.0, %v5387_v8  ;;  %v3330_v8 = vld [vmem:[%s6878_s6 + $0x60] sm:$0xff] }
 0x8ff   :  { %v2960_v19 = vadd.f32 1.0, %v5389_v11  ;;  %v5391_v24 = vpop.eup %5390  ;;  %v5099_v11 = vpack.c.bf16 %v3329_v5, %v3328_v61 }
 0x900   :  { %5394 = vrcp.f32 %v2954_v15  ;;  %v5393_v28 = vpop.eup %5392  ;;  %v2967_v46 = vadd.f32 1.0, %v5391_v24  ;;  %v3331_v15 = vld [vmem:[%s6878_s6 + $0x68] sm:$0xff]  ;;  %v3332_v24 = vld [vmem:[%s6878_s6 + $0x70] sm:$0xff] }
 0x901   :  { %5396 = vrcp.f32 %v2960_v19  ;;  %v5102_v19 = vpack.c.bf16 %v3331_v15, %v3330_v8 }
 0x902   :  { %5398 = vrcp.f32 %v2967_v46 }
 0x90a   :  { %v5395_v33 = vpop.eup %5394 }
 0x90b   :  { %v5397_v39 = vpop.eup %5396  ;;  %v2971_v43 = vmul.f32 %v5395_v33, %v5393_v28  ;;  %v3333_v28 = vld [vmem:[%s6878_s6 + $0x78] sm:$0xff] }
 0x90c   :  { %v2970_v52 = vmul.f32 %v5397_v39, %v6672_v51  ;;  %v5399_v51 = vpop.eup %5398  ;;  %v5105_v33 = vpack.c.bf16 %v3333_v28, %v3332_v24 }
 0x90e   :  { %v3048_v56 = vpop.f32.mrb[14].mxu0  ;;  %v3119_v60 = vpop.f32.mrb[14].mxu1  ;;  %v6804_v1 = vadd.f32 %v2971_v43, %v2970_v52 }
 0x90f   :  { %v5121_v7 = vadd.f32 %v3048_v56, %v7134_v31  ;;  %v3050_v12 = vpop.f32.mrb[15].mxu0  ;;  %v3121_v18 = vpop.f32.mrb[15].mxu1  ;;  %v5137_v59 = vadd.f32 %v3119_v60, %v5954_v63 }
 0x910   :  { %v5122_v27 = vadd.f32 %v3050_v12, %v5947_v3  ;;  %5400 = vtanh.f32 %v6804_v1  ;;  %v5138_v37 = vadd.f32 %v3121_v18, %v7254_v17 }
 0x911   :  { %v3480_v32 = vmul.f32 -1.442695, %v5121_v7 }
 0x912   :  { %v3481_v36 = vmul.f32 -1.442695, %v5122_v27  ;;  %v3482_v57 = vmul.f32 -1.442695, %v5138_v37 }
 0x913   :  { %5402 = vpow2.f32 %v3480_v32 }
 0x914   :  { %5404 = vpow2.f32 %v3481_v36 }
 0x915   :  { %5406 = vpow2.f32 %v3482_v57 }
 0x916   :  { %5408 = vtanh.f32 %v5137_v59 }
 0x91a   :  { %v5401_v45 = vpop.eup %5400 }
 0x91b   :  { %v2974_v4 = vmul.f32 %v5401_v45, %v5399_v51 }
 0x91d   :  { %v5403_v6 = vpop.eup %5402  ;;  %3216 = vmatprep.mubr.f32.mxu0 %v2974_v4  ;;  %3287 = vmatprep.mubr.f32.mxu1 %v2974_v4 }
 0x91e   :  { %v5405_v31 = vpop.eup %5404  ;;  %v3131_v26 = vadd.f32 1.0, %v5403_v6 }
 0x91f   :  { %v3137_v3 = vadd.f32 1.0, %v5405_v31  ;;  %v5407_v0 = vpop.eup %5406 }
 0x920   :  { %5410 = vrcp.f32 %v3131_v26  ;;  %v5409_v9 = vpop.eup %5408  ;;  %v3144_v49 = vadd.f32 1.0, %v5407_v0 }
 0x921   :  { %5412 = vrcp.f32 %v3137_v3  ;;  %v3334_v3 = vld [vmem:[%s6879_s7] sm:$0xff] }
 0x922   :  { %5414 = vrcp.f32 %v3144_v49 }
 0x92a   :  { %v5411_v21 = vpop.eup %5410 }
 0x92b   :  { %v5413_v17 = vpop.eup %5412  ;;  %v3148_v48 = vmul.f32 %v5411_v21, %v5409_v9 }
 0x92c   :  { %v3147_v23 = vmul.f32 %v5413_v17, %v6680_v20  ;;  %v5415_v40 = vpop.eup %5414  ;;  %v3320_v20 = vld [vmem:[%s6878_s6 + $0x10] sm:$0xff] }
 0x92d   :  { %v5087_v10 = vpack.c.bf16 %v3321_v14, %v3320_v20 }
 0x92e   :  { %v3149_v63 = vadd.f32 %v3148_v48, %v3147_v23 }
 0x930   :  { %5416 = vtanh.f32 %v3149_v63 }
 0x93a   :  { %v5417_v44 = vpop.eup %5416 }
 0x93b   :  { %v3151_v41 = vmul.f32 %v5417_v44, %v5415_v40 }
 0x93d   :  { %3217 = vmatmul.mubr.f32.vlgmr.msra.gmra.mrb[30].mxu0 %v3151_v41  ;;  %3288 = vmatmul.mubr.f32.vlgmr.msra.gmra.mrb[30].mxu1 %v3151_v41 }
 0x93e   :  { %5085 = vmatpush3.bf16.msra.mxu0 %v5084_v53  ;;  %3536 = vmatprep.mubr.msk.f32.mxu0 %vm5496_vm1, %v7077_v55 }
 0x93f   :  { %5086 = vmatprep.subr.bf16.mxu0 %v5495_v13 }
 0x942   :  { %5088 = vmatpush3.bf16.msra.mxu0 %v5087_v10 }
 0x943   :  { %5089 = vmatprep.subr.bf16.mxu0 %v5495_v13 }
 0x946   :  { %5091 = vmatpush3.bf16.msra.mxu0 %v5090_v29 }
 0x947   :  { %5092 = vmatprep.subr.bf16.mxu0 %v5495_v13 }
 0x94a   :  { %5094 = vmatpush3.bf16.msra.mxu0 %v5093_v42 }
 0x94b   :  { %5095 = vmatprep.subr.bf16.mxu0 %v5495_v13 }
 0x94e   :  { %5097 = vmatpush3.bf16.msra.mxu0 %v5096_v58 }
 0x94f   :  { %5098 = vmatprep.subr.bf16.mxu0 %v5495_v13 }
 0x952   :  { %5100 = vmatpush3.bf16.msra.mxu0 %v5099_v11 }
 0x953   :  { %5101 = vmatprep.subr.bf16.mxu0 %v5495_v13 }
 0x956   :  { %5103 = vmatpush3.bf16.msra.mxu0 %v5102_v19 }
 0x957   :  { %5104 = vmatprep.subr.bf16.mxu0 %v5495_v13 }
 0x95a   :  { %5106 = vmatpush3.bf16.msra.mxu0 %v5105_v33 }
 0xa10   :  { %v3218_v39 = vpop.f32.mrb[30].mxu0  ;;  %v3289_v43 = vpop.f32.mrb[30].mxu1 }
 0xa11   :  { %v3219_v46 = vadd.f32 %v6782_v25, %v3218_v39  ;;  %v3220_v55 = vpop.f32.mrb[31].mxu0  ;;  %v3291_v52 = vpop.f32.mrb[31].mxu1  ;;  %v3290_v27 = vadd.f32 %v6800_v2, %v3289_v43 }
 0xa12   :  { %v3221_v56 = vadd.f32 %v6788_v38, %v3220_v55  ;;  %v3292_v12 = vadd.f32 %v6794_v54, %v3291_v52 }
 0xa13   :  { %v3483_v60 = vmul.f32 -1.442695, %v3219_v46 }
 0xa14   :  { %v3484_v7 = vmul.f32 -1.442695, %v3221_v56  ;;  %v3485_v18 = vmul.f32 -1.442695, %v3292_v12 }
 0xa15   :  { %5418 = vpow2.f32 %v3483_v60 }
 0xa16   :  { %5420 = vpow2.f32 %v3484_v7 }
 0xa17   :  { %5422 = vpow2.f32 %v3485_v18 }
 0xa18   :  { %5424 = vtanh.f32 %v3290_v27 }
 0xa1f   :  { %v5419_v32 = vpop.eup %5418 }
 0xa20   :  { %v5421_v36 = vpop.eup %5420  ;;  %v3297_v37 = vadd.f32 1.0, %v5419_v32 }
 0xa21   :  { %v3303_v51 = vadd.f32 1.0, %v5421_v36  ;;  %v5423_v25 = vpop.eup %5422 }
 0xa22   :  { %5426 = vrcp.f32 %v3297_v37  ;;  %v5425_v45 = vpop.eup %5424  ;;  %v3310_v4 = vadd.f32 1.0, %v5423_v25 }
 0xa23   :  { %5428 = vrcp.f32 %v3303_v51 }
 0xa24   :  { %5430 = vrcp.f32 %v3310_v4 }
 0xa2c   :  { %v5427_v38 = vpop.eup %5426 }
 0xa2d   :  { %v5429_v57 = vpop.eup %5428  ;;  %v3314_v59 = vmul.f32 %v5427_v38, %v5425_v45 }
 0xa2e   :  { %v3313_v6 = vmul.f32 %v5429_v57, %v6804_v1  ;;  %v5431_v2 = vpop.eup %5430 }
 0xa30   :  { %v3315_v54 = vadd.f32 %v3314_v59, %v3313_v6 }
 0xa32   :  { %5432 = vtanh.f32 %v3315_v54 }
 0xa3c   :  { %v5433_v31 = vpop.eup %5432 }
 0xa3d   :  { %v3317_v26 = vmul.f32 %v5433_v31, %v5431_v2 }
 0xa3f   :  { %3537 = vmatmul.mubr.f32.vlgmr.msra.gmra.mrb[32].mxu0 %v3317_v26 }
 0xb12   :  { %v3401_v0 = vpop.f32.mrb[32].mxu0 }
 0xb13   :  { %v3402_v9 = vadd.f32 %v3401_v0, %v3334_v3  ;;  %v3538_v21 = vpop.f32.mrb[33].mxu0 }
 0xb15   :  { %v3486_v17 = vclamps-f32 %v3402_v9, 5.0 }
 0xb17   :  { %3408 = vst.msk [vmem:[%s6880_s8] sm:$0xff] %vm3407_vm2, %v3486_v17 }
 0xb18   :  { %3413 = vsyncpa [#allocation4], 1 }
 0xb19   :  { %3414 = vsyncpa [#allocation6], 1 }

</bundles_post_ra>
